<compile_context>
chip_gen: v7x
topology: tpu7x:2x2x1
jax: 0.10.0
libtpu: 0.0.40
codegen_flags: <defaults>
</compile_context>

<pallas_src>
import math
import numpy as np
import jax
import jax.numpy as jnp
from jax import lax
from jax.experimental import pallas as pl
from jax.experimental.pallas import tpu as pltpu

GROUPS = 8                 # nn.GroupNorm(8, out_channels)
EPS = 1e-5                 # torch GroupNorm default eps
_INV_SQRT2 = 1.0 / math.sqrt(2.0)


# ---------------------------------------------------------------------------
# Fused forward: cat -> ConvTranspose2d(2,2) -> 4x (Conv3x3 + GroupNorm + GELU)
# ---------------------------------------------------------------------------
def unet_up_forward(x_nchw, skip_nchw, params):
    N, Cx, H, W = x_nchw.shape
    Csk = skip_nchw.shape[1]
    Cin = Cx + Csk
    Cout = params["up_b"].shape[0]
    assert Cout % GROUPS == 0
    cg = Cout // GROUPS

    HW = H * W
    H2, W2 = 2 * H, 2 * W            # upsampled spatial size
    Hp, Wp = H2 + 2, W2 + 2          # +1-px zero border for the 3x3 convs
    L = Hp * Wp                      # flat padded spatial length (lane axis)
    HW2 = H2 * W2                    # de-padded output length (multiple of 128 when W2%8==0)
    # lane-aligned image start inside the haloed VMEM buffer; halos cover the Wp+1 tap reach
    IMG0 = ((Wp + 1 + 127) // 128) * 128
    Lext = 2 * IMG0 + L
    inv_cnt = 1.0 / float(cg * HW2)
    # tap window start (in ext lanes) for each of the 9 conv taps
    tap_start = [IMG0 + (dh - 1) * Wp + (dw - 1) for dh in range(3) for dw in range(3)]

    # ---- tiny trace-time constants ----------------------------------------
    # interior mask over the flat padded image (1 on the H2 x W2 interior, 0 on the ring)
    mask_np = np.zeros((1, L), np.float32)
    for r in range(1, Hp - 1):
        mask_np[0, r * Wp + 1: r * Wp + 1 + W2] = 1.0
    mask = jnp.asarray(mask_np)
    # column expansion E_kw (W, 2W): E_kw[j, 2j+kw] = 1   (O(W^2), NOT O((HW)^2))
    ecol_np = np.zeros((2, W, W2), np.float32)
    for kw in range(2):
        for j in range(W):
            ecol_np[kw, j, 2 * j + kw] = 1.0
    ecol = jnp.asarray(ecol_np)

    # ---- weight repacking (small constants; pure layout) ------------------
    # ConvTranspose2d weight (Cin, Cout, 2, 2) -> rows ordered (kw, kh, co)
    wd_all = jnp.transpose(params["up_w"], (3, 2, 1, 0)).reshape(4 * Cout, Cin)
    wdx, wds = wd_all[:, :Cx], wd_all[:, Cx:]          # never materialize cat(x, skip)
    bd2 = jnp.concatenate([params["up_b"].reshape(Cout, 1)] * 2, axis=0)   # rows (kh, co)
    # Conv2d weights (Cout, Cin, 3, 3) -> (Cout, 9*Cin), columns ordered (dh, dw, ci)
    wc = jnp.stack([jnp.transpose(params[f"conv{i}_w"], (0, 2, 3, 1)).reshape(Cout, 9 * Cout)
                    for i in range(4)])
    bc = jnp.stack([params[f"conv{i}_b"].reshape(Cout, 1) for i in range(4)])
    gam = jnp.stack([params[f"gn{i}_g"].reshape(Cout, 1) for i in range(4)])
    bet = jnp.stack([params[f"gn{i}_b"].reshape(Cout, 1) for i in range(4)])

    xf = x_nchw.reshape(N, Cx, HW)       # free reshapes: stay in NCHW-flat
    sf = skip_nchw.reshape(N, Csk, HW)

    def kernel(x_ref, s_ref, wdx_ref, wds_ref, bd2_ref, ecol_ref, mask_ref,
               wc_ref, bc_ref, gam_ref, bet_ref, out_ref, ext_ref):
        msk = mask_ref[...]                                   # (1, L)

        # haloed flat activation buffer: padding/halo lives in VMEM, never in HBM.
        # Re-zeroed every grid step (scratch is per-core; keeps halos correct on v7x).
        ext_ref[...] = jnp.zeros((Cout, Lext), jnp.float32)

        # ---- ConvTranspose2d(2, 2, stride=2): two dense matmuls, then the stride-2
        #      lane interleave via tiny (W, 2W) column-expansion matmuls + row writes.
        yall = (jnp.dot(wdx_ref[...], x_ref[...], preferred_element_type=jnp.float32) +
                jnp.dot(wds_ref[...], s_ref[...], preferred_element_type=jnp.float32))
        e0 = ecol_ref[0]                 # (W, W2)
        e1 = ecol_ref[1]
        bd2v = bd2_ref[...]              # (2*Cout, 1), rows (kh, co)
        for i in range(H):               # one coarse input row -> two fine output rows
            a0 = yall[0:2 * Cout, i * W:(i + 1) * W]            # kw = 0, rows (kh, co)
            a1 = yall[2 * Cout:4 * Cout, i * W:(i + 1) * W]     # kw = 1
            rp = (jnp.dot(a0, e0, preferred_element_type=jnp.float32) +
                  jnp.dot(a1, e1, preferred_element_type=jnp.float32) + bd2v)
            base = IMG0 + (2 * i + 1) * Wp + 1
            ext_ref[:, pl.ds(base, W2)] = rp[0:Cout, :]            # fine row 2i   (kh=0)
            ext_ref[:, pl.ds(base + Wp, W2)] = rp[Cout:2 * Cout, :]  # fine row 2i+1 (kh=1)

        # ---- 4x (Conv3x3 -> GroupNorm(8) -> exact GELU), all VMEM-resident
        for li in range(4):
            wc_i = wc_ref[li]            # (Cout, 9*Cout)
            bc_i = bc_ref[li]
            gam_i = gam_ref[li]
            bet_i = bet_ref[li]

            # im2col in registers: 9 lane-shifted views -> one K = 9*Cout matmul
            patches = jnp.concatenate(
                [ext_ref[:, pl.ds(tap_start[t], L)] for t in range(9)], axis=0)
            y = jnp.dot(wc_i, patches, preferred_element_type=jnp.float32)
            y = (y + bc_i) * msk         # zero border ring so GN stats see interior only

            # vectorized GroupNorm over the full (Cout, L) tile
            s1 = jnp.sum(y, axis=1, keepdims=True)          # (Cout, 1)
            s2 = jnp.sum(y * y, axis=1, keepdims=True)
            if cg > 1:   # combine per-channel stats within each group (dead when cg == 1)
                s1 = jnp.broadcast_to(
                    jnp.sum(s1.reshape(GROUPS, cg, 1), axis=1, keepdims=True),
                    (GROUPS, cg, 1)).reshape(Cout, 1)
                s2 = jnp.broadcast_to(
                    jnp.sum(s2.reshape(GROUPS, cg, 1), axis=1, keepdims=True),
                    (GROUPS, cg, 1)).reshape(Cout, 1)
            mean = s1 * inv_cnt
            var = s2 * inv_cnt - mean * mean
            rstd = lax.rsqrt(var + EPS)

            z = (y - mean) * (rstd * gam_i) + bet_i
            z = 0.5 * z * (1.0 + lax.erf(z * _INV_SQRT2))   # exact GELU (torch default)
            z = z * msk                                     # re-zero the border ring

            if li < 3:
                ext_ref[:, pl.ds(IMG0, L)] = z              # lane-aligned full writeback
            else:
                # emit the de-padded output directly (no wrapper slice / extra HBM pass)
                for r in range(H2):
                    src = (r + 1) * Wp + 1
                    out_ref[:, pl.ds(r * W2, W2)] = z[:, src:src + W2]

    out_flat = pl.pallas_call(
        kernel,
        out_shape=jax.ShapeDtypeStruct((N, Cout, HW2), jnp.float32),
        grid_spec=pltpu.PrefetchScalarGridSpec(
            num_scalar_prefetch=0,
            grid=(N,),
            in_specs=[
                pl.BlockSpec((None, Cx, HW), lambda n: (n, 0, 0)),
                pl.BlockSpec((None, Csk, HW), lambda n: (n, 0, 0)),
                pl.BlockSpec((4 * Cout, Cx), lambda n: (0, 0)),
                pl.BlockSpec((4 * Cout, Csk), lambda n: (0, 0)),
                pl.BlockSpec((2 * Cout, 1), lambda n: (0, 0)),
                pl.BlockSpec((2, W, W2), lambda n: (0, 0, 0)),
                pl.BlockSpec((1, L), lambda n: (0, 0)),
                pl.BlockSpec((4, Cout, 9 * Cout), lambda n: (0, 0, 0)),
                pl.BlockSpec((4, Cout, 1), lambda n: (0, 0, 0)),
                pl.BlockSpec((4, Cout, 1), lambda n: (0, 0, 0)),
                pl.BlockSpec((4, Cout, 1), lambda n: (0, 0, 0)),
            ],
            out_specs=pl.BlockSpec((None, Cout, HW2), lambda n: (n, 0, 0)),
            scratch_shapes=[pltpu.VMEM((Cout, Lext), jnp.float32)],
        ),
        compiler_params=pltpu.CompilerParams(dimension_semantics=("parallel",)),
    )(xf, sf, wdx, wds, bd2, ecol, mask, wc, bc, gam, bet)

    # free metadata reshape back to NCHW (no slicing, output is already de-padded)
    return out_flat.reshape(N, Cout, H2, W2)


unet_up_forward = jax.jit(unet_up_forward)


# ---------------------------------------------------------------------------
# Pure-JAX reference (matches the PyTorch module semantics) for self-checking.
# ---------------------------------------------------------------------------
def _ref_forward(x, skip, params):
    hi = lax.Precision.HIGHEST
    xc = jnp.concatenate([x, skip], axis=1)
    N, Cin, H, W = xc.shape
    Cout = params["up_b"].shape[0]
    t = jnp.einsum("ncij,cokl->noikjl", xc, params["up_w"], precision=hi)
    y = t.reshape(N, Cout, 2 * H, 2 * W) + params["up_b"][None, :, None, None]
    for i in range(4):
        w = params[f"conv{i}_w"]
        b = params[f"conv{i}_b"]
        Hh, Ww = y.shape[2], y.shape[3]
        yp = jnp.pad(y, ((0, 0), (0, 0), (1, 1), (1, 1)))
        acc = jnp.zeros((N, Cout, Hh, Ww), jnp.float32)
        for dh in range(3):
            for dw in range(3):
                acc = acc + jnp.einsum("ncij,oc->noij",
                                       yp[:, :, dh:dh + Hh, dw:dw + Ww],
                                       w[:, :, dh, dw], precision=hi)
        acc = acc + b[None, :, None, None]
        g = acc.reshape(N, GROUPS, Cout // GROUPS, Hh, Ww)
        m = jnp.mean(g, axis=(2, 3, 4), keepdims=True)
        v = jnp.mean((g - m) ** 2, axis=(2, 3, 4), keepdims=True)
        yn = ((g - m) * lax.rsqrt(v + EPS)).reshape(N, Cout, Hh, Ww)
        yn = yn * params[f"gn{i}_g"][None, :, None, None] \
            + params[f"gn{i}_b"][None, :, None, None]
        y = 0.5 * yn * (1.0 + lax.erf(yn * _INV_SQRT2))
    return y


def init_params(key, in_channels, out_channels):
    ks = jax.random.split(key, 2 + 4 * 4)
    p = {
        "up_w": 0.1 * jax.random.normal(ks[0], (in_channels, out_channels, 2, 2), jnp.float32),
        "up_b": 0.05 * jax.random.normal(ks[1], (out_channels,), jnp.float32),
    }
    for i in range(4):
        k0, k1, k2, k3 = ks[2 + 4 * i: 6 + 4 * i]
        p[f"conv{i}_w"] = 0.1 * jax.random.normal(k0, (out_channels, out_channels, 3, 3), jnp.float32)
        p[f"conv{i}_b"] = 0.05 * jax.random.normal(k1, (out_channels,), jnp.float32)
        p[f"gn{i}_g"] = 1.0 + 0.1 * jax.random.normal(k2, (out_channels,), jnp.float32)
        p[f"gn{i}_b"] = 0.05 * jax.random.normal(k3, (out_channels,), jnp.float32)
    return p


if __name__ == "__main__":
    key = jax.random.PRNGKey(0)
    kx, ksk, kp = jax.random.split(key, 3)

    N, Cx, Csk, H, W = 2, 4, 4, 8, 8
    in_channels = Cx + Csk          # channels after torch.cat((x, skip), 1)
    out_channels = 8                # divisible by GroupNorm groups (8)

    x = jax.random.normal(kx, (N, Cx, H, W), jnp.float32)     # NCHW, like torch
    skip = jax.random.normal(ksk, (N, Csk, H, W), jnp.float32)
    params = init_params(kp, in_channels, out_channels)

    out = jax.block_until_ready(unet_up_forward(x, skip, params))
    ref = jax.block_until_ready(jax.jit(_ref_forward)(x, skip, params))

    assert out.shape == (N, out_channels, 2 * H, 2 * W), out.shape
    assert bool(jnp.all(jnp.isfinite(out)))
    err = float(jnp.max(jnp.abs(out - ref)))
    assert err < 5e-3, f"max abs err vs reference = {err}"
    print("KERNEL_OK")
</pallas_src>

<mosaic_0001>
module attributes {stable_mosaic.version = 11 : i64} {
  func.func @kernel(%arg0: i32, %arg1: memref<1x4x64xf32, #tpu.memory_space<vmem>>, %arg2: memref<1x4x64xf32, #tpu.memory_space<vmem>>, %arg3: memref<32x4xf32, #tpu.memory_space<vmem>>, %arg4: memref<32x4xf32, #tpu.memory_space<vmem>>, %arg5: memref<16x1xf32, #tpu.memory_space<vmem>>, %arg6: memref<2x8x16xf32, #tpu.memory_space<vmem>>, %arg7: memref<1x324xf32, #tpu.memory_space<vmem>>, %arg8: memref<4x8x72xf32, #tpu.memory_space<vmem>>, %arg9: memref<4x8x1xf32, #tpu.memory_space<vmem>>, %arg10: memref<4x8x1xf32, #tpu.memory_space<vmem>>, %arg11: memref<4x8x1xf32, #tpu.memory_space<vmem>>, %arg12: memref<1x8x256xf32, #tpu.memory_space<vmem>>, %arg13: memref<8x580xf32, #tpu.memory_space<vmem>>) attributes {dimension_semantics = [#tpu.dimension_semantics<parallel>], iteration_bounds = array<i64: 2>, scalar_prefetch = 0 : i64, scratch_operands = 1 : i64, tpu.core_type = #tpu.core_type<tc>, window_params = [{transform_indices = @transform_0, window_bounds = array<i64: 1, 4, 64>}, {transform_indices = @transform_1, window_bounds = array<i64: 1, 4, 64>}, {pipeline_mode = #tpu.pipeline_mode<synchronous>, transform_indices = @transform_2, window_bounds = array<i64: 32, 4>}, {pipeline_mode = #tpu.pipeline_mode<synchronous>, transform_indices = @transform_3, window_bounds = array<i64: 32, 4>}, {pipeline_mode = #tpu.pipeline_mode<synchronous>, transform_indices = @transform_4, window_bounds = array<i64: 16, 1>}, {pipeline_mode = #tpu.pipeline_mode<synchronous>, transform_indices = @transform_5, window_bounds = array<i64: 2, 8, 16>}, {pipeline_mode = #tpu.pipeline_mode<synchronous>, transform_indices = @transform_6, window_bounds = array<i64: 1, 324>}, {pipeline_mode = #tpu.pipeline_mode<synchronous>, transform_indices = @transform_7, window_bounds = array<i64: 4, 8, 72>}, {pipeline_mode = #tpu.pipeline_mode<synchronous>, transform_indices = @transform_8, window_bounds = array<i64: 4, 8, 1>}, {pipeline_mode = #tpu.pipeline_mode<synchronous>, transform_indices = @transform_9, window_bounds = array<i64: 4, 8, 1>}, {pipeline_mode = #tpu.pipeline_mode<synchronous>, transform_indices = @transform_10, window_bounds = array<i64: 4, 8, 1>}, {transform_indices = @transform_11, window_bounds = array<i64: 1, 8, 256>}]} {
    %c0 = arith.constant 0 : index
    %c0_0 = arith.constant 0 : index
    %0 = vector.load %arg7[%c0, %c0_0] : memref<1x324xf32, #tpu.memory_space<vmem>>, vector<1x324xf32>
    %cst = arith.constant 0.000000e+00 : f32
    %1 = vector.broadcast %cst : f32 to vector<8x580xf32>
    %c0_1 = arith.constant 0 : index
    %c0_2 = arith.constant 0 : index
    %2 = vector.load %arg13[%c0_1, %c0_2] : memref<8x580xf32, #tpu.memory_space<vmem>>, vector<8x580xf32>
    tpu.vector_store %arg13[%c0_1, %c0_2], %1 {strides = array<i32>} : memref<8x580xf32, #tpu.memory_space<vmem>>, vector<8x580xf32>,
    %c0_3 = arith.constant 0 : index
    %c0_4 = arith.constant 0 : index
    %3 = vector.load %arg3[%c0_3, %c0_4] : memref<32x4xf32, #tpu.memory_space<vmem>>, vector<32x4xf32>
    %c0_5 = arith.constant 0 : index
    %c0_6 = arith.constant 0 : index
    %c0_7 = arith.constant 0 : index
    %4 = vector.load %arg1[%c0_5, %c0_6, %c0_7] : memref<1x4x64xf32, #tpu.memory_space<vmem>>, vector<1x4x64xf32>
    %5 = vector.shape_cast %4 : vector<1x4x64xf32> to vector<4x64xf32>
    %cst_8 = arith.constant dense<0.000000e+00> : vector<32x64xf32>
    %6 = tpu.matmul %3, %5, %cst_8 {dimension_numbers = #tpu.dot_dimension_numbers<[1], [0], [0], [1], [0, 0, 1, 1], [], []>} : vector<32x4xf32>, vector<4x64xf32>, vector<32x64xf32> -> vector<32x64xf32>
    %c0_9 = arith.constant 0 : index
    %c0_10 = arith.constant 0 : index
    %7 = vector.load %arg4[%c0_9, %c0_10] : memref<32x4xf32, #tpu.memory_space<vmem>>, vector<32x4xf32>
    %c0_11 = arith.constant 0 : index
    %c0_12 = arith.constant 0 : index
    %c0_13 = arith.constant 0 : index
    %8 = vector.load %arg2[%c0_11, %c0_12, %c0_13] : memref<1x4x64xf32, #tpu.memory_space<vmem>>, vector<1x4x64xf32>
    %9 = vector.shape_cast %8 : vector<1x4x64xf32> to vector<4x64xf32>
    %cst_14 = arith.constant dense<0.000000e+00> : vector<32x64xf32>
    %10 = tpu.matmul %7, %9, %cst_14 {dimension_numbers = #tpu.dot_dimension_numbers<[1], [0], [0], [1], [0, 0, 1, 1], [], []>} : vector<32x4xf32>, vector<4x64xf32>, vector<32x64xf32> -> vector<32x64xf32>
    %11 = arith.addf %6, %10 : vector<32x64xf32>
    %c0_15 = arith.constant 0 : index
    %c0_16 = arith.constant 0 : index
    %c0_17 = arith.constant 0 : index
    %12 = vector.load %arg6[%c0_15, %c0_16, %c0_17] : memref<2x8x16xf32, #tpu.memory_space<vmem>>, vector<1x8x16xf32>
    %13 = vector.shape_cast %12 : vector<1x8x16xf32> to vector<8x16xf32>
    %c1 = arith.constant 1 : index
    %c0_18 = arith.constant 0 : index
    %c0_19 = arith.constant 0 : index
    %14 = vector.load %arg6[%c1, %c0_18, %c0_19] : memref<2x8x16xf32, #tpu.memory_space<vmem>>, vector<1x8x16xf32>
    %15 = vector.shape_cast %14 : vector<1x8x16xf32> to vector<8x16xf32>
    %c0_20 = arith.constant 0 : index
    %c0_21 = arith.constant 0 : index
    %16 = vector.load %arg5[%c0_20, %c0_21] : memref<16x1xf32, #tpu.memory_space<vmem>>, vector<16x1xf32>
    %17 = vector.extract_strided_slice %11 {offsets = [0, 0], sizes = [16, 8], strides = [1, 1]} : vector<32x64xf32> to vector<16x8xf32>
    %18 = vector.extract_strided_slice %11 {offsets = [16, 0], sizes = [16, 8], strides = [1, 1]} : vector<32x64xf32> to vector<16x8xf32>
    %cst_22 = arith.constant dense<0.000000e+00> : vector<16x16xf32>
    %19 = tpu.matmul %17, %13, %cst_22 {dimension_numbers = #tpu.dot_dimension_numbers<[1], [0], [0], [1], [0, 0, 1, 1], [], []>} : vector<16x8xf32>, vector<8x16xf32>, vector<16x16xf32> -> vector<16x16xf32>
    %cst_23 = arith.constant dense<0.000000e+00> : vector<16x16xf32>
    %20 = tpu.matmul %18, %15, %cst_23 {dimension_numbers = #tpu.dot_dimension_numbers<[1], [0], [0], [1], [0, 0, 1, 1], [], []>} : vector<16x8xf32>, vector<8x16xf32>, vector<16x16xf32> -> vector<16x16xf32>
    %21 = arith.addf %19, %20 : vector<16x16xf32>
    %22 = vector.broadcast %16 : vector<16x1xf32> to vector<16x16xf32>
    %23 = arith.addf %21, %22 : vector<16x16xf32>
    %24 = vector.extract_strided_slice %23 {offsets = [0, 0], sizes = [8, 16], strides = [1, 1]} : vector<16x16xf32> to vector<8x16xf32>
    %c0_24 = arith.constant 0 : index
    %c147 = arith.constant 147 : index
    %25 = vector.load %arg13[%c0_24, %c147] : memref<8x580xf32, #tpu.memory_space<vmem>>, vector<8x16xf32>
    tpu.vector_store %arg13[%c0_24, %c147], %24 {strides = array<i32>} : memref<8x580xf32, #tpu.memory_space<vmem>>, vector<8x16xf32>,
    %26 = vector.extract_strided_slice %23 {offsets = [8, 0], sizes = [8, 16], strides = [1, 1]} : vector<16x16xf32> to vector<8x16xf32>
    %c0_25 = arith.constant 0 : index
    %c165 = arith.constant 165 : index
    %27 = vector.load %arg13[%c0_25, %c165] : memref<8x580xf32, #tpu.memory_space<vmem>>, vector<8x16xf32>
    tpu.vector_store %arg13[%c0_25, %c165], %26 {strides = array<i32>} : memref<8x580xf32, #tpu.memory_space<vmem>>, vector<8x16xf32>,
    %28 = vector.extract_strided_slice %11 {offsets = [0, 8], sizes = [16, 8], strides = [1, 1]} : vector<32x64xf32> to vector<16x8xf32>
    %29 = vector.extract_strided_slice %11 {offsets = [16, 8], sizes = [16, 8], strides = [1, 1]} : vector<32x64xf32> to vector<16x8xf32>
    %cst_26 = arith.constant dense<0.000000e+00> : vector<16x16xf32>
    %30 = tpu.matmul %28, %13, %cst_26 {dimension_numbers = #tpu.dot_dimension_numbers<[1], [0], [0], [1], [0, 0, 1, 1], [], []>} : vector<16x8xf32>, vector<8x16xf32>, vector<16x16xf32> -> vector<16x16xf32>
    %cst_27 = arith.constant dense<0.000000e+00> : vector<16x16xf32>
    %31 = tpu.matmul %29, %15, %cst_27 {dimension_numbers = #tpu.dot_dimension_numbers<[1], [0], [0], [1], [0, 0, 1, 1], [], []>} : vector<16x8xf32>, vector<8x16xf32>, vector<16x16xf32> -> vector<16x16xf32>
    %32 = arith.addf %30, %31 : vector<16x16xf32>
    %33 = vector.broadcast %16 : vector<16x1xf32> to vector<16x16xf32>
    %34 = arith.addf %32, %33 : vector<16x16xf32>
    %35 = vector.extract_strided_slice %34 {offsets = [0, 0], sizes = [8, 16], strides = [1, 1]} : vector<16x16xf32> to vector<8x16xf32>
    %c0_28 = arith.constant 0 : index
    %c183 = arith.constant 183 : index
    %36 = vector.load %arg13[%c0_28, %c183] : memref<8x580xf32, #tpu.memory_space<vmem>>, vector<8x16xf32>
    tpu.vector_store %arg13[%c0_28, %c183], %35 {strides = array<i32>} : memref<8x580xf32, #tpu.memory_space<vmem>>, vector<8x16xf32>,
    %37 = vector.extract_strided_slice %34 {offsets = [8, 0], sizes = [8, 16], strides = [1, 1]} : vector<16x16xf32> to vector<8x16xf32>
    %c0_29 = arith.constant 0 : index
    %c201 = arith.constant 201 : index
    %38 = vector.load %arg13[%c0_29, %c201] : memref<8x580xf32, #tpu.memory_space<vmem>>, vector<8x16xf32>
    tpu.vector_store %arg13[%c0_29, %c201], %37 {strides = array<i32>} : memref<8x580xf32, #tpu.memory_space<vmem>>, vector<8x16xf32>,
    %39 = vector.extract_strided_slice %11 {offsets = [0, 16], sizes = [16, 8], strides = [1, 1]} : vector<32x64xf32> to vector<16x8xf32>
    %40 = vector.extract_strided_slice %11 {offsets = [16, 16], sizes = [16, 8], strides = [1, 1]} : vector<32x64xf32> to vector<16x8xf32>
    %cst_30 = arith.constant dense<0.000000e+00> : vector<16x16xf32>
    %41 = tpu.matmul %39, %13, %cst_30 {dimension_numbers = #tpu.dot_dimension_numbers<[1], [0], [0], [1], [0, 0, 1, 1], [], []>} : vector<16x8xf32>, vector<8x16xf32>, vector<16x16xf32> -> vector<16x16xf32>
    %cst_31 = arith.constant dense<0.000000e+00> : vector<16x16xf32>
    %42 = tpu.matmul %40, %15, %cst_31 {dimension_numbers = #tpu.dot_dimension_numbers<[1], [0], [0], [1], [0, 0, 1, 1], [], []>} : vector<16x8xf32>, vector<8x16xf32>, vector<16x16xf32> -> vector<16x16xf32>
    %43 = arith.addf %41, %42 : vector<16x16xf32>
    %44 = vector.broadcast %16 : vector<16x1xf32> to vector<16x16xf32>
    %45 = arith.addf %43, %44 : vector<16x16xf32>
    %46 = vector.extract_strided_slice %45 {offsets = [0, 0], sizes = [8, 16], strides = [1, 1]} : vector<16x16xf32> to vector<8x16xf32>
    %c0_32 = arith.constant 0 : index
    %c219 = arith.constant 219 : index
    %47 = vector.load %arg13[%c0_32, %c219] : memref<8x580xf32, #tpu.memory_space<vmem>>, vector<8x16xf32>
    tpu.vector_store %arg13[%c0_32, %c219], %46 {strides = array<i32>} : memref<8x580xf32, #tpu.memory_space<vmem>>, vector<8x16xf32>,
    %48 = vector.extract_strided_slice %45 {offsets = [8, 0], sizes = [8, 16], strides = [1, 1]} : vector<16x16xf32> to vector<8x16xf32>
    %c0_33 = arith.constant 0 : index
    %c237 = arith.constant 237 : index
    %49 = vector.load %arg13[%c0_33, %c237] : memref<8x580xf32, #tpu.memory_space<vmem>>, vector<8x16xf32>
    tpu.vector_store %arg13[%c0_33, %c237], %48 {strides = array<i32>} : memref<8x580xf32, #tpu.memory_space<vmem>>, vector<8x16xf32>,
    %50 = vector.extract_strided_slice %11 {offsets = [0, 24], sizes = [16, 8], strides = [1, 1]} : vector<32x64xf32> to vector<16x8xf32>
    %51 = vector.extract_strided_slice %11 {offsets = [16, 24], sizes = [16, 8], strides = [1, 1]} : vector<32x64xf32> to vector<16x8xf32>
    %cst_34 = arith.constant dense<0.000000e+00> : vector<16x16xf32>
    %52 = tpu.matmul %50, %13, %cst_34 {dimension_numbers = #tpu.dot_dimension_numbers<[1], [0], [0], [1], [0, 0, 1, 1], [], []>} : vector<16x8xf32>, vector<8x16xf32>, vector<16x16xf32> -> vector<16x16xf32>
    %cst_35 = arith.constant dense<0.000000e+00> : vector<16x16xf32>
    %53 = tpu.matmul %51, %15, %cst_35 {dimension_numbers = #tpu.dot_dimension_numbers<[1], [0], [0], [1], [0, 0, 1, 1], [], []>} : vector<16x8xf32>, vector<8x16xf32>, vector<16x16xf32> -> vector<16x16xf32>
    %54 = arith.addf %52, %53 : vector<16x16xf32>
    %55 = vector.broadcast %16 : vector<16x1xf32> to vector<16x16xf32>
    %56 = arith.addf %54, %55 : vector<16x16xf32>
    %57 = vector.extract_strided_slice %56 {offsets = [0, 0], sizes = [8, 16], strides = [1, 1]} : vector<16x16xf32> to vector<8x16xf32>
    %c0_36 = arith.constant 0 : index
    %c255 = arith.constant 255 : index
    %58 = vector.load %arg13[%c0_36, %c255] : memref<8x580xf32, #tpu.memory_space<vmem>>, vector<8x16xf32>
    tpu.vector_store %arg13[%c0_36, %c255], %57 {strides = array<i32>} : memref<8x580xf32, #tpu.memory_space<vmem>>, vector<8x16xf32>,
    %59 = vector.extract_strided_slice %56 {offsets = [8, 0], sizes = [8, 16], strides = [1, 1]} : vector<16x16xf32> to vector<8x16xf32>
    %c0_37 = arith.constant 0 : index
    %c273 = arith.constant 273 : index
    %60 = vector.load %arg13[%c0_37, %c273] : memref<8x580xf32, #tpu.memory_space<vmem>>, vector<8x16xf32>
    tpu.vector_store %arg13[%c0_37, %c273], %59 {strides = array<i32>} : memref<8x580xf32, #tpu.memory_space<vmem>>, vector<8x16xf32>,
    %61 = vector.extract_strided_slice %11 {offsets = [0, 32], sizes = [16, 8], strides = [1, 1]} : vector<32x64xf32> to vector<16x8xf32>
    %62 = vector.extract_strided_slice %11 {offsets = [16, 32], sizes = [16, 8], strides = [1, 1]} : vector<32x64xf32> to vector<16x8xf32>
    %cst_38 = arith.constant dense<0.000000e+00> : vector<16x16xf32>
    %63 = tpu.matmul %61, %13, %cst_38 {dimension_numbers = #tpu.dot_dimension_numbers<[1], [0], [0], [1], [0, 0, 1, 1], [], []>} : vector<16x8xf32>, vector<8x16xf32>, vector<16x16xf32> -> vector<16x16xf32>
    %cst_39 = arith.constant dense<0.000000e+00> : vector<16x16xf32>
    %64 = tpu.matmul %62, %15, %cst_39 {dimension_numbers = #tpu.dot_dimension_numbers<[1], [0], [0], [1], [0, 0, 1, 1], [], []>} : vector<16x8xf32>, vector<8x16xf32>, vector<16x16xf32> -> vector<16x16xf32>
    %65 = arith.addf %63, %64 : vector<16x16xf32>
    %66 = vector.broadcast %16 : vector<16x1xf32> to vector<16x16xf32>
    %67 = arith.addf %65, %66 : vector<16x16xf32>
    %68 = vector.extract_strided_slice %67 {offsets = [0, 0], sizes = [8, 16], strides = [1, 1]} : vector<16x16xf32> to vector<8x16xf32>
    %c0_40 = arith.constant 0 : index
    %c291 = arith.constant 291 : index
    %69 = vector.load %arg13[%c0_40, %c291] : memref<8x580xf32, #tpu.memory_space<vmem>>, vector<8x16xf32>
    tpu.vector_store %arg13[%c0_40, %c291], %68 {strides = array<i32>} : memref<8x580xf32, #tpu.memory_space<vmem>>, vector<8x16xf32>,
    %70 = vector.extract_strided_slice %67 {offsets = [8, 0], sizes = [8, 16], strides = [1, 1]} : vector<16x16xf32> to vector<8x16xf32>
    %c0_41 = arith.constant 0 : index
    %c309 = arith.constant 309 : index
    %71 = vector.load %arg13[%c0_41, %c309] : memref<8x580xf32, #tpu.memory_space<vmem>>, vector<8x16xf32>
    tpu.vector_store %arg13[%c0_41, %c309], %70 {strides = array<i32>} : memref<8x580xf32, #tpu.memory_space<vmem>>, vector<8x16xf32>,
    %72 = vector.extract_strided_slice %11 {offsets = [0, 40], sizes = [16, 8], strides = [1, 1]} : vector<32x64xf32> to vector<16x8xf32>
    %73 = vector.extract_strided_slice %11 {offsets = [16, 40], sizes = [16, 8], strides = [1, 1]} : vector<32x64xf32> to vector<16x8xf32>
    %cst_42 = arith.constant dense<0.000000e+00> : vector<16x16xf32>
    %74 = tpu.matmul %72, %13, %cst_42 {dimension_numbers = #tpu.dot_dimension_numbers<[1], [0], [0], [1], [0, 0, 1, 1], [], []>} : vector<16x8xf32>, vector<8x16xf32>, vector<16x16xf32> -> vector<16x16xf32>
    %cst_43 = arith.constant dense<0.000000e+00> : vector<16x16xf32>
    %75 = tpu.matmul %73, %15, %cst_43 {dimension_numbers = #tpu.dot_dimension_numbers<[1], [0], [0], [1], [0, 0, 1, 1], [], []>} : vector<16x8xf32>, vector<8x16xf32>, vector<16x16xf32> -> vector<16x16xf32>
    %76 = arith.addf %74, %75 : vector<16x16xf32>
    %77 = vector.broadcast %16 : vector<16x1xf32> to vector<16x16xf32>
    %78 = arith.addf %76, %77 : vector<16x16xf32>
    %79 = vector.extract_strided_slice %78 {offsets = [0, 0], sizes = [8, 16], strides = [1, 1]} : vector<16x16xf32> to vector<8x16xf32>
    %c0_44 = arith.constant 0 : index
    %c327 = arith.constant 327 : index
    %80 = vector.load %arg13[%c0_44, %c327] : memref<8x580xf32, #tpu.memory_space<vmem>>, vector<8x16xf32>
    tpu.vector_store %arg13[%c0_44, %c327], %79 {strides = array<i32>} : memref<8x580xf32, #tpu.memory_space<vmem>>, vector<8x16xf32>,
    %81 = vector.extract_strided_slice %78 {offsets = [8, 0], sizes = [8, 16], strides = [1, 1]} : vector<16x16xf32> to vector<8x16xf32>
    %c0_45 = arith.constant 0 : index
    %c345 = arith.constant 345 : index
    %82 = vector.load %arg13[%c0_45, %c345] : memref<8x580xf32, #tpu.memory_space<vmem>>, vector<8x16xf32>
    tpu.vector_store %arg13[%c0_45, %c345], %81 {strides = array<i32>} : memref<8x580xf32, #tpu.memory_space<vmem>>, vector<8x16xf32>,
    %83 = vector.extract_strided_slice %11 {offsets = [0, 48], sizes = [16, 8], strides = [1, 1]} : vector<32x64xf32> to vector<16x8xf32>
    %84 = vector.extract_strided_slice %11 {offsets = [16, 48], sizes = [16, 8], strides = [1, 1]} : vector<32x64xf32> to vector<16x8xf32>
    %cst_46 = arith.constant dense<0.000000e+00> : vector<16x16xf32>
    %85 = tpu.matmul %83, %13, %cst_46 {dimension_numbers = #tpu.dot_dimension_numbers<[1], [0], [0], [1], [0, 0, 1, 1], [], []>} : vector<16x8xf32>, vector<8x16xf32>, vector<16x16xf32> -> vector<16x16xf32>
    %cst_47 = arith.constant dense<0.000000e+00> : vector<16x16xf32>
    %86 = tpu.matmul %84, %15, %cst_47 {dimension_numbers = #tpu.dot_dimension_numbers<[1], [0], [0], [1], [0, 0, 1, 1], [], []>} : vector<16x8xf32>, vector<8x16xf32>, vector<16x16xf32> -> vector<16x16xf32>
    %87 = arith.addf %85, %86 : vector<16x16xf32>
    %88 = vector.broadcast %16 : vector<16x1xf32> to vector<16x16xf32>
    %89 = arith.addf %87, %88 : vector<16x16xf32>
    %90 = vector.extract_strided_slice %89 {offsets = [0, 0], sizes = [8, 16], strides = [1, 1]} : vector<16x16xf32> to vector<8x16xf32>
    %c0_48 = arith.constant 0 : index
    %c363 = arith.constant 363 : index
    %91 = vector.load %arg13[%c0_48, %c363] : memref<8x580xf32, #tpu.memory_space<vmem>>, vector<8x16xf32>
    tpu.vector_store %arg13[%c0_48, %c363], %90 {strides = array<i32>} : memref<8x580xf32, #tpu.memory_space<vmem>>, vector<8x16xf32>,
    %92 = vector.extract_strided_slice %89 {offsets = [8, 0], sizes = [8, 16], strides = [1, 1]} : vector<16x16xf32> to vector<8x16xf32>
    %c0_49 = arith.constant 0 : index
    %c381 = arith.constant 381 : index
    %93 = vector.load %arg13[%c0_49, %c381] : memref<8x580xf32, #tpu.memory_space<vmem>>, vector<8x16xf32>
    tpu.vector_store %arg13[%c0_49, %c381], %92 {strides = array<i32>} : memref<8x580xf32, #tpu.memory_space<vmem>>, vector<8x16xf32>,
    %94 = vector.extract_strided_slice %11 {offsets = [0, 56], sizes = [16, 8], strides = [1, 1]} : vector<32x64xf32> to vector<16x8xf32>
    %95 = vector.extract_strided_slice %11 {offsets = [16, 56], sizes = [16, 8], strides = [1, 1]} : vector<32x64xf32> to vector<16x8xf32>
    %cst_50 = arith.constant dense<0.000000e+00> : vector<16x16xf32>
    %96 = tpu.matmul %94, %13, %cst_50 {dimension_numbers = #tpu.dot_dimension_numbers<[1], [0], [0], [1], [0, 0, 1, 1], [], []>} : vector<16x8xf32>, vector<8x16xf32>, vector<16x16xf32> -> vector<16x16xf32>
    %cst_51 = arith.constant dense<0.000000e+00> : vector<16x16xf32>
    %97 = tpu.matmul %95, %15, %cst_51 {dimension_numbers = #tpu.dot_dimension_numbers<[1], [0], [0], [1], [0, 0, 1, 1], [], []>} : vector<16x8xf32>, vector<8x16xf32>, vector<16x16xf32> -> vector<16x16xf32>
    %98 = arith.addf %96, %97 : vector<16x16xf32>
    %99 = vector.broadcast %16 : vector<16x1xf32> to vector<16x16xf32>
    %100 = arith.addf %98, %99 : vector<16x16xf32>
    %101 = vector.extract_strided_slice %100 {offsets = [0, 0], sizes = [8, 16], strides = [1, 1]} : vector<16x16xf32> to vector<8x16xf32>
    %c0_52 = arith.constant 0 : index
    %c399 = arith.constant 399 : index
    %102 = vector.load %arg13[%c0_52, %c399] : memref<8x580xf32, #tpu.memory_space<vmem>>, vector<8x16xf32>
    tpu.vector_store %arg13[%c0_52, %c399], %101 {strides = array<i32>} : memref<8x580xf32, #tpu.memory_space<vmem>>, vector<8x16xf32>,
    %103 = vector.extract_strided_slice %100 {offsets = [8, 0], sizes = [8, 16], strides = [1, 1]} : vector<16x16xf32> to vector<8x16xf32>
    %c0_53 = arith.constant 0 : index
    %c417 = arith.constant 417 : index
    %104 = vector.load %arg13[%c0_53, %c417] : memref<8x580xf32, #tpu.memory_space<vmem>>, vector<8x16xf32>
    tpu.vector_store %arg13[%c0_53, %c417], %103 {strides = array<i32>} : memref<8x580xf32, #tpu.memory_space<vmem>>, vector<8x16xf32>,
    %c0_54 = arith.constant 0 : index
    %c0_55 = arith.constant 0 : index
    %c0_56 = arith.constant 0 : index
    %105 = vector.load %arg8[%c0_54, %c0_55, %c0_56] : memref<4x8x72xf32, #tpu.memory_space<vmem>>, vector<1x8x72xf32>
    %106 = vector.shape_cast %105 : vector<1x8x72xf32> to vector<8x72xf32>
    %c0_57 = arith.constant 0 : index
    %c0_58 = arith.constant 0 : index
    %c0_59 = arith.constant 0 : index
    %107 = vector.load %arg9[%c0_57, %c0_58, %c0_59] : memref<4x8x1xf32, #tpu.memory_space<vmem>>, vector<1x8x1xf32>
    %108 = vector.shape_cast %107 : vector<1x8x1xf32> to vector<8x1xf32>
    %c0_60 = arith.constant 0 : index
    %c0_61 = arith.constant 0 : index
    %c0_62 = arith.constant 0 : index
    %109 = vector.load %arg10[%c0_60, %c0_61, %c0_62] : memref<4x8x1xf32, #tpu.memory_space<vmem>>, vector<1x8x1xf32>
    %110 = vector.shape_cast %109 : vector<1x8x1xf32> to vector<8x1xf32>
    %c0_63 = arith.constant 0 : index
    %c0_64 = arith.constant 0 : index
    %c0_65 = arith.constant 0 : index
    %111 = vector.load %arg11[%c0_63, %c0_64, %c0_65] : memref<4x8x1xf32, #tpu.memory_space<vmem>>, vector<1x8x1xf32>
    %112 = vector.shape_cast %111 : vector<1x8x1xf32> to vector<8x1xf32>
    %c0_66 = arith.constant 0 : index
    %c109 = arith.constant 109 : index
    %113 = vector.load %arg13[%c0_66, %c109] : memref<8x580xf32, #tpu.memory_space<vmem>>, vector<8x324xf32>
    %c0_67 = arith.constant 0 : index
    %c110 = arith.constant 110 : index
    %114 = vector.load %arg13[%c0_67, %c110] : memref<8x580xf32, #tpu.memory_space<vmem>>, vector<8x324xf32>
    %c0_68 = arith.constant 0 : index
    %c111 = arith.constant 111 : index
    %115 = vector.load %arg13[%c0_68, %c111] : memref<8x580xf32, #tpu.memory_space<vmem>>, vector<8x324xf32>
    %c0_69 = arith.constant 0 : index
    %c127 = arith.constant 127 : index
    %116 = vector.load %arg13[%c0_69, %c127] : memref<8x580xf32, #tpu.memory_space<vmem>>, vector<8x324xf32>
    %c0_70 = arith.constant 0 : index
    %c128 = arith.constant 128 : index
    %117 = vector.load %arg13[%c0_70, %c128] : memref<8x580xf32, #tpu.memory_space<vmem>>, vector<8x324xf32>
    %c0_71 = arith.constant 0 : index
    %c129 = arith.constant 129 : index
    %118 = vector.load %arg13[%c0_71, %c129] : memref<8x580xf32, #tpu.memory_space<vmem>>, vector<8x324xf32>
    %c0_72 = arith.constant 0 : index
    %c145 = arith.constant 145 : index
    %119 = vector.load %arg13[%c0_72, %c145] : memref<8x580xf32, #tpu.memory_space<vmem>>, vector<8x324xf32>
    %c0_73 = arith.constant 0 : index
    %c146 = arith.constant 146 : index
    %120 = vector.load %arg13[%c0_73, %c146] : memref<8x580xf32, #tpu.memory_space<vmem>>, vector<8x324xf32>
    %c0_74 = arith.constant 0 : index
    %c147_75 = arith.constant 147 : index
    %121 = vector.load %arg13[%c0_74, %c147_75] : memref<8x580xf32, #tpu.memory_space<vmem>>, vector<8x324xf32>
    %122 = tpu.concatenate %113, %114, %115, %116, %117, %118, %119, %120, %121 in 0 : vector<8x324xf32>, vector<8x324xf32>, vector<8x324xf32>, vector<8x324xf32>, vector<8x324xf32>, vector<8x324xf32>, vector<8x324xf32>, vector<8x324xf32>, vector<8x324xf32> -> vector<72x324xf32>
    %cst_76 = arith.constant dense<0.000000e+00> : vector<8x324xf32>
    %123 = tpu.matmul %106, %122, %cst_76 {dimension_numbers = #tpu.dot_dimension_numbers<[1], [0], [0], [1], [0, 0, 1, 1], [], []>} : vector<8x72xf32>, vector<72x324xf32>, vector<8x324xf32> -> vector<8x324xf32>
    %124 = vector.broadcast %108 : vector<8x1xf32> to vector<8x324xf32>
    %125 = arith.addf %123, %124 : vector<8x324xf32>
    %126 = vector.broadcast %0 : vector<1x324xf32> to vector<8x324xf32>
    %127 = arith.mulf %125, %126 : vector<8x324xf32>
    %cst_77 = arith.constant dense<0.000000e+00> : vector<8xf32>
    %128 = vector.multi_reduction <add>, %127, %cst_77 [1] : vector<8x324xf32> to vector<8xf32>
    %129 = vector.shape_cast %128 : vector<8xf32> to vector<8x1xf32>
    %130 = arith.mulf %127, %127 : vector<8x324xf32>
    %cst_78 = arith.constant dense<0.000000e+00> : vector<8xf32>
    %131 = vector.multi_reduction <add>, %130, %cst_78 [1] : vector<8x324xf32> to vector<8xf32>
    %132 = vector.shape_cast %131 : vector<8xf32> to vector<8x1xf32>
    %cst_79 = arith.constant 3.906250e-03 : f32
    %133 = vector.broadcast %cst_79 : f32 to vector<8x1xf32>
    %134 = arith.mulf %129, %133 : vector<8x1xf32>
    %cst_80 = arith.constant 3.906250e-03 : f32
    %135 = vector.broadcast %cst_80 : f32 to vector<8x1xf32>
    %136 = arith.mulf %132, %135 : vector<8x1xf32>
    %137 = arith.mulf %134, %134 : vector<8x1xf32>
    %138 = arith.subf %136, %137 : vector<8x1xf32>
    %cst_81 = arith.constant 9.99999974E-6 : f32
    %139 = vector.broadcast %cst_81 : f32 to vector<8x1xf32>
    %140 = arith.addf %138, %139 : vector<8x1xf32>
    %141 = math.rsqrt %140 : vector<8x1xf32>
    %142 = vector.broadcast %134 : vector<8x1xf32> to vector<8x324xf32>
    %143 = arith.subf %127, %142 : vector<8x324xf32>
    %144 = arith.mulf %141, %110 : vector<8x1xf32>
    %145 = vector.broadcast %144 : vector<8x1xf32> to vector<8x324xf32>
    %146 = arith.mulf %143, %145 : vector<8x324xf32>
    %147 = vector.broadcast %112 : vector<8x1xf32> to vector<8x324xf32>
    %148 = arith.addf %146, %147 : vector<8x324xf32>
    %cst_82 = arith.constant 5.000000e-01 : f32
    %149 = vector.broadcast %cst_82 : f32 to vector<8x324xf32>
    %150 = arith.mulf %149, %148 : vector<8x324xf32>
    %cst_83 = arith.constant 0.707106769 : f32
    %151 = vector.broadcast %cst_83 : f32 to vector<8x324xf32>
    %152 = arith.mulf %148, %151 : vector<8x324xf32>
    %153 = math.erf %152 : vector<8x324xf32>
    %cst_84 = arith.constant 1.000000e+00 : f32
    %154 = vector.broadcast %cst_84 : f32 to vector<8x324xf32>
    %155 = arith.addf %154, %153 : vector<8x324xf32>
    %156 = arith.mulf %150, %155 : vector<8x324xf32>
    %157 = vector.broadcast %0 : vector<1x324xf32> to vector<8x324xf32>
    %158 = arith.mulf %156, %157 : vector<8x324xf32>
    %c0_85 = arith.constant 0 : index
    %c128_86 = arith.constant 128 : index
    %159 = vector.load %arg13[%c0_85, %c128_86] : memref<8x580xf32, #tpu.memory_space<vmem>>, vector<8x324xf32>
    tpu.vector_store %arg13[%c0_85, %c128_86], %158 {strides = array<i32>} : memref<8x580xf32, #tpu.memory_space<vmem>>, vector<8x324xf32>,
    %c1_87 = arith.constant 1 : index
    %c0_88 = arith.constant 0 : index
    %c0_89 = arith.constant 0 : index
    %160 = vector.load %arg8[%c1_87, %c0_88, %c0_89] : memref<4x8x72xf32, #tpu.memory_space<vmem>>, vector<1x8x72xf32>
    %161 = vector.shape_cast %160 : vector<1x8x72xf32> to vector<8x72xf32>
    %c1_90 = arith.constant 1 : index
    %c0_91 = arith.constant 0 : index
    %c0_92 = arith.constant 0 : index
    %162 = vector.load %arg9[%c1_90, %c0_91, %c0_92] : memref<4x8x1xf32, #tpu.memory_space<vmem>>, vector<1x8x1xf32>
    %163 = vector.shape_cast %162 : vector<1x8x1xf32> to vector<8x1xf32>
    %c1_93 = arith.constant 1 : index
    %c0_94 = arith.constant 0 : index
    %c0_95 = arith.constant 0 : index
    %164 = vector.load %arg10[%c1_93, %c0_94, %c0_95] : memref<4x8x1xf32, #tpu.memory_space<vmem>>, vector<1x8x1xf32>
    %165 = vector.shape_cast %164 : vector<1x8x1xf32> to vector<8x1xf32>
    %c1_96 = arith.constant 1 : index
    %c0_97 = arith.constant 0 : index
    %c0_98 = arith.constant 0 : index
    %166 = vector.load %arg11[%c1_96, %c0_97, %c0_98] : memref<4x8x1xf32, #tpu.memory_space<vmem>>, vector<1x8x1xf32>
    %167 = vector.shape_cast %166 : vector<1x8x1xf32> to vector<8x1xf32>
    %c0_99 = arith.constant 0 : index
    %c109_100 = arith.constant 109 : index
    %168 = vector.load %arg13[%c0_99, %c109_100] : memref<8x580xf32, #tpu.memory_space<vmem>>, vector<8x324xf32>
    %c0_101 = arith.constant 0 : index
    %c110_102 = arith.constant 110 : index
    %169 = vector.load %arg13[%c0_101, %c110_102] : memref<8x580xf32, #tpu.memory_space<vmem>>, vector<8x324xf32>
    %c0_103 = arith.constant 0 : index
    %c111_104 = arith.constant 111 : index
    %170 = vector.load %arg13[%c0_103, %c111_104] : memref<8x580xf32, #tpu.memory_space<vmem>>, vector<8x324xf32>
    %c0_105 = arith.constant 0 : index
    %c127_106 = arith.constant 127 : index
    %171 = vector.load %arg13[%c0_105, %c127_106] : memref<8x580xf32, #tpu.memory_space<vmem>>, vector<8x324xf32>
    %c0_107 = arith.constant 0 : index
    %c128_108 = arith.constant 128 : index
    %172 = vector.load %arg13[%c0_107, %c128_108] : memref<8x580xf32, #tpu.memory_space<vmem>>, vector<8x324xf32>
    %c0_109 = arith.constant 0 : index
    %c129_110 = arith.constant 129 : index
    %173 = vector.load %arg13[%c0_109, %c129_110] : memref<8x580xf32, #tpu.memory_space<vmem>>, vector<8x324xf32>
    %c0_111 = arith.constant 0 : index
    %c145_112 = arith.constant 145 : index
    %174 = vector.load %arg13[%c0_111, %c145_112] : memref<8x580xf32, #tpu.memory_space<vmem>>, vector<8x324xf32>
    %c0_113 = arith.constant 0 : index
    %c146_114 = arith.constant 146 : index
    %175 = vector.load %arg13[%c0_113, %c146_114] : memref<8x580xf32, #tpu.memory_space<vmem>>, vector<8x324xf32>
    %c0_115 = arith.constant 0 : index
    %c147_116 = arith.constant 147 : index
    %176 = vector.load %arg13[%c0_115, %c147_116] : memref<8x580xf32, #tpu.memory_space<vmem>>, vector<8x324xf32>
    %177 = tpu.concatenate %168, %169, %170, %171, %172, %173, %174, %175, %176 in 0 : vector<8x324xf32>, vector<8x324xf32>, vector<8x324xf32>, vector<8x324xf32>, vector<8x324xf32>, vector<8x324xf32>, vector<8x324xf32>, vector<8x324xf32>, vector<8x324xf32> -> vector<72x324xf32>
    %cst_117 = arith.constant dense<0.000000e+00> : vector<8x324xf32>
    %178 = tpu.matmul %161, %177, %cst_117 {dimension_numbers = #tpu.dot_dimension_numbers<[1], [0], [0], [1], [0, 0, 1, 1], [], []>} : vector<8x72xf32>, vector<72x324xf32>, vector<8x324xf32> -> vector<8x324xf32>
    %179 = vector.broadcast %163 : vector<8x1xf32> to vector<8x324xf32>
    %180 = arith.addf %178, %179 : vector<8x324xf32>
    %181 = vector.broadcast %0 : vector<1x324xf32> to vector<8x324xf32>
    %182 = arith.mulf %180, %181 : vector<8x324xf32>
    %cst_118 = arith.constant dense<0.000000e+00> : vector<8xf32>
    %183 = vector.multi_reduction <add>, %182, %cst_118 [1] : vector<8x324xf32> to vector<8xf32>
    %184 = vector.shape_cast %183 : vector<8xf32> to vector<8x1xf32>
    %185 = arith.mulf %182, %182 : vector<8x324xf32>
    %cst_119 = arith.constant dense<0.000000e+00> : vector<8xf32>
    %186 = vector.multi_reduction <add>, %185, %cst_119 [1] : vector<8x324xf32> to vector<8xf32>
    %187 = vector.shape_cast %186 : vector<8xf32> to vector<8x1xf32>
    %cst_120 = arith.constant 3.906250e-03 : f32
    %188 = vector.broadcast %cst_120 : f32 to vector<8x1xf32>
    %189 = arith.mulf %184, %188 : vector<8x1xf32>
    %cst_121 = arith.constant 3.906250e-03 : f32
    %190 = vector.broadcast %cst_121 : f32 to vector<8x1xf32>
    %191 = arith.mulf %187, %190 : vector<8x1xf32>
    %192 = arith.mulf %189, %189 : vector<8x1xf32>
    %193 = arith.subf %191, %192 : vector<8x1xf32>
    %cst_122 = arith.constant 9.99999974E-6 : f32
    %194 = vector.broadcast %cst_122 : f32 to vector<8x1xf32>
    %195 = arith.addf %193, %194 : vector<8x1xf32>
    %196 = math.rsqrt %195 : vector<8x1xf32>
    %197 = vector.broadcast %189 : vector<8x1xf32> to vector<8x324xf32>
    %198 = arith.subf %182, %197 : vector<8x324xf32>
    %199 = arith.mulf %196, %165 : vector<8x1xf32>
    %200 = vector.broadcast %199 : vector<8x1xf32> to vector<8x324xf32>
    %201 = arith.mulf %198, %200 : vector<8x324xf32>
    %202 = vector.broadcast %167 : vector<8x1xf32> to vector<8x324xf32>
    %203 = arith.addf %201, %202 : vector<8x324xf32>
    %cst_123 = arith.constant 5.000000e-01 : f32
    %204 = vector.broadcast %cst_123 : f32 to vector<8x324xf32>
    %205 = arith.mulf %204, %203 : vector<8x324xf32>
    %cst_124 = arith.constant 0.707106769 : f32
    %206 = vector.broadcast %cst_124 : f32 to vector<8x324xf32>
    %207 = arith.mulf %203, %206 : vector<8x324xf32>
    %208 = math.erf %207 : vector<8x324xf32>
    %cst_125 = arith.constant 1.000000e+00 : f32
    %209 = vector.broadcast %cst_125 : f32 to vector<8x324xf32>
    %210 = arith.addf %209, %208 : vector<8x324xf32>
    %211 = arith.mulf %205, %210 : vector<8x324xf32>
    %212 = vector.broadcast %0 : vector<1x324xf32> to vector<8x324xf32>
    %213 = arith.mulf %211, %212 : vector<8x324xf32>
    %c0_126 = arith.constant 0 : index
    %c128_127 = arith.constant 128 : index
    %214 = vector.load %arg13[%c0_126, %c128_127] : memref<8x580xf32, #tpu.memory_space<vmem>>, vector<8x324xf32>
    tpu.vector_store %arg13[%c0_126, %c128_127], %213 {strides = array<i32>} : memref<8x580xf32, #tpu.memory_space<vmem>>, vector<8x324xf32>,
    %c2 = arith.constant 2 : index
    %c0_128 = arith.constant 0 : index
    %c0_129 = arith.constant 0 : index
    %215 = vector.load %arg8[%c2, %c0_128, %c0_129] : memref<4x8x72xf32, #tpu.memory_space<vmem>>, vector<1x8x72xf32>
    %216 = vector.shape_cast %215 : vector<1x8x72xf32> to vector<8x72xf32>
    %c2_130 = arith.constant 2 : index
    %c0_131 = arith.constant 0 : index
    %c0_132 = arith.constant 0 : index
    %217 = vector.load %arg9[%c2_130, %c0_131, %c0_132] : memref<4x8x1xf32, #tpu.memory_space<vmem>>, vector<1x8x1xf32>
    %218 = vector.shape_cast %217 : vector<1x8x1xf32> to vector<8x1xf32>
    %c2_133 = arith.constant 2 : index
    %c0_134 = arith.constant 0 : index
    %c0_135 = arith.constant 0 : index
    %219 = vector.load %arg10[%c2_133, %c0_134, %c0_135] : memref<4x8x1xf32, #tpu.memory_space<vmem>>, vector<1x8x1xf32>
    %220 = vector.shape_cast %219 : vector<1x8x1xf32> to vector<8x1xf32>
    %c2_136 = arith.constant 2 : index
    %c0_137 = arith.constant 0 : index
    %c0_138 = arith.constant 0 : index
    %221 = vector.load %arg11[%c2_136, %c0_137, %c0_138] : memref<4x8x1xf32, #tpu.memory_space<vmem>>, vector<1x8x1xf32>
    %222 = vector.shape_cast %221 : vector<1x8x1xf32> to vector<8x1xf32>
    %c0_139 = arith.constant 0 : index
    %c109_140 = arith.constant 109 : index
    %223 = vector.load %arg13[%c0_139, %c109_140] : memref<8x580xf32, #tpu.memory_space<vmem>>, vector<8x324xf32>
    %c0_141 = arith.constant 0 : index
    %c110_142 = arith.constant 110 : index
    %224 = vector.load %arg13[%c0_141, %c110_142] : memref<8x580xf32, #tpu.memory_space<vmem>>, vector<8x324xf32>
    %c0_143 = arith.constant 0 : index
    %c111_144 = arith.constant 111 : index
    %225 = vector.load %arg13[%c0_143, %c111_144] : memref<8x580xf32, #tpu.memory_space<vmem>>, vector<8x324xf32>
    %c0_145 = arith.constant 0 : index
    %c127_146 = arith.constant 127 : index
    %226 = vector.load %arg13[%c0_145, %c127_146] : memref<8x580xf32, #tpu.memory_space<vmem>>, vector<8x324xf32>
    %c0_147 = arith.constant 0 : index
    %c128_148 = arith.constant 128 : index
    %227 = vector.load %arg13[%c0_147, %c128_148] : memref<8x580xf32, #tpu.memory_space<vmem>>, vector<8x324xf32>
    %c0_149 = arith.constant 0 : index
    %c129_150 = arith.constant 129 : index
    %228 = vector.load %arg13[%c0_149, %c129_150] : memref<8x580xf32, #tpu.memory_space<vmem>>, vector<8x324xf32>
    %c0_151 = arith.constant 0 : index
    %c145_152 = arith.constant 145 : index
    %229 = vector.load %arg13[%c0_151, %c145_152] : memref<8x580xf32, #tpu.memory_space<vmem>>, vector<8x324xf32>
    %c0_153 = arith.constant 0 : index
    %c146_154 = arith.constant 146 : index
    %230 = vector.load %arg13[%c0_153, %c146_154] : memref<8x580xf32, #tpu.memory_space<vmem>>, vector<8x324xf32>
    %c0_155 = arith.constant 0 : index
    %c147_156 = arith.constant 147 : index
    %231 = vector.load %arg13[%c0_155, %c147_156] : memref<8x580xf32, #tpu.memory_space<vmem>>, vector<8x324xf32>
    %232 = tpu.concatenate %223, %224, %225, %226, %227, %228, %229, %230, %231 in 0 : vector<8x324xf32>, vector<8x324xf32>, vector<8x324xf32>, vector<8x324xf32>, vector<8x324xf32>, vector<8x324xf32>, vector<8x324xf32>, vector<8x324xf32>, vector<8x324xf32> -> vector<72x324xf32>
    %cst_157 = arith.constant dense<0.000000e+00> : vector<8x324xf32>
    %233 = tpu.matmul %216, %232, %cst_157 {dimension_numbers = #tpu.dot_dimension_numbers<[1], [0], [0], [1], [0, 0, 1, 1], [], []>} : vector<8x72xf32>, vector<72x324xf32>, vector<8x324xf32> -> vector<8x324xf32>
    %234 = vector.broadcast %218 : vector<8x1xf32> to vector<8x324xf32>
    %235 = arith.addf %233, %234 : vector<8x324xf32>
    %236 = vector.broadcast %0 : vector<1x324xf32> to vector<8x324xf32>
    %237 = arith.mulf %235, %236 : vector<8x324xf32>
    %cst_158 = arith.constant dense<0.000000e+00> : vector<8xf32>
    %238 = vector.multi_reduction <add>, %237, %cst_158 [1] : vector<8x324xf32> to vector<8xf32>
    %239 = vector.shape_cast %238 : vector<8xf32> to vector<8x1xf32>
    %240 = arith.mulf %237, %237 : vector<8x324xf32>
    %cst_159 = arith.constant dense<0.000000e+00> : vector<8xf32>
    %241 = vector.multi_reduction <add>, %240, %cst_159 [1] : vector<8x324xf32> to vector<8xf32>
    %242 = vector.shape_cast %241 : vector<8xf32> to vector<8x1xf32>
    %cst_160 = arith.constant 3.906250e-03 : f32
    %243 = vector.broadcast %cst_160 : f32 to vector<8x1xf32>
    %244 = arith.mulf %239, %243 : vector<8x1xf32>
    %cst_161 = arith.constant 3.906250e-03 : f32
    %245 = vector.broadcast %cst_161 : f32 to vector<8x1xf32>
    %246 = arith.mulf %242, %245 : vector<8x1xf32>
    %247 = arith.mulf %244, %244 : vector<8x1xf32>
    %248 = arith.subf %246, %247 : vector<8x1xf32>
    %cst_162 = arith.constant 9.99999974E-6 : f32
    %249 = vector.broadcast %cst_162 : f32 to vector<8x1xf32>
    %250 = arith.addf %248, %249 : vector<8x1xf32>
    %251 = math.rsqrt %250 : vector<8x1xf32>
    %252 = vector.broadcast %244 : vector<8x1xf32> to vector<8x324xf32>
    %253 = arith.subf %237, %252 : vector<8x324xf32>
    %254 = arith.mulf %251, %220 : vector<8x1xf32>
    %255 = vector.broadcast %254 : vector<8x1xf32> to vector<8x324xf32>
    %256 = arith.mulf %253, %255 : vector<8x324xf32>
    %257 = vector.broadcast %222 : vector<8x1xf32> to vector<8x324xf32>
    %258 = arith.addf %256, %257 : vector<8x324xf32>
    %cst_163 = arith.constant 5.000000e-01 : f32
    %259 = vector.broadcast %cst_163 : f32 to vector<8x324xf32>
    %260 = arith.mulf %259, %258 : vector<8x324xf32>
    %cst_164 = arith.constant 0.707106769 : f32
    %261 = vector.broadcast %cst_164 : f32 to vector<8x324xf32>
    %262 = arith.mulf %258, %261 : vector<8x324xf32>
    %263 = math.erf %262 : vector<8x324xf32>
    %cst_165 = arith.constant 1.000000e+00 : f32
    %264 = vector.broadcast %cst_165 : f32 to vector<8x324xf32>
    %265 = arith.addf %264, %263 : vector<8x324xf32>
    %266 = arith.mulf %260, %265 : vector<8x324xf32>
    %267 = vector.broadcast %0 : vector<1x324xf32> to vector<8x324xf32>
    %268 = arith.mulf %266, %267 : vector<8x324xf32>
    %c0_166 = arith.constant 0 : index
    %c128_167 = arith.constant 128 : index
    %269 = vector.load %arg13[%c0_166, %c128_167] : memref<8x580xf32, #tpu.memory_space<vmem>>, vector<8x324xf32>
    tpu.vector_store %arg13[%c0_166, %c128_167], %268 {strides = array<i32>} : memref<8x580xf32, #tpu.memory_space<vmem>>, vector<8x324xf32>,
    %c3 = arith.constant 3 : index
    %c0_168 = arith.constant 0 : index
    %c0_169 = arith.constant 0 : index
    %270 = vector.load %arg8[%c3, %c0_168, %c0_169] : memref<4x8x72xf32, #tpu.memory_space<vmem>>, vector<1x8x72xf32>
    %271 = vector.shape_cast %270 : vector<1x8x72xf32> to vector<8x72xf32>
    %c3_170 = arith.constant 3 : index
    %c0_171 = arith.constant 0 : index
    %c0_172 = arith.constant 0 : index
    %272 = vector.load %arg9[%c3_170, %c0_171, %c0_172] : memref<4x8x1xf32, #tpu.memory_space<vmem>>, vector<1x8x1xf32>
    %273 = vector.shape_cast %272 : vector<1x8x1xf32> to vector<8x1xf32>
    %c3_173 = arith.constant 3 : index
    %c0_174 = arith.constant 0 : index
    %c0_175 = arith.constant 0 : index
    %274 = vector.load %arg10[%c3_173, %c0_174, %c0_175] : memref<4x8x1xf32, #tpu.memory_space<vmem>>, vector<1x8x1xf32>
    %275 = vector.shape_cast %274 : vector<1x8x1xf32> to vector<8x1xf32>
    %c3_176 = arith.constant 3 : index
    %c0_177 = arith.constant 0 : index
    %c0_178 = arith.constant 0 : index
    %276 = vector.load %arg11[%c3_176, %c0_177, %c0_178] : memref<4x8x1xf32, #tpu.memory_space<vmem>>, vector<1x8x1xf32>
    %277 = vector.shape_cast %276 : vector<1x8x1xf32> to vector<8x1xf32>
    %c0_179 = arith.constant 0 : index
    %c109_180 = arith.constant 109 : index
    %278 = vector.load %arg13[%c0_179, %c109_180] : memref<8x580xf32, #tpu.memory_space<vmem>>, vector<8x324xf32>
    %c0_181 = arith.constant 0 : index
    %c110_182 = arith.constant 110 : index
    %279 = vector.load %arg13[%c0_181, %c110_182] : memref<8x580xf32, #tpu.memory_space<vmem>>, vector<8x324xf32>
    %c0_183 = arith.constant 0 : index
    %c111_184 = arith.constant 111 : index
    %280 = vector.load %arg13[%c0_183, %c111_184] : memref<8x580xf32, #tpu.memory_space<vmem>>, vector<8x324xf32>
    %c0_185 = arith.constant 0 : index
    %c127_186 = arith.constant 127 : index
    %281 = vector.load %arg13[%c0_185, %c127_186] : memref<8x580xf32, #tpu.memory_space<vmem>>, vector<8x324xf32>
    %c0_187 = arith.constant 0 : index
    %c128_188 = arith.constant 128 : index
    %282 = vector.load %arg13[%c0_187, %c128_188] : memref<8x580xf32, #tpu.memory_space<vmem>>, vector<8x324xf32>
    %c0_189 = arith.constant 0 : index
    %c129_190 = arith.constant 129 : index
    %283 = vector.load %arg13[%c0_189, %c129_190] : memref<8x580xf32, #tpu.memory_space<vmem>>, vector<8x324xf32>
    %c0_191 = arith.constant 0 : index
    %c145_192 = arith.constant 145 : index
    %284 = vector.load %arg13[%c0_191, %c145_192] : memref<8x580xf32, #tpu.memory_space<vmem>>, vector<8x324xf32>
    %c0_193 = arith.constant 0 : index
    %c146_194 = arith.constant 146 : index
    %285 = vector.load %arg13[%c0_193, %c146_194] : memref<8x580xf32, #tpu.memory_space<vmem>>, vector<8x324xf32>
    %c0_195 = arith.constant 0 : index
    %c147_196 = arith.constant 147 : index
    %286 = vector.load %arg13[%c0_195, %c147_196] : memref<8x580xf32, #tpu.memory_space<vmem>>, vector<8x324xf32>
    %287 = tpu.concatenate %278, %279, %280, %281, %282, %283, %284, %285, %286 in 0 : vector<8x324xf32>, vector<8x324xf32>, vector<8x324xf32>, vector<8x324xf32>, vector<8x324xf32>, vector<8x324xf32>, vector<8x324xf32>, vector<8x324xf32>, vector<8x324xf32> -> vector<72x324xf32>
    %cst_197 = arith.constant dense<0.000000e+00> : vector<8x324xf32>
    %288 = tpu.matmul %271, %287, %cst_197 {dimension_numbers = #tpu.dot_dimension_numbers<[1], [0], [0], [1], [0, 0, 1, 1], [], []>} : vector<8x72xf32>, vector<72x324xf32>, vector<8x324xf32> -> vector<8x324xf32>
    %289 = vector.broadcast %273 : vector<8x1xf32> to vector<8x324xf32>
    %290 = arith.addf %288, %289 : vector<8x324xf32>
    %291 = vector.broadcast %0 : vector<1x324xf32> to vector<8x324xf32>
    %292 = arith.mulf %290, %291 : vector<8x324xf32>
    %cst_198 = arith.constant dense<0.000000e+00> : vector<8xf32>
    %293 = vector.multi_reduction <add>, %292, %cst_198 [1] : vector<8x324xf32> to vector<8xf32>
    %294 = vector.shape_cast %293 : vector<8xf32> to vector<8x1xf32>
    %295 = arith.mulf %292, %292 : vector<8x324xf32>
    %cst_199 = arith.constant dense<0.000000e+00> : vector<8xf32>
    %296 = vector.multi_reduction <add>, %295, %cst_199 [1] : vector<8x324xf32> to vector<8xf32>
    %297 = vector.shape_cast %296 : vector<8xf32> to vector<8x1xf32>
    %cst_200 = arith.constant 3.906250e-03 : f32
    %298 = vector.broadcast %cst_200 : f32 to vector<8x1xf32>
    %299 = arith.mulf %294, %298 : vector<8x1xf32>
    %cst_201 = arith.constant 3.906250e-03 : f32
    %300 = vector.broadcast %cst_201 : f32 to vector<8x1xf32>
    %301 = arith.mulf %297, %300 : vector<8x1xf32>
    %302 = arith.mulf %299, %299 : vector<8x1xf32>
    %303 = arith.subf %301, %302 : vector<8x1xf32>
    %cst_202 = arith.constant 9.99999974E-6 : f32
    %304 = vector.broadcast %cst_202 : f32 to vector<8x1xf32>
    %305 = arith.addf %303, %304 : vector<8x1xf32>
    %306 = math.rsqrt %305 : vector<8x1xf32>
    %307 = vector.broadcast %299 : vector<8x1xf32> to vector<8x324xf32>
    %308 = arith.subf %292, %307 : vector<8x324xf32>
    %309 = arith.mulf %306, %275 : vector<8x1xf32>
    %310 = vector.broadcast %309 : vector<8x1xf32> to vector<8x324xf32>
    %311 = arith.mulf %308, %310 : vector<8x324xf32>
    %312 = vector.broadcast %277 : vector<8x1xf32> to vector<8x324xf32>
    %313 = arith.addf %311, %312 : vector<8x324xf32>
    %cst_203 = arith.constant 5.000000e-01 : f32
    %314 = vector.broadcast %cst_203 : f32 to vector<8x324xf32>
    %315 = arith.mulf %314, %313 : vector<8x324xf32>
    %cst_204 = arith.constant 0.707106769 : f32
    %316 = vector.broadcast %cst_204 : f32 to vector<8x324xf32>
    %317 = arith.mulf %313, %316 : vector<8x324xf32>
    %318 = math.erf %317 : vector<8x324xf32>
    %cst_205 = arith.constant 1.000000e+00 : f32
    %319 = vector.broadcast %cst_205 : f32 to vector<8x324xf32>
    %320 = arith.addf %319, %318 : vector<8x324xf32>
    %321 = arith.mulf %315, %320 : vector<8x324xf32>
    %322 = vector.broadcast %0 : vector<1x324xf32> to vector<8x324xf32>
    %323 = arith.mulf %321, %322 : vector<8x324xf32>
    %324 = vector.extract_strided_slice %323 {offsets = [0, 19], sizes = [8, 16], strides = [1, 1]} : vector<8x324xf32> to vector<8x16xf32>
    %c0_206 = arith.constant 0 : index
    %c0_207 = arith.constant 0 : index
    %c0_208 = arith.constant 0 : index
    %325 = vector.load %arg12[%c0_206, %c0_207, %c0_208] : memref<1x8x256xf32, #tpu.memory_space<vmem>>, vector<1x8x16xf32>
    %326 = vector.shape_cast %325 : vector<1x8x16xf32> to vector<8x16xf32>
    %327 = vector.shape_cast %324 : vector<8x16xf32> to vector<1x8x16xf32>
    tpu.vector_store %arg12[%c0_206, %c0_207, %c0_208], %327 {strides = array<i32>} : memref<1x8x256xf32, #tpu.memory_space<vmem>>, vector<1x8x16xf32>,
    %328 = vector.extract_strided_slice %323 {offsets = [0, 37], sizes = [8, 16], strides = [1, 1]} : vector<8x324xf32> to vector<8x16xf32>
    %c0_209 = arith.constant 0 : index
    %c0_210 = arith.constant 0 : index
    %c16 = arith.constant 16 : index
    %329 = vector.load %arg12[%c0_209, %c0_210, %c16] : memref<1x8x256xf32, #tpu.memory_space<vmem>>, vector<1x8x16xf32>
    %330 = vector.shape_cast %329 : vector<1x8x16xf32> to vector<8x16xf32>
    %331 = vector.shape_cast %328 : vector<8x16xf32> to vector<1x8x16xf32>
    tpu.vector_store %arg12[%c0_209, %c0_210, %c16], %331 {strides = array<i32>} : memref<1x8x256xf32, #tpu.memory_space<vmem>>, vector<1x8x16xf32>,
    %332 = vector.extract_strided_slice %323 {offsets = [0, 55], sizes = [8, 16], strides = [1, 1]} : vector<8x324xf32> to vector<8x16xf32>
    %c0_211 = arith.constant 0 : index
    %c0_212 = arith.constant 0 : index
    %c32 = arith.constant 32 : index
    %333 = vector.load %arg12[%c0_211, %c0_212, %c32] : memref<1x8x256xf32, #tpu.memory_space<vmem>>, vector<1x8x16xf32>
    %334 = vector.shape_cast %333 : vector<1x8x16xf32> to vector<8x16xf32>
    %335 = vector.shape_cast %332 : vector<8x16xf32> to vector<1x8x16xf32>
    tpu.vector_store %arg12[%c0_211, %c0_212, %c32], %335 {strides = array<i32>} : memref<1x8x256xf32, #tpu.memory_space<vmem>>, vector<1x8x16xf32>,
    %336 = vector.extract_strided_slice %323 {offsets = [0, 73], sizes = [8, 16], strides = [1, 1]} : vector<8x324xf32> to vector<8x16xf32>
    %c0_213 = arith.constant 0 : index
    %c0_214 = arith.constant 0 : index
    %c48 = arith.constant 48 : index
    %337 = vector.load %arg12[%c0_213, %c0_214, %c48] : memref<1x8x256xf32, #tpu.memory_space<vmem>>, vector<1x8x16xf32>
    %338 = vector.shape_cast %337 : vector<1x8x16xf32> to vector<8x16xf32>
    %339 = vector.shape_cast %336 : vector<8x16xf32> to vector<1x8x16xf32>
    tpu.vector_store %arg12[%c0_213, %c0_214, %c48], %339 {strides = array<i32>} : memref<1x8x256xf32, #tpu.memory_space<vmem>>, vector<1x8x16xf32>,
    %340 = vector.extract_strided_slice %323 {offsets = [0, 91], sizes = [8, 16], strides = [1, 1]} : vector<8x324xf32> to vector<8x16xf32>
    %c0_215 = arith.constant 0 : index
    %c0_216 = arith.constant 0 : index
    %c64 = arith.constant 64 : index
    %341 = vector.load %arg12[%c0_215, %c0_216, %c64] : memref<1x8x256xf32, #tpu.memory_space<vmem>>, vector<1x8x16xf32>
    %342 = vector.shape_cast %341 : vector<1x8x16xf32> to vector<8x16xf32>
    %343 = vector.shape_cast %340 : vector<8x16xf32> to vector<1x8x16xf32>
    tpu.vector_store %arg12[%c0_215, %c0_216, %c64], %343 {strides = array<i32>} : memref<1x8x256xf32, #tpu.memory_space<vmem>>, vector<1x8x16xf32>,
    %344 = vector.extract_strided_slice %323 {offsets = [0, 109], sizes = [8, 16], strides = [1, 1]} : vector<8x324xf32> to vector<8x16xf32>
    %c0_217 = arith.constant 0 : index
    %c0_218 = arith.constant 0 : index
    %c80 = arith.constant 80 : index
    %345 = vector.load %arg12[%c0_217, %c0_218, %c80] : memref<1x8x256xf32, #tpu.memory_space<vmem>>, vector<1x8x16xf32>
    %346 = vector.shape_cast %345 : vector<1x8x16xf32> to vector<8x16xf32>
    %347 = vector.shape_cast %344 : vector<8x16xf32> to vector<1x8x16xf32>
    tpu.vector_store %arg12[%c0_217, %c0_218, %c80], %347 {strides = array<i32>} : memref<1x8x256xf32, #tpu.memory_space<vmem>>, vector<1x8x16xf32>,
    %348 = vector.extract_strided_slice %323 {offsets = [0, 127], sizes = [8, 16], strides = [1, 1]} : vector<8x324xf32> to vector<8x16xf32>
    %c0_219 = arith.constant 0 : index
    %c0_220 = arith.constant 0 : index
    %c96 = arith.constant 96 : index
    %349 = vector.load %arg12[%c0_219, %c0_220, %c96] : memref<1x8x256xf32, #tpu.memory_space<vmem>>, vector<1x8x16xf32>
    %350 = vector.shape_cast %349 : vector<1x8x16xf32> to vector<8x16xf32>
    %351 = vector.shape_cast %348 : vector<8x16xf32> to vector<1x8x16xf32>
    tpu.vector_store %arg12[%c0_219, %c0_220, %c96], %351 {strides = array<i32>} : memref<1x8x256xf32, #tpu.memory_space<vmem>>, vector<1x8x16xf32>,
    %352 = vector.extract_strided_slice %323 {offsets = [0, 145], sizes = [8, 16], strides = [1, 1]} : vector<8x324xf32> to vector<8x16xf32>
    %c0_221 = arith.constant 0 : index
    %c0_222 = arith.constant 0 : index
    %c112 = arith.constant 112 : index
    %353 = vector.load %arg12[%c0_221, %c0_222, %c112] : memref<1x8x256xf32, #tpu.memory_space<vmem>>, vector<1x8x16xf32>
    %354 = vector.shape_cast %353 : vector<1x8x16xf32> to vector<8x16xf32>
    %355 = vector.shape_cast %352 : vector<8x16xf32> to vector<1x8x16xf32>
    tpu.vector_store %arg12[%c0_221, %c0_222, %c112], %355 {strides = array<i32>} : memref<1x8x256xf32, #tpu.memory_space<vmem>>, vector<1x8x16xf32>,
    %356 = vector.extract_strided_slice %323 {offsets = [0, 163], sizes = [8, 16], strides = [1, 1]} : vector<8x324xf32> to vector<8x16xf32>
    %c0_223 = arith.constant 0 : index
    %c0_224 = arith.constant 0 : index
    %c128_225 = arith.constant 128 : index
    %357 = vector.load %arg12[%c0_223, %c0_224, %c128_225] : memref<1x8x256xf32, #tpu.memory_space<vmem>>, vector<1x8x16xf32>
    %358 = vector.shape_cast %357 : vector<1x8x16xf32> to vector<8x16xf32>
    %359 = vector.shape_cast %356 : vector<8x16xf32> to vector<1x8x16xf32>
    tpu.vector_store %arg12[%c0_223, %c0_224, %c128_225], %359 {strides = array<i32>} : memref<1x8x256xf32, #tpu.memory_space<vmem>>, vector<1x8x16xf32>,
    %360 = vector.extract_strided_slice %323 {offsets = [0, 181], sizes = [8, 16], strides = [1, 1]} : vector<8x324xf32> to vector<8x16xf32>
    %c0_226 = arith.constant 0 : index
    %c0_227 = arith.constant 0 : index
    %c144 = arith.constant 144 : index
    %361 = vector.load %arg12[%c0_226, %c0_227, %c144] : memref<1x8x256xf32, #tpu.memory_space<vmem>>, vector<1x8x16xf32>
    %362 = vector.shape_cast %361 : vector<1x8x16xf32> to vector<8x16xf32>
    %363 = vector.shape_cast %360 : vector<8x16xf32> to vector<1x8x16xf32>
    tpu.vector_store %arg12[%c0_226, %c0_227, %c144], %363 {strides = array<i32>} : memref<1x8x256xf32, #tpu.memory_space<vmem>>, vector<1x8x16xf32>,
    %364 = vector.extract_strided_slice %323 {offsets = [0, 199], sizes = [8, 16], strides = [1, 1]} : vector<8x324xf32> to vector<8x16xf32>
    %c0_228 = arith.constant 0 : index
    %c0_229 = arith.constant 0 : index
    %c160 = arith.constant 160 : index
    %365 = vector.load %arg12[%c0_228, %c0_229, %c160] : memref<1x8x256xf32, #tpu.memory_space<vmem>>, vector<1x8x16xf32>
    %366 = vector.shape_cast %365 : vector<1x8x16xf32> to vector<8x16xf32>
    %367 = vector.shape_cast %364 : vector<8x16xf32> to vector<1x8x16xf32>
    tpu.vector_store %arg12[%c0_228, %c0_229, %c160], %367 {strides = array<i32>} : memref<1x8x256xf32, #tpu.memory_space<vmem>>, vector<1x8x16xf32>,
    %368 = vector.extract_strided_slice %323 {offsets = [0, 217], sizes = [8, 16], strides = [1, 1]} : vector<8x324xf32> to vector<8x16xf32>
    %c0_230 = arith.constant 0 : index
    %c0_231 = arith.constant 0 : index
    %c176 = arith.constant 176 : index
    %369 = vector.load %arg12[%c0_230, %c0_231, %c176] : memref<1x8x256xf32, #tpu.memory_space<vmem>>, vector<1x8x16xf32>
    %370 = vector.shape_cast %369 : vector<1x8x16xf32> to vector<8x16xf32>
    %371 = vector.shape_cast %368 : vector<8x16xf32> to vector<1x8x16xf32>
    tpu.vector_store %arg12[%c0_230, %c0_231, %c176], %371 {strides = array<i32>} : memref<1x8x256xf32, #tpu.memory_space<vmem>>, vector<1x8x16xf32>,
    %372 = vector.extract_strided_slice %323 {offsets = [0, 235], sizes = [8, 16], strides = [1, 1]} : vector<8x324xf32> to vector<8x16xf32>
    %c0_232 = arith.constant 0 : index
    %c0_233 = arith.constant 0 : index
    %c192 = arith.constant 192 : index
    %373 = vector.load %arg12[%c0_232, %c0_233, %c192] : memref<1x8x256xf32, #tpu.memory_space<vmem>>, vector<1x8x16xf32>
    %374 = vector.shape_cast %373 : vector<1x8x16xf32> to vector<8x16xf32>
    %375 = vector.shape_cast %372 : vector<8x16xf32> to vector<1x8x16xf32>
    tpu.vector_store %arg12[%c0_232, %c0_233, %c192], %375 {strides = array<i32>} : memref<1x8x256xf32, #tpu.memory_space<vmem>>, vector<1x8x16xf32>,
    %376 = vector.extract_strided_slice %323 {offsets = [0, 253], sizes = [8, 16], strides = [1, 1]} : vector<8x324xf32> to vector<8x16xf32>
    %c0_234 = arith.constant 0 : index
    %c0_235 = arith.constant 0 : index
    %c208 = arith.constant 208 : index
    %377 = vector.load %arg12[%c0_234, %c0_235, %c208] : memref<1x8x256xf32, #tpu.memory_space<vmem>>, vector<1x8x16xf32>
    %378 = vector.shape_cast %377 : vector<1x8x16xf32> to vector<8x16xf32>
    %379 = vector.shape_cast %376 : vector<8x16xf32> to vector<1x8x16xf32>
    tpu.vector_store %arg12[%c0_234, %c0_235, %c208], %379 {strides = array<i32>} : memref<1x8x256xf32, #tpu.memory_space<vmem>>, vector<1x8x16xf32>,
    %380 = vector.extract_strided_slice %323 {offsets = [0, 271], sizes = [8, 16], strides = [1, 1]} : vector<8x324xf32> to vector<8x16xf32>
    %c0_236 = arith.constant 0 : index
    %c0_237 = arith.constant 0 : index
    %c224 = arith.constant 224 : index
    %381 = vector.load %arg12[%c0_236, %c0_237, %c224] : memref<1x8x256xf32, #tpu.memory_space<vmem>>, vector<1x8x16xf32>
    %382 = vector.shape_cast %381 : vector<1x8x16xf32> to vector<8x16xf32>
    %383 = vector.shape_cast %380 : vector<8x16xf32> to vector<1x8x16xf32>
    tpu.vector_store %arg12[%c0_236, %c0_237, %c224], %383 {strides = array<i32>} : memref<1x8x256xf32, #tpu.memory_space<vmem>>, vector<1x8x16xf32>,
    %384 = vector.extract_strided_slice %323 {offsets = [0, 289], sizes = [8, 16], strides = [1, 1]} : vector<8x324xf32> to vector<8x16xf32>
    %c0_238 = arith.constant 0 : index
    %c0_239 = arith.constant 0 : index
    %c240 = arith.constant 240 : index
    %385 = vector.load %arg12[%c0_238, %c0_239, %c240] : memref<1x8x256xf32, #tpu.memory_space<vmem>>, vector<1x8x16xf32>
    %386 = vector.shape_cast %385 : vector<1x8x16xf32> to vector<8x16xf32>
    %387 = vector.shape_cast %384 : vector<8x16xf32> to vector<1x8x16xf32>
    tpu.vector_store %arg12[%c0_238, %c0_239, %c240], %387 {strides = array<i32>} : memref<1x8x256xf32, #tpu.memory_space<vmem>>, vector<1x8x16xf32>,
    return
  }
  func.func @transform_0(%arg0: i32) -> (i32, i32, i32) {
    %c0_i32 = arith.constant 0 : i32
    %c0_i32_0 = arith.constant 0 : i32
    %c0_i32_1 = arith.constant 0 : i32
    return %arg0, %c0_i32, %c0_i32_0 : i32, i32, i32
  }
  func.func @transform_1(%arg0: i32) -> (i32, i32, i32) {
    %c0_i32 = arith.constant 0 : i32
    %c0_i32_0 = arith.constant 0 : i32
    %c0_i32_1 = arith.constant 0 : i32
    return %arg0, %c0_i32, %c0_i32_0 : i32, i32, i32
  }
  func.func @transform_2(%arg0: i32) -> (i32, i32) {
    %c0_i32 = arith.constant 0 : i32
    %c0_i32_0 = arith.constant 0 : i32
    %c0_i32_1 = arith.constant 0 : i32
    return %c0_i32, %c0_i32_0 : i32, i32
  }
  func.func @transform_3(%arg0: i32) -> (i32, i32) {
    %c0_i32 = arith.constant 0 : i32
    %c0_i32_0 = arith.constant 0 : i32
    %c0_i32_1 = arith.constant 0 : i32
    return %c0_i32, %c0_i32_0 : i32, i32
  }
  func.func @transform_4(%arg0: i32) -> (i32, i32) {
    %c0_i32 = arith.constant 0 : i32
    %c0_i32_0 = arith.constant 0 : i32
    %c0_i32_1 = arith.constant 0 : i32
    return %c0_i32, %c0_i32_0 : i32, i32
  }
  func.func @transform_5(%arg0: i32) -> (i32, i32, i32) {
    %c0_i32 = arith.constant 0 : i32
    %c0_i32_0 = arith.constant 0 : i32
    %c0_i32_1 = arith.constant 0 : i32
    %c0_i32_2 = arith.constant 0 : i32
    return %c0_i32, %c0_i32_0, %c0_i32_1 : i32, i32, i32
  }
  func.func @transform_6(%arg0: i32) -> (i32, i32) {
    %c0_i32 = arith.constant 0 : i32
    %c0_i32_0 = arith.constant 0 : i32
    %c0_i32_1 = arith.constant 0 : i32
    return %c0_i32, %c0_i32_0 : i32, i32
  }
  func.func @transform_7(%arg0: i32) -> (i32, i32, i32) {
    %c0_i32 = arith.constant 0 : i32
    %c0_i32_0 = arith.constant 0 : i32
    %c0_i32_1 = arith.constant 0 : i32
    %c0_i32_2 = arith.constant 0 : i32
    return %c0_i32, %c0_i32_0, %c0_i32_1 : i32, i32, i32
  }
  func.func @transform_8(%arg0: i32) -> (i32, i32, i32) {
    %c0_i32 = arith.constant 0 : i32
    %c0_i32_0 = arith.constant 0 : i32
    %c0_i32_1 = arith.constant 0 : i32
    %c0_i32_2 = arith.constant 0 : i32
    return %c0_i32, %c0_i32_0, %c0_i32_1 : i32, i32, i32
  }
  func.func @transform_9(%arg0: i32) -> (i32, i32, i32) {
    %c0_i32 = arith.constant 0 : i32
    %c0_i32_0 = arith.constant 0 : i32
    %c0_i32_1 = arith.constant 0 : i32
    %c0_i32_2 = arith.constant 0 : i32
    return %c0_i32, %c0_i32_0, %c0_i32_1 : i32, i32, i32
  }
  func.func @transform_10(%arg0: i32) -> (i32, i32, i32) {
    %c0_i32 = arith.constant 0 : i32
    %c0_i32_0 = arith.constant 0 : i32
    %c0_i32_1 = arith.constant 0 : i32
    %c0_i32_2 = arith.constant 0 : i32
    return %c0_i32, %c0_i32_0, %c0_i32_1 : i32, i32, i32
  }
  func.func @transform_11(%arg0: i32) -> (i32, i32, i32) {
    %c0_i32 = arith.constant 0 : i32
    %c0_i32_0 = arith.constant 0 : i32
    %c0_i32_1 = arith.constant 0 : i32
    return %arg0, %c0_i32, %c0_i32_0 : i32, i32, i32
  }
}

</mosaic_0001>

<bundles_post_ra>
// kernel: unet_up_forward.1
= control target key start
LH: loop header
LB: loop body
LE: loop exit
PB: predicated region body
PF: predicated region fallthrough
CT: control target
= control target key end

     0   :  { %s5158_s17 = smov 0   ;;  %s5904_s0 = inlined_call_operand.vmem [shape: f32[2,4,64], index: 0, kind: input, shape index: {}]   ;;  %s5905_s1 = inlined_call_operand.vmem [shape: f32[2,4,64], index: 1, kind: input, shape index: {}]   ;;  %s5906_s2 = inlined_call_operand.vmem [shape: f32[32,4], index: 2, kind: input, shape index: {}]   ;;  %s5907_s3 = inlined_call_operand.vmem [shape: f32[32,4], index: 3, kind: input, shape index: {}]   ;;  %s5908_s4 = inlined_call_operand.vmem [shape: f32[16,1], index: 4, kind: input, shape index: {}]   ;;  %s5909_s5 = inlined_call_operand.vmem [shape: f32[2,8,16], index: 5, kind: input, shape index: {}]   ;;  %s5910_s6 = inlined_call_operand.vmem [shape: f32[1,324], index: 6, kind: input, shape index: {}]   ;;  %s5911_s7 = inlined_call_operand.vmem [shape: f32[4,8,72], index: 7, kind: input, shape index: {}]   ;;  %s5912_s8 = inlined_call_operand.vmem [shape: f32[4,8,1], index: 8, kind: input, shape index: {}]   ;;  %s5913_s9 = inlined_call_operand.vmem [shape: f32[4,8,1], index: 9, kind: input, shape index: {}]   ;;  %s5914_s10 = inlined_call_operand.vmem [shape: f32[4,8,1], index: 10, kind: input, shape index: {}]   ;;  %s5915_s11 = inlined_call_operand.vmem [shape: f32[2,8,256], index: 11, kind: output, shape index: {}]  }
   0x1 LB: > { %s3953_s18 = sadd.s32 4294967295, %s5052_s17   ;;  %p3957_p0 = scmp.ge.s32.totalorder %s5052_s17, 1  ;;  %s5052_s17 = sphi %s5158_s17, %s21_s17  }
   0x2   : > { %p345_p1 = scmp.lt.s32.totalorder %s5052_s17, 3 }
   0x4   : > { %p346_p2 = pnand %p3957_p0, %p345_p1 }
   0x5   : > { %p388_p3 = scmp.lt.s32.totalorder (!%p346_p2), %s3953_s18, 1  ;;  %v413_v0 = vld [vmem:[%s5907_s3] sm:$0xff] (!%p346_p2)  ;;  %vm418_vm0 = vcmask (!%p346_p2), 31744   ;;  %vm431_vm1 = vcmask (!%p346_p2), 1043456   ;;  %v414_v3 = vld [vmem:[%s5907_s3 + $0x8] sm:$0xff] (!%p346_p2)  ;;  %v415_v4 = vld [vmem:[%s5907_s3 + $0x10] sm:$0xff] (!%p346_p2) }
   0x6   : > { %349 = sbr.rel (%p346_p2) target bundleno = 4211 (0x1073), region = 64  ;;  %4128 = vmatprep.mubr.msk.f32.mxu0 (!%p346_p2), %vm418_vm0, %v413_v0  ;;  %v416_v5 = vld [vmem:[%s5907_s3 + $0x18] sm:$0xff] (!%p346_p2)  ;;  %v408_v6 = vld [vmem:[%s5906_s2] sm:$0xff] (!%p346_p2)  ;;  %v409_v7 = vld [vmem:[%s5906_s2 + $0x8] sm:$0xff] (!%p346_p2)  ;;  %v5054_v12 = vmov (!%p346_p2), 0   ;;  %s5055_s29 = smov (!%p346_p2), 120  }
   0x7   : > { %v410_v8 = vld [vmem:[%s5906_s2 + $0x10] sm:$0xff] (!%p346_p2)  ;;  %v411_v9 = vld [vmem:[%s5906_s2 + $0x18] sm:$0xff] (!%p346_p2)  ;;  %v5210_v10 = vld [vmem:[%s5909_s5 + $0x8] sm:$0xff] (!%p346_p2)  ;;  %4491 = vset.pattern.permute.xlu1 (!%p346_p2), %v5054_v12  ;;  %4490 = vset.pattern.permute.xlu0 (!%p346_p2), %v5054_v12  ;;  %vm625_vm2 = vcmask (!%p346_p2), 64512   ;;  %s5056_s30 = smov (!%p346_p2), 104   ;;  %s5057_s12 = smov (!%p346_p2), 112  }
   0x8   : > { %4142 = vmatprep.subr.mxu1 (!%p346_p2), %v5210_v10  ;;  %v5219_v11 = vld [vmem:[%s5909_s5] sm:$0xff] (!%p346_p2)  ;;  %s5058_s13 = smov (!%p346_p2), 88   ;;  %s5059_s14 = smov (!%p346_p2), 96   ;;  %v624_v17 = vld [vmem:[%s5908_s4 + $0x8] sm:$0xff] (!%p346_p2)  ;;  %v5062_v47 = vmov (!%p346_p2), 0.0   ;;  %vm804_vm3 = vcmask (!%p346_p2), 285848  }
   0x9   : > { %4143 = vmatpush3.msra.mxu1 (!%p346_p2), %v5210_v10  ;;  %s5060_s15 = smov (!%p346_p2), 72   ;;  %s5061_s16 = smov (!%p346_p2), 80   ;;  %v623_v18 = vld [vmem:[%s5908_s4] sm:$0xff] (!%p346_p2)  ;;  %403 = vst [vmem:[#allocation2 + $0x8] sm:$0xff] (!%p346_p2), %v5062_v47  ;;  %402 = vst [vmem:[#allocation2] sm:$0xff] (!%p346_p2), %v5062_v47  ;;  %vm810_vm4 = vcmask (!%p346_p2), 433448  }
   0xa   : > { %4147 = vmatprep.subr.mxu1 (!%p346_p2), %v5219_v11  ;;  %404 = vst [vmem:[#allocation2 + $0x10] sm:$0xff] (!%p346_p2), %v5062_v47  ;;  %405 = vst [vmem:[#allocation2 + $0x18] sm:$0xff] (!%p346_p2), %v5062_v47  ;;  %s5063_s23 = smov (!%p346_p2), 37   ;;  %s5065_s25 = smov (!%p346_p2), 73   ;;  %vm984_vm5 = vcmask (!%p346_p2), 581048   ;;  %vm990_vm6 = vcmask (!%p346_p2), 728648  }
   0xb   : > { %s5066_s26 = smov (!%p346_p2), 55   ;;  %s5068_s28 = smov (!%p346_p2), 91   ;;  %vm1164_vm7 = vcmask (!%p346_p2), 876248   ;;  %vm1170_vm8 = vcmask (!%p346_p2), 1023848   ;;  %vm1344_vm9 = vcmask (!%p346_p2), 1048568   ;;  %vm1346_vm10 = vcmask (!%p346_p2), 121856  }
   0xc   : > { %s5076_s19 = smov (!%p346_p2), 107   ;;  %s5077_s20 = smov (!%p346_p2), 15   ;;  %vm1352_vm11 = vcmask (!%p346_p2), 269448   ;;  %vm1526_vm12 = vcmask (!%p346_p2), 417048   ;;  %vm1532_vm13 = vcmask (!%p346_p2), 564648   ;;  %vm1894_vm14 = vcmask (!%p346_p2), 105472  }
   0xd   : > { %s5917_s18 = smov (!%p388_p3, %s3953_s18), 1  ;;  %vm1706_vm15 = vcmask 712248   ;;  %s5079_s22 = smov 126  }
   0xe   : > { %s3958_s21 = sshll.u32 %s5917_s18, 2 }
   0xf   : > { %s391_s24 = scalar_lea.vmem %s5904_s0, %s3958_s21  ;;  %s395_s27 = scalar_lea.vmem %s5905_s1, %s3958_s21 }
  0x10   : > { %v412_v1 = vld [vmem:[%s391_s24] sm:$0xf]  ;;  %s5064_s24 = smov 19   ;;  %s5078_s21 = smov 33  }
  0x11   : > { %v417_v2 = vld [vmem:[%s395_s27] sm:$0xf]  ;;  %s5067_s27 = smov 109  }
  0x12   : > { %4126 = vmatprep.subr.msk.mxu0 %vm431_vm1, %v417_v2 }
  0x13   : > { %4127 = vmatpush3.msk.msra.mxu0 %vm431_vm1, %v417_v2 }
  0x14   : > { %4129 = vmatmul.mubr.msk.f32.vlgmr.msra.gmra.mrb[0].mxu0 %vm418_vm0, %v414_v3  ;;  %4134 = vmatprep.subr.msk.mxu0 %vm431_vm1, %v412_v1 }
  0x15   : > { %4135 = vmatpush3.msk.msra.mxu0 %vm431_vm1, %v412_v1  ;;  %4131 = vmatprep.mubr.msk.f32.mxu0 %vm418_vm0, %v415_v4  ;;  %vm1886_vm1 = vcmask 1007448  }
  0x16   : > { %4162 = vmatprep.subr.mxu0 %v5210_v10 }
  0x18   : > { %4132 = vmatmul.mubr.msk.f32.gmra.mrb[2].mxu0 %vm418_vm0, %v416_v5 }
  0x19   : > { %4136 = vmatprep.mubr.msk.f32.mxu0 %vm418_vm0, %v408_v6 }
  0x1c   : > { %4137 = vmatmul.mubr.msk.f32.vlgmr.msra.gmra.mrb[0].mxu0 %vm418_vm0, %v409_v7 }
  0x1d   : > { %4139 = vmatprep.mubr.msk.f32.mxu0 %vm418_vm0, %v410_v8  ;;  %4163 = vmatpush3.msra.mxu0 %v5210_v10 }
  0x1e   : > { %4167 = vmatprep.subr.mxu0 %v5219_v11 }
  0x20   : > { %4140 = vmatmul.mubr.msk.f32.gmra.mrb[2].mxu0 %vm418_vm0, %v411_v9  ;;  %vm1712_vm0 = vcmask 859848  }
  0xef   : > { %v4138_v13 = vpop.f32.mrb[0].mxu0 }
  0xf0   : > { %897 = vrot.lane.b32.xlu1 %v4138_v13, %s5055_s29  ;;  %v601_v14 = vpop.f32.mrb[1].mxu0 }
  0xf3   : > { %v4141_v15 = vpop.f32.mrb[2].mxu0 }
  0xf4   : > { %895 = vrot.lane.b32.xlu1 %v601_v14, %s5055_s29  ;;  %814 = vrot.lane.b32.xlu0 %v4141_v15, %s5055_s29  ;;  %v611_v16 = vpop.f32.mrb[3].mxu0 }
  0xf5   : > { %4144 = vmatprep.mubr.msk.f32.mxu1 %vm625_vm2, %v611_v16 }
  0xf6   : > { %4145 = vmatmul.mubr.msk.f32.vlgmr.msra.gmra.mrb[0].mxu1 %vm625_vm2, %v4141_v15 }
  0xf7   : > { %4149 = vmatprep.mubr.msk.f32.mxu1 %vm625_vm2, %v601_v14  ;;  %4148 = vmatpush3.msra.mxu1 %v5219_v11 }
  0xf8   : > { %1174 = vrot.lane.b32.xlu1 %v4141_v15, %s5056_s30  ;;  %812 = vrot.lane.b32.xlu0 %v611_v16, %s5055_s29  ;;  %s5069_s29 = smov 17  }
  0xf9   : > { %4152 = vmatprep.subr.mxu1 %v5210_v10 }
  0xfc   : > { %1255 = vrot.lane.b32.xlu1 %v601_v14, %s5056_s30  ;;  %994 = vrot.lane.b32.xlu0 %v4141_v15, %s5057_s12 }
  0xfe   : > { %4150 = vmatmul.mubr.msk.f32.vlgmr.msra.gmra.mrb[0].mxu1 %vm625_vm2, %v4138_v13 }
  0xff   : > { %4153 = vmatpush3.msra.mxu1 %v5210_v10 }
 0x100   : > { %1172 = vrot.lane.b32.xlu1 %v611_v16, %s5056_s30  ;;  %1075 = vrot.lane.b32.xlu0 %v601_v14, %s5057_s12 }
 0x101   : > { %4157 = vmatprep.subr.mxu1 %v5219_v11 }
 0x104   : > { %1257 = vrot.lane.b32.xlu1 %v4138_v13, %s5056_s30  ;;  %992 = vrot.lane.b32.xlu0 %v611_v16, %s5057_s12  ;;  %s5070_s30 = smov 53  }
 0x108   : > { %1536 = vrot.lane.b32.xlu1 %v4141_v15, %s5058_s13  ;;  %1077 = vrot.lane.b32.xlu0 %v4138_v13, %s5057_s12  ;;  %s5071_s12 = smov 127  }
 0x10c   : > { %1534 = vrot.lane.b32.xlu1 %v611_v16, %s5058_s13  ;;  %1356 = vrot.lane.b32.xlu0 %v4141_v15, %s5059_s14 }
 0x110   : > { %1617 = vrot.lane.b32.xlu1 %v601_v14, %s5058_s13  ;;  %1354 = vrot.lane.b32.xlu0 %v611_v16, %s5059_s14 }
 0x114   : > { %1619 = vrot.lane.b32.xlu1 %v4138_v13, %s5058_s13  ;;  %1437 = vrot.lane.b32.xlu0 %v601_v14, %s5059_s14  ;;  %s5072_s13 = smov 35  }
 0x118   : > { %1896 = vrot.lane.b32.xlu1 %v611_v16, %s5060_s15  ;;  %1439 = vrot.lane.b32.xlu0 %v4138_v13, %s5059_s14  ;;  %s5073_s14 = smov 89  }
 0x11c   : > { %1898 = vrot.lane.b32.xlu1 %v4141_v15, %s5060_s15  ;;  %1714 = vrot.lane.b32.xlu0 %v611_v16, %s5061_s16 }
 0x120   : > { %1979 = vrot.lane.b32.xlu1 %v601_v14, %s5060_s15  ;;  %1716 = vrot.lane.b32.xlu0 %v4141_v15, %s5061_s16 }
 0x124   : > { %1981 = vrot.lane.b32.xlu1 %v4138_v13, %s5060_s15  ;;  %1797 = vrot.lane.b32.xlu0 %v601_v14, %s5061_s16  ;;  %s5074_s15 = smov 125  }
 0x128   : > { %1799 = vrot.lane.b32.xlu0 %v4138_v13, %s5061_s16  ;;  %795 = vperm.xlu1 %4491, %v624_v17   ;;  %s5075_s16 = smov 71  }
 0x12c   : > { %790 = vperm.xlu0 %4490, %v623_v18  }
 0x162   : > { %v898_v19 = vpop.permute.xlu1 %897 }
 0x166   : > { %v896_v20 = vpop.permute.xlu1 %895  ;;  %v815_v21 = vpop.permute.xlu0 %814 }
 0x16a   : > { %v1175_v22 = vpop.permute.xlu1 %1174  ;;  %v813_v23 = vpop.permute.xlu0 %812 }
 0x16b   : > { %4154 = vmatprep.mubr.msk.f32.mxu1 %vm625_vm2, %v813_v23 }
 0x16c   : > { %4155 = vmatmul.mubr.msk.f32.vlgmr.msra.gmra.mrb[2].mxu1 %vm625_vm2, %v815_v21 }
 0x16d   : > { %4159 = vmatprep.mubr.msk.f32.mxu1 %vm625_vm2, %v896_v20  ;;  %4158 = vmatpush3.msra.mxu1 %v5219_v11 }
 0x16e   : > { %v1256_v24 = vpop.permute.xlu1 %1255  ;;  %v995_v25 = vpop.permute.xlu0 %994  ;;  %4172 = vmatprep.subr.mxu1 %v5210_v10 }
 0x172   : > { %v1173_v26 = vpop.permute.xlu1 %1172  ;;  %v1076_v27 = vpop.permute.xlu0 %1075 }
 0x174   : > { %4160 = vmatmul.mubr.msk.f32.vlgmr.msra.gmra.mrb[2].mxu1 %vm625_vm2, %v898_v19 }
 0x175   : > { %4174 = vmatprep.mubr.msk.f32.mxu1 %vm625_vm2, %v1173_v26  ;;  %4173 = vmatpush3.msra.mxu1 %v5210_v10 }
 0x176   : > { %v1258_v28 = vpop.permute.xlu1 %1257  ;;  %v993_v29 = vpop.permute.xlu0 %992  ;;  %4177 = vmatprep.subr.mxu1 %v5219_v11 }
 0x177   : > { %4164 = vmatprep.mubr.msk.f32.mxu0 %vm625_vm2, %v993_v29 }
 0x178   : > { %4165 = vmatmul.mubr.msk.f32.vlgmr.msra.gmra.mrb[4].mxu0 %vm625_vm2, %v995_v25  ;;  %4175 = vmatmul.mubr.msk.f32.vlgmr.msra.gmra.mrb[4].mxu1 %vm625_vm2, %v1175_v22 }
 0x179   : > { %4169 = vmatprep.mubr.msk.f32.mxu0 %vm625_vm2, %v1076_v27  ;;  %4179 = vmatprep.mubr.msk.f32.mxu1 %vm625_vm2, %v1256_v24 }
 0x17a   : > { %v1537_v30 = vpop.permute.xlu1 %1536  ;;  %4168 = vmatpush3.msra.mxu0 %v5219_v11  ;;  %v1078_v31 = vpop.permute.xlu0 %1077  ;;  %4178 = vmatpush3.msra.mxu1 %v5219_v11 }
 0x17b   : > { %4182 = vmatprep.subr.mxu0 %v5210_v10  ;;  %4192 = vmatprep.subr.mxu1 %v5210_v10 }
 0x17e   : > { %v1535_v32 = vpop.permute.xlu1 %1534  ;;  %v1357_v33 = vpop.permute.xlu0 %1356 }
 0x180   : > { %4170 = vmatmul.mubr.msk.f32.vlgmr.msra.gmra.mrb[4].mxu0 %vm625_vm2, %v1078_v31  ;;  %4180 = vmatmul.mubr.msk.f32.vlgmr.msra.gmra.mrb[4].mxu1 %vm625_vm2, %v1258_v28 }
 0x181   : > { %4194 = vmatprep.mubr.msk.f32.mxu1 %vm625_vm2, %v1535_v32  ;;  %4183 = vmatpush3.msra.mxu0 %v5210_v10 }
 0x182   : > { %v1618_v34 = vpop.permute.xlu1 %1617  ;;  %v1355_v35 = vpop.permute.xlu0 %1354  ;;  %4193 = vmatpush3.msra.mxu1 %v5210_v10  ;;  %4187 = vmatprep.subr.mxu0 %v5219_v11 }
 0x183   : > { %4184 = vmatprep.mubr.msk.f32.mxu0 %vm625_vm2, %v1355_v35  ;;  %4197 = vmatprep.subr.mxu1 %v5219_v11 }
 0x184   : > { %4185 = vmatmul.mubr.msk.f32.vlgmr.msra.gmra.mrb[6].mxu0 %vm625_vm2, %v1357_v33  ;;  %4195 = vmatmul.mubr.msk.f32.vlgmr.msra.gmra.mrb[6].mxu1 %vm625_vm2, %v1537_v30 }
 0x185   : > { %4199 = vmatprep.mubr.msk.f32.mxu1 %vm625_vm2, %v1618_v34  ;;  %4188 = vmatpush3.msra.mxu0 %v5219_v11 }
 0x186   : > { %v1620_v36 = vpop.permute.xlu1 %1619  ;;  %v1438_v37 = vpop.permute.xlu0 %1437  ;;  %4198 = vmatpush3.msra.mxu1 %v5219_v11  ;;  %4202 = vmatprep.subr.mxu0 %v5210_v10 }
 0x187   : > { %4189 = vmatprep.mubr.msk.f32.mxu0 %vm625_vm2, %v1438_v37  ;;  %4212 = vmatprep.subr.mxu1 %v5210_v10 }
 0x18a   : > { %v1897_v38 = vpop.permute.xlu1 %1896  ;;  %v1440_v39 = vpop.permute.xlu0 %1439 }
 0x18c   : > { %4190 = vmatmul.mubr.msk.f32.vlgmr.msra.gmra.mrb[6].mxu0 %vm625_vm2, %v1440_v39  ;;  %4200 = vmatmul.mubr.msk.f32.vlgmr.msra.gmra.mrb[6].mxu1 %vm625_vm2, %v1620_v36 }
 0x18d   : > { %4214 = vmatprep.mubr.msk.f32.mxu1 %vm625_vm2, %v1897_v38  ;;  %4213 = vmatpush3.msra.mxu1 %v5210_v10 }
 0x18e   : > { %v1899_v40 = vpop.permute.xlu1 %1898  ;;  %v1715_v41 = vpop.permute.xlu0 %1714  ;;  %4203 = vmatpush3.msra.mxu0 %v5210_v10  ;;  %4217 = vmatprep.subr.mxu1 %v5219_v11 }
 0x18f   : > { %4204 = vmatprep.mubr.msk.f32.mxu0 %vm625_vm2, %v1715_v41  ;;  %4207 = vmatprep.subr.mxu0 %v5219_v11 }
 0x190   : > { %4215 = vmatmul.mubr.msk.f32.vlgmr.msra.gmra.mrb[8].mxu1 %vm625_vm2, %v1899_v40 }
 0x191   : > { %4218 = vmatpush3.msra.mxu1 %v5219_v11 }
 0x192   : > { %v1980_v42 = vpop.permute.xlu1 %1979  ;;  %v1717_v43 = vpop.permute.xlu0 %1716 }
 0x193   : > { %4205 = vmatmul.mubr.msk.f32.vlgmr.msra.gmra.mrb[8].mxu0 %vm625_vm2, %v1717_v43  ;;  %4219 = vmatprep.mubr.msk.f32.mxu1 %vm625_vm2, %v1980_v42 }
 0x194   : > { %4208 = vmatpush3.msra.mxu0 %v5219_v11 }
 0x196   : > { %v1982_v44 = vpop.permute.xlu1 %1981  ;;  %v1798_v45 = vpop.permute.xlu0 %1797 }
 0x197   : > { %4209 = vmatprep.mubr.msk.f32.mxu0 %vm625_vm2, %v1798_v45 }
 0x198   : > { %4220 = vmatmul.mubr.msk.f32.vlgmr.msra.gmra.mrb[8].mxu1 %vm625_vm2, %v1982_v44 }
 0x19a   : > { %v1800_v46 = vpop.permute.xlu0 %1799 }
 0x19b   : > { %4210 = vmatmul.mubr.msk.f32.vlgmr.msra.gmra.mrb[8].mxu0 %vm625_vm2, %v1800_v46  ;;  %vm1892_vm2 = vcmask 1048552  }
 0x19c   : > { %2369 = vmatprep.mubr.f32.mxu0 %v5062_v47 }
 0x1a7   : > { %v5292_v48 = vpop.permute.xlu1 %795 }
 0x1ab   : > { %v791_v52 = vpop.permute.xlu0 %790 }
 0x1d1   : > { %v4151_v49 = vpop.f32.mrb[0].mxu1 }
 0x1d2   : > { %v799_v50 = vadd.f32 %v4151_v49, %v5292_v48  ;;  %v779_v51 = vpop.f32.mrb[1].mxu1 }
 0x1d3   : > { %v798_v53 = vadd.f32 %v791_v52, %v779_v51 }
 0x1d4   : > { %807 = vrot.lane.b32.xlu0 %v799_v50, %s5063_s23  ;;  %s5080_s23 = smov 110  }
 0x1d8   : > { %801 = vrot.lane.b32.xlu0 %v798_v53, %s5064_s24 }
 0x246   : > { %v808_v54 = vpop.permute.xlu0 %807 }
 0x247   : > { %v4161_v55 = vpop.f32.mrb[2].mxu1 }
 0x248   : > { %v979_v56 = vadd.f32 %v4161_v55, %v5292_v48  ;;  %v969_v57 = vpop.f32.mrb[3].mxu1 }
 0x249   : > { %v978_v59 = vadd.f32 %v969_v57, %v791_v52 }
 0x24a   : > { %987 = vrot.lane.b32.xlu0 %v979_v56, %s5065_s25  ;;  %v802_v58 = vpop.permute.xlu0 %801  ;;  %s5081_s25 = smov 108   ;;  %v5084_v56 = vmov 0.0|0.0  }
 0x24b   : > { %805 = vst.msk [vmem:[#allocation2 + $0x8] sm:$0xff] %vm804_vm3, %v802_v58  ;;  %vm2068_vm3 = vcmask 253048   ;;  %4322 = vmatprep.subr.bf16.mxu1 %v5084_v56 }
 0x24c   : > { %811 = vst.msk [vmem:[#allocation2 + $0x8] sm:$0xff] %vm810_vm4, %v808_v54  ;;  %vm2074_vm4 = vcmask 400648  }
 0x24e   : > { %981 = vrot.lane.b32.xlu0 %v978_v59, %s5066_s26  ;;  %s5082_s26 = smov 92  }
 0x253   : > { %v4171_v60 = vpop.f32.mrb[4].mxu0  ;;  %v4181_v61 = vpop.f32.mrb[4].mxu1 }
 0x254   : > { %v1159_v62 = vadd.f32 %v4171_v60, %v5292_v48  ;;  %v1149_v63 = vpop.f32.mrb[5].mxu0  ;;  %v1329_v0 = vpop.f32.mrb[5].mxu1  ;;  %v1339_v2 = vadd.f32 %v4181_v61, %v5292_v48 }
 0x255   : > { %v1158_v1 = vadd.f32 %v1149_v63, %v791_v52  ;;  %v1338_v8 = vadd.f32 %v1329_v0, %v791_v52 }
 0x256   : > { %1167 = vrot.lane.b32.xlu1 %v1159_v62, %s5067_s27 }
 0x257   : > { %1161 = vrot.lane.b32.xlu0 %v1158_v1, %s5068_s28 }
 0x25a   : > { %1349 = vrot.lane.b32.xlu1 %v1339_v2, %s5069_s29  ;;  %s5083_s29 = smov 90  }
 0x25f   : > { %v4191_v3 = vpop.f32.mrb[6].mxu0  ;;  %v4201_v4 = vpop.f32.mrb[6].mxu1 }
 0x260   : > { %v1521_v5 = vadd.f32 %v4191_v3, %v5292_v48  ;;  %v1511_v6 = vpop.f32.mrb[7].mxu0  ;;  %v1691_v7 = vpop.f32.mrb[7].mxu1  ;;  %v1701_v11 = vadd.f32 %v4201_v4, %v5292_v48 }
 0x261   : > { %v1520_v9 = vadd.f32 %v1511_v6, %v791_v52  ;;  %v1700_v16 = vadd.f32 %v1691_v7, %v791_v52 }
 0x262   : > { %1529 = vrot.lane.b32.xlu1 %v1521_v5, %s5070_s30  ;;  %s5089_s30 = smov 87  }
 0x266   : > { %1341 = vrot.lane.b32.xlu1 %v1338_v8, %s5071_s12 }
 0x26a   : > { %1523 = vrot.lane.b32.xlu1 %v1520_v9, %s5072_s13  ;;  %s5090_s13 = smov 101  }
 0x26b   : > { %v4221_v10 = vpop.f32.mrb[8].mxu1 }
 0x26c   : > { %v2053_v12 = vpop.f32.mrb[9].mxu1  ;;  %v2063_v19 = vadd.f32 %v4221_v10, %v5292_v48 }
 0x26d   : > { %v2062_v18 = vadd.f32 %v2053_v12, %v791_v52 }
 0x26e   : > { %v4211_v13 = vpop.f32.mrb[8].mxu0  ;;  %1709 = vrot.lane.b32.xlu1 %v1701_v11, %s5073_s14 }
 0x26f   : > { %v1881_v14 = vadd.f32 %v4211_v13, %v5292_v48  ;;  %v1871_v15 = vpop.f32.mrb[9].mxu0 }
 0x270   : > { %v1880_v17 = vadd.f32 %v1871_v15, %v791_v52 }
 0x271   : > { %1889 = vrot.lane.b32.xlu0 %v1881_v14, %s5074_s15 }
 0x272   : > { %1703 = vrot.lane.b32.xlu1 %v1700_v16, %s5075_s16  ;;  %s5086_s16 = smov 93  }
 0x275   : > { %1883 = vrot.lane.b32.xlu0 %v1880_v17, %s5076_s19 }
 0x276   : > { %2065 = vrot.lane.b32.xlu1 %v2062_v18, %s5077_s20  ;;  %s5087_s20 = smov 105  }
 0x279   : > { %2071 = vrot.lane.b32.xlu0 %v2063_v19, %s5078_s21  ;;  %s5088_s21 = smov 103  }
 0x2bc   : > { %v988_v20 = vpop.permute.xlu0 %987 }
 0x2c0   : > { %v982_v21 = vpop.permute.xlu0 %981 }
 0x2c1   : > { %985 = vst.msk [vmem:[#allocation2 + $0x8] sm:$0xff] %vm984_vm5, %v982_v21  ;;  %vm2096_vm5 = vcmask 1039360  }
 0x2c2   : > { %991 = vst.msk [vmem:[#allocation2 + $0x8] sm:$0xff] %vm990_vm6, %v988_v20  ;;  %vm2120_vm6 = vcmask 900096  }
 0x2c8   : > { %v1168_v23 = vpop.permute.xlu1 %1167 }
 0x2c9   : > { %v1162_v22 = vpop.permute.xlu0 %1161 }
 0x2ca   : > { %1165 = vst.msk [vmem:[#allocation2 + $0x8] sm:$0xff] %vm1164_vm7, %v1162_v22  ;;  %vm2139_vm7 = vcmask 883712  }
 0x2cb   : > { %1171 = vst.msk [vmem:[#allocation2 + $0x8] sm:$0xff] %vm1170_vm8, %v1168_v23  ;;  %vm2157_vm8 = vcmask 744448  }
 0x2cc   : > { %v1350_v24 = vpop.permute.xlu1 %1349 }
 0x2d4   : > { %v1530_v25 = vpop.permute.xlu1 %1529 }
 0x2d8   : > { %v1342_v26 = vpop.permute.xlu1 %1341 }
 0x2d9   : > { %1345 = vst.msk [vmem:[#allocation2 + $0x8] sm:$0xff] %vm1344_vm9, %v1342_v26  ;;  %vm2108_vm9 = vcmask 1031168  }
 0x2da   : > { %1347 = vst.msk [vmem:[#allocation2 + $0x10] sm:$0xff] %vm1346_vm10, %v1342_v26  ;;  %vm2130_vm10 = vcmask 891904  }
 0x2db   : > { %1353 = vst.msk [vmem:[#allocation2 + $0x10] sm:$0xff] %vm1352_vm11, %v1350_v24  ;;  %vm2148_vm11 = vcmask 752640  }
 0x2dc   : > { %v1524_v27 = vpop.permute.xlu1 %1523 }
 0x2dd   : > { %1527 = vst.msk [vmem:[#allocation2 + $0x10] sm:$0xff] %vm1526_vm12, %v1524_v27  ;;  %vm2166_vm12 = vcmask 736256  }
 0x2de   : > { %1533 = vst.msk [vmem:[#allocation2 + $0x10] sm:$0xff] %vm1532_vm13, %v1530_v25  ;;  %vm5085_vm13 = vmmov 0  }
 0x2df   : > { %4240 = vmatprep.mubr.msk.f32.mxu1 %vm5085_vm13, %v5062_v47 }
 0x2e0   : > { %v1710_v28 = vpop.permute.xlu1 %1709  ;;  %v2081_v34 = vld [vmem:[#allocation2 + $0x8] sm:$0xff] }
 0x2e3   : > { %v1890_v29 = vpop.permute.xlu0 %1889 }
 0x2e4   : > { %1895 = vst.msk [vmem:[#allocation2 + $0x18] sm:$0xff] %vm1894_vm14, %v1890_v29  ;;  %v1704_v30 = vpop.permute.xlu1 %1703  ;;  %vm2246_vm14 = vcmask 154624  }
 0x2e5   : > { %1707 = vst.msk [vmem:[#allocation2 + $0x10] sm:$0xff] %vm1706_vm15, %v1704_v30  ;;  %vm2301_vm15 = vcmask 588800  }
 0x2e6   : > { %1713 = vst.msk [vmem:[#allocation2 + $0x10] sm:$0xff] %vm1712_vm0, %v1710_v28  ;;  %vm406_vm0 = vcmask 556032  }
 0x2e7   : > { %v1884_v31 = vpop.permute.xlu0 %1883 }
 0x2e8   : > { %1887 = vst.msk [vmem:[#allocation2 + $0x10] sm:$0xff] %vm1886_vm1, %v1884_v31  ;;  %v2066_v32 = vpop.permute.xlu1 %2065  ;;  %vm3807_vm1 = vcmask 130048  }
 0x2e9   : > { %1893 = vst.msk [vmem:[#allocation2 + $0x10] sm:$0xff] %vm1892_vm2, %v1890_v29  ;;  %vm3812_vm2 = vcmask 261248  }
 0x2ea   : > { %2069 = vst.msk [vmem:[#allocation2 + $0x18] sm:$0xff] %vm2068_vm3, %v2066_v32  ;;  %vm3817_vm3 = vcmask 392448  }
 0x2eb   : > { %v2072_v33 = vpop.permute.xlu0 %2071 }
 0x2ec   : > { %2075 = vst.msk [vmem:[#allocation2 + $0x18] sm:$0xff] %vm2074_vm4, %v2072_v33  ;;  %vm3822_vm4 = vcmask 523648  }
 0x2f0   : > { %v2082_v35 = vld [vmem:[#allocation2 + $0x10] sm:$0xff] }
 0x2f1   : > { %v4492_v36 = vpack.i.bf16 %v2082_v35, %v2081_v34 }
 0x2f3   : > { %4493 = vrot.lane.b32.xlu1 %v4492_v36, %s5071_s12  ;;  %v2083_v37 = vld [vmem:[#allocation2 + $0x18] sm:$0xff] }
 0x2f4   : > { %v4527_v38 = vpack.i.bf16 %v5062_v47, %v2083_v37 }
 0x2f6   : > { %4528 = vrot.lane.b32.xlu0 %v4527_v38, %s5071_s12 }
 0x2f7   : > { %4498 = vrot.lane.b32.xlu1 %v4492_v36, %s5079_s22 }
 0x2fa   : > { %4533 = vrot.lane.b32.xlu0 %v4527_v38, %s5079_s22 }
 0x2fb   : > { %4503 = vrot.lane.b32.xlu1 %v4492_v36, %s5080_s23 }
 0x2fe   : > { %4538 = vrot.lane.b32.xlu0 %v4527_v38, %s5080_s23 }
 0x2ff   : > { %4508 = vrot.lane.b32.xlu1 %v4492_v36, %s5067_s27 }
 0x302   : > { %2128 = vrot.lane.b32.xlu0 %v2083_v37, %s5067_s27 }
 0x303   : > { %4513 = vrot.lane.b32.xlu1 %v4492_v36, %s5081_s25 }
 0x306   : > { %2137 = vrot.lane.b32.xlu0 %v2083_v37, %s5081_s25 }
 0x307   : > { %4518 = vrot.lane.b32.xlu1 %v4492_v36, %s5082_s26 }
 0x30a   : > { %2146 = vrot.lane.b32.xlu0 %v2083_v37, %s5082_s26 }
 0x30b   : > { %4523 = vrot.lane.b32.xlu1 %v4492_v36, %s5068_s28 }
 0x30e   : > { %2155 = vrot.lane.b32.xlu0 %v2083_v37, %s5068_s28 }
 0x30f   : > { %2160 = vrot.lane.b32.xlu1 %v2081_v34, %s5083_s29 }
 0x312   : > { %2162 = vrot.lane.b32.xlu0 %v2082_v35, %s5083_s29 }
 0x313   : > { %2164 = vrot.lane.b32.xlu1 %v2083_v37, %s5083_s29 }
 0x316   : > { %4543 = vrot.lane.b32.xlu0 %v4492_v36, %s5064_s24 }
 0x365   : > { %v4494_v39 = vpop.permute.xlu1 %4493 }
 0x366   : > { %v4496_v57 = vunpack.i.h.bf16 %v4494_v39  ;;  %v4495_v58 = vunpack.i.l.bf16 %v4494_v39 }
 0x368   : > { %v4529_v40 = vpop.permute.xlu0 %4528  ;;  %v2098_v2 = vsel %vm2096_vm5, %v4495_v58, %v4496_v57 }
 0x369   : > { %v4530_v41 = vunpack.i.l.bf16 %v4529_v40  ;;  %v5327_v42 = vpop.permute.xlu1 %4498  ;;  %v4531_v3 = vunpack.i.h.bf16 %v4529_v40 }
 0x36a   : > { %v4500_v22 = vunpack.i.l.bf16 %v5327_v42  ;;  %v4501_v27 = vunpack.i.h.bf16 %v5327_v42 }
 0x36b   : > { %v4567_v43 = vpack.i.bf16 %v4530_v41, %v2083_v37  ;;  %v2099_v63 = vsel %vm2096_vm5, %v4496_v57, %v4530_v41  ;;  %v2097_v15 = vsel %vm2096_vm5, %v4531_v3, %v4495_v58 }
 0x36c   : > { %v5329_v44 = vpop.permute.xlu0 %4533  ;;  %v4582_v6 = vpack.i.bf16 %v2099_v63, %v2098_v2  ;;  %v4557_v21 = vpack.i.bf16 %v2097_v15, %v5062_v47  ;;  %v2110_v34 = vsel %vm2108_vm9, %v4500_v22, %v4501_v27 }
 0x36d   : > { %v4504_v45 = vpop.permute.xlu1 %4503  ;;  %4568 = vrot.lane.b32.xlu1 %v4567_v43, %s5064_s24  ;;  %v4535_v48 = vunpack.i.l.bf16 %v5329_v44  ;;  %v4536_v19 = vunpack.i.h.bf16 %v5329_v44 }
 0x36e   : > { %v4506_v0 = vunpack.i.h.bf16 %v4504_v45  ;;  %v4505_v1 = vunpack.i.l.bf16 %v4504_v45 }
 0x36f   : > { %v2109_v28 = vsel %vm2108_vm9, %v4536_v19, %v4500_v22  ;;  %v2111_v33 = vsel %vm2108_vm9, %v4501_v27, %v4535_v48 }
 0x370   : > { %v4539_v46 = vpop.permute.xlu0 %4538  ;;  %v2122_v12 = vsel %vm2120_vm6, %v4505_v1, %v4506_v0  ;;  %v4587_v35 = vpack.i.bf16 %v2111_v33, %v2110_v34 }
 0x371   : > { %v4540_v49 = vunpack.i.l.bf16 %v4539_v46  ;;  %v5333_v50 = vpop.permute.xlu1 %4508  ;;  %v4541_v13 = vunpack.i.h.bf16 %v4539_v46 }
 0x372   : > { %v4510_v54 = vunpack.i.l.bf16 %v5333_v50  ;;  %v4511_v30 = vunpack.i.h.bf16 %v5333_v50 }
 0x373   : > { %v4572_v51 = vpack.i.bf16 %v4540_v49, %v4535_v48  ;;  %v2123_v10 = vsel %vm2120_vm6, %v4506_v0, %v4540_v49  ;;  %v2121_v24 = vsel %vm2120_vm6, %v4541_v13, %v4505_v1  ;;  %v2077_v49 = vld [vmem:[%s5912_s8] sm:$0xff] }
 0x374   : > { %v5337_v52 = vpop.permute.xlu0 %2128  ;;  %v4592_v14 = vpack.i.bf16 %v2123_v10, %v2122_v12  ;;  %v4562_v29 = vpack.i.bf16 %v2121_v24, %v2109_v28  ;;  %v2131_v39 = vsel %vm2130_vm10, %v4510_v54, %v4511_v30 }
 0x375   : > { %v4514_v53 = vpop.permute.xlu1 %4513  ;;  %4573 = vrot.lane.b32.xlu1 %v4572_v51, %s5064_s24  ;;  %v2132_v36 = vsel %vm2130_vm10, %v4511_v30, %v5337_v52 }
 0x376   : > { %v4515_v55 = vunpack.i.l.bf16 %v4514_v53  ;;  %v4516_v7 = vunpack.i.h.bf16 %v4514_v53  ;;  %v4597_v42 = vpack.i.bf16 %v2132_v36, %v2131_v39 }
 0x378   : > { %v2138_v59 = vpop.permute.xlu0 %2137  ;;  %v4547_v60 = vpack.i.bf16 %v4515_v55, %v4510_v54  ;;  %v2140_v18 = vsel %vm2139_vm7, %v4515_v55, %v4516_v7 }
 0x379   : > { %v4577_v61 = vpack.i.bf16 %v2138_v59, %v5337_v52  ;;  %v5345_v62 = vpop.permute.xlu1 %4518  ;;  %v2141_v16 = vsel %vm2139_vm7, %v4516_v7, %v2138_v59 }
 0x37a   : > { %4548 = vrot.lane.b32.xlu0 %v4547_v60, %s5064_s24  ;;  %v4520_v8 = vunpack.i.l.bf16 %v5345_v62  ;;  %v4602_v23 = vpack.i.bf16 %v2141_v16, %v2140_v18  ;;  %v4521_v37 = vunpack.i.h.bf16 %v5345_v62 }
 0x37b   : > { %4578 = vrot.lane.b32.xlu1 %v4577_v61, %s5064_s24 }
 0x37c   : > { %v2147_v4 = vpop.permute.xlu0 %2146  ;;  %v2149_v44 = vsel %vm2148_vm11, %v4520_v8, %v4521_v37 }
 0x37d   : > { %v4524_v5 = vpop.permute.xlu1 %4523  ;;  %v2150_v43 = vsel %vm2148_vm11, %v4521_v37, %v2147_v4 }
 0x37e   : > { %v4525_v9 = vunpack.i.l.bf16 %v4524_v5  ;;  %v4526_v17 = vunpack.i.h.bf16 %v4524_v5  ;;  %v4607_v46 = vpack.i.bf16 %v2150_v43, %v2149_v44 }
 0x37f   : > { %4583 = vrot.lane.b32.xlu1 %v4582_v6, %s5064_s24 }
 0x380   : > { %v4552_v11 = vpack.i.bf16 %v4525_v9, %v4520_v8  ;;  %v2156_v20 = vpop.permute.xlu0 %2155  ;;  %v2158_v26 = vsel %vm2157_vm8, %v4525_v9, %v4526_v17 }
 0x381   : > { %v2159_v25 = vsel %vm2157_vm8, %v4526_v17, %v2156_v20  ;;  %v2161_v31 = vpop.permute.xlu1 %2160  ;;  %v4617_v38 = vpack.i.bf16 %v2156_v20, %v2147_v4 }
 0x382   : > { %4553 = vrot.lane.b32.xlu0 %v4552_v11, %s5064_s24  ;;  %v4612_v32 = vpack.i.bf16 %v2159_v25, %v2158_v26 }
 0x383   : > { %4593 = vrot.lane.b32.xlu1 %v4592_v14, %s5064_s24 }
 0x384   : > { %v2163_v40 = vpop.permute.xlu0 %2162 }
 0x385   : > { %v2165_v41 = vpop.permute.xlu1 %2164  ;;  %v2167_v48 = vsel %vm2166_vm12, %v2161_v31, %v2163_v40 }
 0x386   : > { %4558 = vrot.lane.b32.xlu0 %v4557_v21, %s5064_s24  ;;  %v2168_v45 = vsel %vm2166_vm12, %v2163_v40, %v2165_v41 }
 0x387   : > { %4603 = vrot.lane.b32.xlu1 %v4602_v23, %s5064_s24 }
 0x388   : > { %v4544_v52 = vpop.permute.xlu0 %4543 }
 0x389   : > { %v4546_v54 = vunpack.i.h.bf16 %v4544_v52  ;;  %v4545_v55 = vunpack.i.l.bf16 %v4544_v52 }
 0x38a   : > { %4563 = vrot.lane.b32.xlu0 %v4562_v29, %s5064_s24 }
 0x38b   : > { %4613 = vrot.lane.b32.xlu1 %v4612_v32, %s5064_s24  ;;  %v2248_v2 = vsel %vm2246_vm14, %v4545_v55, %v4546_v54 }
 0x38e   : > { %4588 = vrot.lane.b32.xlu0 %v4587_v35, %s5064_s24 }
 0x38f   : > { %4618 = vrot.lane.b32.xlu1 %v4617_v38, %s5064_s24 }
 0x392   : > { %4598 = vrot.lane.b32.xlu0 %v4597_v42, %s5064_s24 }
 0x393   : > { %2242 = vrot.lane.b32.xlu1 %v2168_v45, %s5064_s24 }
 0x396   : > { %4608 = vrot.lane.b32.xlu0 %v4607_v46, %s5064_s24 }
 0x397   : > { %2244 = vrot.lane.b32.xlu1 %v2165_v41, %s5064_s24 }
 0x39a   : > { %2240 = vrot.lane.b32.xlu0 %v2167_v48, %s5064_s24 }
 0x39e   : > { %2238 = vrot.lane.b32.xlu0 %v2161_v31, %s5064_s24 }
 0x3a2   : > { %2171 = vperm.xlu0 %4490, %v2077_v49  }
 0x3df   : > { %v4569_v50 = vpop.permute.xlu1 %4568 }
 0x3e0   : > { %v4570_v57 = vunpack.i.l.bf16 %v4569_v50  ;;  %v4571_v60 = vunpack.i.h.bf16 %v4569_v50 }
 0x3e2   : > { %v2249_v63 = vsel %vm2246_vm14, %v4546_v54, %v4570_v57 }
 0x3e7   : > { %v4574_v51 = vpop.permute.xlu1 %4573 }
 0x3e8   : > { %v4576_v19 = vunpack.i.h.bf16 %v4574_v51  ;;  %v4575_v20 = vunpack.i.l.bf16 %v4574_v51 }
 0x3ec   : > { %v5402_v58 = vpop.permute.xlu0 %4548 }
 0x3ed   : > { %v5400_v53 = vpop.permute.xlu1 %4578  ;;  %v4551_v21 = vunpack.i.h.bf16 %v5402_v58  ;;  %v4550_v28 = vunpack.i.l.bf16 %v5402_v58 }
 0x3ee   : > { %v4581_v29 = vunpack.i.h.bf16 %v5400_v53  ;;  %v4580_v37 = vunpack.i.l.bf16 %v5400_v53 }
 0x3f1   : > { %v4584_v59 = vpop.permute.xlu1 %4583 }
 0x3f2   : > { %v4586_v61 = vunpack.i.h.bf16 %v4584_v59  ;;  %v4585_v62 = vunpack.i.l.bf16 %v4584_v59 }
 0x3f4   : > { %v2252_v0 = vsel %vm2246_vm14, %v4586_v61, %v4571_v60  ;;  %v5406_v1 = vpop.permute.xlu0 %4553  ;;  %v2251_v3 = vsel %vm2246_vm14, %v4585_v62, %v4586_v61 }
 0x3f5   : > { %v4594_v4 = vpop.permute.xlu1 %4593  ;;  %v4306_v5 = vpack.c.bf16 %v2251_v3, %v2248_v2  ;;  %v4323_v6 = vpack.c.bf16 %v2252_v0, %v2249_v63  ;;  %v4556_v54 = vunpack.i.h.bf16 %v5406_v1  ;;  %v4555_v61 = vunpack.i.l.bf16 %v5406_v1 }
 0x3f6   : > { %v4596_v16 = vunpack.i.h.bf16 %v4594_v4  ;;  %v4595_v17 = vunpack.i.l.bf16 %v4594_v4 }
 0x3f7   : > { %4307 = vmatprep.subr.bf16.mxu0 %v4306_v5  ;;  %4324 = vmatpush3.bf16.msra.mxu1 %v4323_v6 }
 0x3f8   : > { %v4559_v7 = vpop.permute.xlu0 %4558  ;;  %4325 = vmatprep.subr.bf16.mxu1 %v5084_v56  ;;  %v2258_v30 = vsel %vm2246_vm14, %v4596_v16, %v4576_v19  ;;  %v2257_v32 = vsel %vm2246_vm14, %v4595_v17, %v4596_v16 }
 0x3f9   : > { %v4561_v8 = vunpack.i.h.bf16 %v4559_v7  ;;  %v4560_v9 = vunpack.i.l.bf16 %v4559_v7  ;;  %v4604_v10 = vpop.permute.xlu1 %4603 }
 0x3fa   : > { %v4606_v22 = vunpack.i.h.bf16 %v4604_v10  ;;  %v4605_v24 = vunpack.i.l.bf16 %v4604_v10 }
 0x3fb   : > { %v2247_v11 = vsel %vm2246_vm14, %v4560_v9, %v4545_v55  ;;  %v2250_v12 = vsel %vm2246_vm14, %v4561_v8, %v4585_v62 }
 0x3fc   : > { %v4564_v13 = vpop.permute.xlu0 %4563  ;;  %v4308_v14 = vpack.c.bf16 %v2250_v12, %v2247_v11  ;;  %v2262_v42 = vsel %vm2246_vm14, %v4551_v21, %v4605_v24  ;;  %v2264_v43 = vsel %vm2246_vm14, %v4606_v22, %v4581_v29  ;;  %v2263_v50 = vsel %vm2246_vm14, %v4605_v24, %v4606_v22 }
 0x3fd   : > { %v4614_v15 = vpop.permute.xlu1 %4613  ;;  %v4566_v18 = vunpack.i.h.bf16 %v4564_v13  ;;  %v4565_v25 = vunpack.i.l.bf16 %v4564_v13 }
 0x3fe   : > { %4309 = vmatpush1.bf16.msra.mxu0 %v4308_v14  ;;  %v4616_v46 = vunpack.i.h.bf16 %v4614_v15  ;;  %v4615_v48 = vunpack.i.l.bf16 %v4614_v15  ;;  %v2076_v14 = vld [vmem:[%s5911_s7] sm:$0xff] }
 0x3ff   : > { %v2256_v33 = vsel %vm2246_vm14, %v4566_v18, %v4595_v17  ;;  %v2447_v17 = vlaneseq }
 0x400   : > { %v4589_v23 = vpop.permute.xlu0 %4588  ;;  %v2268_v2 = vsel %vm2246_vm14, %v4556_v54, %v4615_v48  ;;  %v2269_v4 = vsel %vm2246_vm14, %v4615_v48, %v4616_v46 }
 0x401   : > { %v4591_v26 = vunpack.i.h.bf16 %v4589_v23  ;;  %v4590_v27 = vunpack.i.l.bf16 %v4589_v23  ;;  %v4619_v31 = vpop.permute.xlu1 %4618  ;;  %v2448_v18 = vshrl.u32 %v2447_v17, 7 }
 0x402   : > { %v4621_v49 = vunpack.i.h.bf16 %v4619_v31  ;;  %v4620_v62 = vunpack.i.l.bf16 %v4619_v31 }
 0x403   : > { %v2253_v34 = vsel %vm2246_vm14, %v4565_v25, %v4590_v27  ;;  %v2255_v35 = vsel %vm2246_vm14, %v4591_v26, %v4575_v20  ;;  %v2254_v36 = vsel %vm2246_vm14, %v4590_v27, %v4591_v26  ;;  %v2457_v19 = vsub.s32 2, %v2448_v18  ;;  %v401_v20 = vld [vmem:[%s5910_s6] sm:$0x7] }
 0x404   : > { %v4599_v38 = vpop.permute.xlu0 %4598  ;;  %v4310_v39 = vpack.c.bf16 %v2257_v32, %v2254_v36  ;;  %v4326_v40 = vpack.c.bf16 %v2258_v30, %v2255_v35  ;;  %v4312_v41 = vpack.c.bf16 %v2256_v33, %v2253_v34  ;;  %v2270_v3 = vsel %vm2246_vm14, %v4616_v46, %v4621_v49  ;;  %v2079_v46 = vld [vmem:[%s5914_s10] sm:$0xff] }
 0x405   : > { %v4601_v44 = vunpack.i.h.bf16 %v4599_v38  ;;  %v4600_v45 = vunpack.i.l.bf16 %v4599_v38  ;;  %v2243_v55 = vpop.permute.xlu1 %2242  ;;  %v2449_v21 = vsub.s32 0, %v2448_v18  ;;  %v2453_v22 = vsub.s32 1, %v2448_v18 }
 0x406   : > { %4311 = vmatprep.subr.bf16.mxu0 %v4310_v39  ;;  %4327 = vmatpush3.bf16.msra.mxu1 %v4326_v40  ;;  %v5455_v23 = vrot.slane %v401_v20, %v2457_v19 }
 0x407   : > { %v2259_v51 = vsel %vm2246_vm14, %v4550_v28, %v4600_v45  ;;  %v2261_v52 = vsel %vm2246_vm14, %v4601_v44, %v4580_v37  ;;  %4313 = vmatpush1.bf16.msra.mxu0 %v4312_v41  ;;  %4328 = vmatprep.subr.bf16.mxu1 %v5084_v56  ;;  %v2260_v53 = vsel %vm2246_vm14, %v4600_v45, %v4601_v44 }
 0x408   : > { %v4609_v57 = vpop.permute.xlu0 %4608  ;;  %v4314_v58 = vpack.c.bf16 %v2263_v50, %v2260_v53  ;;  %v4329_v59 = vpack.c.bf16 %v2264_v43, %v2261_v52  ;;  %v4316_v60 = vpack.c.bf16 %v2262_v42, %v2259_v51  ;;  %v5457_v26 = vrot.slane %v401_v20, %v2449_v21 }
 0x409   : > { %v4611_v63 = vunpack.i.h.bf16 %v4609_v57  ;;  %v4610_v0 = vunpack.i.l.bf16 %v4609_v57  ;;  %v2245_v11 = vpop.permute.xlu1 %2244  ;;  %v5459_v29 = vrot.slane %v401_v20, %v2453_v22 }
 0x40a   : > { %4315 = vmatprep.subr.bf16.mxu0 %v4314_v58  ;;  %4330 = vmatpush3.bf16.msra.mxu1 %v4329_v59  ;;  %v2273_v15 = vsel %vm2246_vm14, %v2243_v55, %v2245_v11 }
 0x40b   : > { %v2265_v5 = vsel %vm2246_vm14, %v4555_v61, %v4610_v0  ;;  %v2267_v6 = vsel %vm2246_vm14, %v4611_v63, %v4620_v62  ;;  %4317 = vmatpush1.bf16.msra.mxu0 %v4316_v60  ;;  %4331 = vmatprep.subr.bf16.mxu1 %v5084_v56  ;;  %v2266_v1 = vsel %vm2246_vm14, %v4610_v0, %v4611_v63 }
 0x40c   : > { %v2241_v7 = vpop.permute.xlu0 %2240  ;;  %v4318_v8 = vpack.c.bf16 %v2269_v4, %v2266_v1  ;;  %v4332_v9 = vpack.c.bf16 %v2270_v3, %v2267_v6  ;;  %v4320_v10 = vpack.c.bf16 %v2268_v2, %v2265_v5 }
 0x40d   : > { %v2272_v12 = vsel %vm2246_vm14, %v2241_v7, %v2243_v55  ;;  %v2078_v55 = vld [vmem:[%s5913_s9] sm:$0xff] }
 0x40e   : > { %4319 = vmatprep.subr.bf16.mxu0 %v4318_v8  ;;  %4333 = vmatpush3.bf16.msra.mxu1 %v4332_v9 }
 0x40f   : > { %4321 = vmatpush1.bf16.msra.mxu0 %v4320_v10  ;;  %4238 = vmatprep.subr.mxu1 %v5062_v47 }
 0x410   : > { %v2239_v13 = vpop.permute.xlu0 %2238  ;;  %2321 = vmatprep.subr.mxu0 %v2272_v12 }
 0x411   : > { %v2271_v16 = vsel %vm2246_vm14, %v2239_v13, %v2241_v7 }
 0x412   : > { %4239 = vmatpush3.msra.mxu1 %v2273_v15 }
 0x413   : > { %2322 = vmatpush1.msra.mxu0 %v2271_v16  ;;  %4241 = vmatmul.mubr.msk.f32.vlgmr.msra.gmra.mrb[10].mxu1 %vm2301_vm15, %v2076_v14 }
 0x414   : > { %4005 = vmatmul.mubr.msk.f32.vlgmr.msra.gmra.mrb[10].mxu0 %vm2301_vm15, %v2076_v14  ;;  %4350 = vmatprep.subr.bf16.mxu1 %v5084_v56 }
 0x415   : > { %4261 = vmatprep.mubr.msk.f32.mxu1 %vm5085_vm13, %v5062_v47  ;;  %2812 = vmatprep.mubr.f32.mxu0 %v5062_v47 }
 0x421   : > { %v2172_v24 = vpop.permute.xlu0 %2171 }
 0x4e6   : > { %v2442_v25 = vpop.f32.mrb[10].mxu1 }
 0x4e7   : > { %v2443_v27 = vadd.f32 %v2442_v25, %v2172_v24  ;;  %v2371_v28 = vpop.f32.mrb[10].mxu0  ;;  %v4242_v30 = vpop.f32.mrb[11].mxu1 }
 0x4e8   : > { %v2372_v31 = vadd.f32 %v2371_v28, %v2172_v24  ;;  %v2373_v32 = vpop.f32.mrb[11].mxu0 }
 0x4e9   : > { %v2464_v33 = vmul.f32 %v5455_v23, %v2443_v27  ;;  %v2374_v34 = vadd.f32 %v2373_v32, %v2172_v24 }
 0x4ea   : > { %v2462_v35 = vmul.f32 %v5457_v26, %v2372_v31 }
 0x4eb   : > { %v2463_v36 = vmul.f32 %v5459_v29, %v2374_v34  ;;  %v2472_v38 = vmul.f32 %v2464_v33, %v2464_v33  ;;  %v2466_v41 = vsel %vm406_vm0, %v2464_v33, 0.0 }
 0x4ec   : > { %v2470_v37 = vmul.f32 %v2462_v35, %v2462_v35 }
 0x4ed   : > { %v2465_v39 = vadd.f32 %v2463_v36, %v2462_v35  ;;  %v2471_v40 = vmul.f32 %v2463_v36, %v2463_v36  ;;  %v2474_v44 = vsel %vm406_vm0, %v2472_v38, 0.0 }
 0x4ef   : > { %v2467_v42 = vadd.f32 %v2466_v41, %v2465_v39  ;;  %v2473_v43 = vadd.f32 %v2471_v40, %v2470_v37 }
 0x4f1   : > { %2468 = vadd.xlane.f32.xlu1 %v2467_v42  ;;  %v2475_v45 = vadd.f32 %v2474_v44, %v2473_v43 }
 0x4f3   : > { %2476 = vadd.xlane.f32.xlu0 %v2475_v45 }
 0x502   : > { %2498 = vperm.xlu1 %4491, %v2079_v46  }
 0x57e   : > { %v2469_v48 = vpop.xlane.xlu1 %2468 }
 0x57f   : > { %v2478_v49 = vmul.f32 0.00390625, %v2469_v48 }
 0x580   : > { %v2477_v50 = vpop.xlane.xlu0 %2476 }
 0x581   : > { %v2479_v51 = vmul.f32 0.00390625, %v2477_v50  ;;  %v2480_v52 = vmul.f32 %v2478_v49, %v2478_v49  ;;  %v2484_v59 = vsub.f32 %v2462_v35, %v2478_v49  ;;  %v2485_v60 = vsub.f32 %v2463_v36, %v2478_v49 }
 0x582   : > { %v2486_v61 = vsub.f32 %v2464_v33, %v2478_v49  ;;  %v2499_v3 = vpop.permute.xlu1 %2498 }
 0x583   : > { %v2481_v53 = vsub.f32 %v2479_v51, %v2480_v52 }
 0x585   : > { %v2482_v54 = vadd.f32 1e-05, %v2481_v53 }
 0x587   : > { %5012 = vrsqrt.f32 %v2482_v54 }
 0x591   : > { %v5013_v57 = vpop.eup %5012 }
 0x592   : > { %v2487_v58 = vmul.f32 %v5013_v57, %v2078_v55 }
 0x594   : > { %2490 = vperm.xlu0 %4490, %v2487_v58  }
 0x613   : > { %v2491_v62 = vpop.permute.xlu0 %2490 }
 0x614   : > { %v2493_v63 = vmul.f32 %v2491_v62, %v2484_v59  ;;  %v2494_v0 = vmul.f32 %v2491_v62, %v2485_v60  ;;  %v2495_v2 = vmul.f32 %v2491_v62, %v2486_v61 }
 0x616   : > { %v2501_v4 = vadd.f32 %v2499_v3, %v2493_v63  ;;  %v2502_v5 = vadd.f32 %v2499_v3, %v2494_v0  ;;  %v2503_v6 = vadd.f32 %v2499_v3, %v2495_v2 }
 0x618   : > { %v2507_v1 = vmul.f32 0.70710677, %v2501_v4  ;;  %v2508_v7 = vmul.f32 0.70710677, %v2502_v5  ;;  %v2509_v8 = vmul.f32 0.70710677, %v2503_v6 }
 0x619   : > { %v2504_v11 = vmul.f32 0.5, %v2501_v4  ;;  %v2505_v14 = vmul.f32 0.5, %v2502_v5  ;;  %v2506_v16 = vmul.f32 0.5, %v2503_v6  ;;  %v5510_v5 = vld [vmem:[#allocation2] sm:$0xff] }
 0x61a   : > { %5014 = verf.f32 %v2507_v1 }
 0x61b   : > { %5016 = verf.f32 %v2508_v7 }
 0x61c   : > { %5018 = verf.f32 %v2509_v8 }
 0x624   : > { %v5015_v9 = vpop.eup %5014 }
 0x625   : > { %v5017_v10 = vpop.eup %5016  ;;  %v2513_v12 = vadd.f32 1.0, %v5015_v9 }
 0x626   : > { %v5019_v13 = vpop.eup %5018  ;;  %v2514_v15 = vadd.f32 1.0, %v5017_v10 }
 0x627   : > { %v2515_v17 = vadd.f32 1.0, %v5019_v13  ;;  %v2516_v18 = vmul.f32 %v2513_v12, %v2504_v11 }
 0x628   : > { %v2517_v19 = vmul.f32 %v2514_v15, %v2505_v14 }
 0x629   : > { %v2518_v20 = vmul.f32 %v2515_v17, %v2506_v16  ;;  %v2519_v21 = vmul.f32 %v2516_v18, %v5457_v26 }
 0x62a   : > { %v2520_v22 = vmul.f32 %v2517_v19, %v5459_v29 }
 0x62b   : > { %v2521_v24 = vmul.f32 %v2518_v20, %v5455_v23 }
 0x62c   : > { %v4622_v25 = vpack.i.bf16 %v2520_v22, %v2519_v21 }
 0x62d   : > { %2524 = vst.msk [vmem:[#allocation2 + $0x18] sm:$0xff] %vm406_vm0, %v2521_v24 }
 0x62e   : > { %4623 = vrot.lane.b32.xlu1 %v4622_v25, %s5071_s12 }
 0x632   : > { %4633 = vrot.lane.b32.xlu1 %v4622_v25, %s5079_s22 }
 0x634   : > { %v2536_v27 = vld [vmem:[#allocation2 + $0x18] sm:$0xff] }
 0x635   : > { %v4627_v28 = vpack.i.bf16 %v5062_v47, %v2536_v27 }
 0x636   : > { %4643 = vrot.lane.b32.xlu1 %v4622_v25, %s5080_s23 }
 0x637   : > { %4628 = vrot.lane.b32.xlu0 %v4627_v28, %s5071_s12 }
 0x63a   : > { %4653 = vrot.lane.b32.xlu1 %v4622_v25, %s5067_s27 }
 0x63b   : > { %4638 = vrot.lane.b32.xlu0 %v4627_v28, %s5079_s22 }
 0x63e   : > { %4658 = vrot.lane.b32.xlu1 %v4622_v25, %s5081_s25 }
 0x63f   : > { %4648 = vrot.lane.b32.xlu0 %v4627_v28, %s5080_s23 }
 0x642   : > { %4663 = vrot.lane.b32.xlu1 %v4622_v25, %s5082_s26 }
 0x643   : > { %2578 = vrot.lane.b32.xlu0 %v2536_v27, %s5067_s27 }
 0x646   : > { %4668 = vrot.lane.b32.xlu1 %v4622_v25, %s5068_s28 }
 0x647   : > { %2586 = vrot.lane.b32.xlu0 %v2536_v27, %s5081_s25 }
 0x64a   : > { %2606 = vrot.lane.b32.xlu1 %v2519_v21, %s5083_s29 }
 0x64b   : > { %2594 = vrot.lane.b32.xlu0 %v2536_v27, %s5082_s26 }
 0x64e   : > { %2610 = vrot.lane.b32.xlu1 %v2536_v27, %s5083_s29 }
 0x64f   : > { %2602 = vrot.lane.b32.xlu0 %v2536_v27, %s5068_s28 }
 0x653   : > { %2608 = vrot.lane.b32.xlu0 %v2520_v22, %s5083_s29 }
 0x657   : > { %4673 = vrot.lane.b32.xlu0 %v4622_v25, %s5064_s24 }
 0x6a0   : > { %v4624_v47 = vpop.permute.xlu1 %4623 }
 0x6a1   : > { %v4626_v50 = vunpack.i.h.bf16 %v4624_v47  ;;  %v4625_v51 = vunpack.i.l.bf16 %v4624_v47 }
 0x6a3   : > { %v2550_v60 = vsel %vm2096_vm5, %v4625_v51, %v4626_v50 }
 0x6a4   : > { %v4634_v30 = vpop.permute.xlu1 %4633 }
 0x6a5   : > { %v4636_v63 = vunpack.i.h.bf16 %v4634_v30  ;;  %v4635_v0 = vunpack.i.l.bf16 %v4634_v30 }
 0x6a7   : > { %v2561_v11 = vsel %vm2108_vm9, %v4635_v0, %v4636_v63 }
 0x6a8   : > { %v4644_v31 = vpop.permute.xlu1 %4643 }
 0x6a9   : > { %v4629_v32 = vpop.permute.xlu0 %4628  ;;  %v4646_v61 = vunpack.i.h.bf16 %v4644_v31  ;;  %v4645_v62 = vunpack.i.l.bf16 %v4644_v31 }
 0x6aa   : > { %v4630_v33 = vunpack.i.l.bf16 %v4629_v32  ;;  %v4631_v48 = vunpack.i.h.bf16 %v4629_v32 }
 0x6ab   : > { %v2572_v8 = vsel %vm2120_vm6, %v4645_v62, %v4646_v61 }
 0x6ac   : > { %v4677_v34 = vpack.i.bf16 %v4630_v33, %v2536_v27  ;;  %v5495_v35 = vpop.permute.xlu1 %4653  ;;  %v2551_v57 = vsel %vm2096_vm5, %v4626_v50, %v4630_v33  ;;  %v2549_v59 = vsel %vm2096_vm5, %v4631_v48, %v4625_v51 }
 0x6ad   : > { %v4639_v36 = vpop.permute.xlu0 %4638  ;;  %v4655_v39 = vunpack.i.l.bf16 %v5495_v35  ;;  %v4702_v3 = vpack.i.bf16 %v2551_v57, %v2550_v60  ;;  %v4707_v6 = vpack.i.bf16 %v2549_v59, %v5510_v5  ;;  %v4656_v20 = vunpack.i.h.bf16 %v5495_v35 }
 0x6ae   : > { %4678 = vrot.lane.b32.xlu1 %v4677_v34, %s5064_s24  ;;  %v4640_v41 = vunpack.i.l.bf16 %v4639_v36  ;;  %v4641_v10 = vunpack.i.h.bf16 %v4639_v36 }
 0x6af   : > { %v2580_v28 = vsel %vm2130_vm10, %v4655_v39, %v4656_v20 }
 0x6b0   : > { %v4659_v37 = vpop.permute.xlu1 %4658  ;;  %v2562_v1 = vsel %vm2108_vm9, %v4636_v63, %v4640_v41  ;;  %v2560_v19 = vsel %vm2108_vm9, %v4641_v10, %v4635_v0 }
 0x6b1   : > { %v4649_v38 = vpop.permute.xlu0 %4648  ;;  %v4660_v40 = vunpack.i.l.bf16 %v4659_v37  ;;  %v4661_v9 = vunpack.i.h.bf16 %v4659_v37  ;;  %v4712_v14 = vpack.i.bf16 %v2562_v1, %v2561_v11 }
 0x6b2   : > { %v4650_v42 = vunpack.i.l.bf16 %v4649_v38  ;;  %v4651_v7 = vunpack.i.h.bf16 %v4649_v38 }
 0x6b3   : > { %v4687_v43 = vpack.i.bf16 %v4660_v40, %v4655_v39  ;;  %v2588_v17 = vsel %vm2139_vm7, %v4660_v40, %v4661_v9 }
 0x6b4   : > { %v4682_v44 = vpack.i.bf16 %v4650_v42, %v4640_v41  ;;  %v5499_v45 = vpop.permute.xlu1 %4663  ;;  %v2573_v4 = vsel %vm2120_vm6, %v4646_v61, %v4650_v42  ;;  %v2571_v15 = vsel %vm2120_vm6, %v4651_v7, %v4645_v62  ;;  %v4008_v41 = vld [vmem:[%s5912_s8 + $0x8] sm:$0xff] }
 0x6b5   : > { %v2579_v46 = vpop.permute.xlu0 %2578  ;;  %4688 = vrot.lane.b32.xlu0 %v4687_v43, %s5064_s24  ;;  %v4665_v53 = vunpack.i.l.bf16 %v5499_v45  ;;  %v4717_v12 = vpack.i.bf16 %v2573_v4, %v2572_v8  ;;  %v4722_v24 = vpack.i.bf16 %v2571_v15, %v2560_v19  ;;  %v4666_v47 = vunpack.i.h.bf16 %v5499_v45 }
 0x6b6   : > { %4683 = vrot.lane.b32.xlu1 %v4682_v44, %s5064_s24  ;;  %v2581_v25 = vsel %vm2130_vm10, %v4656_v20, %v2579_v46 }
 0x6b7   : > { %v4727_v31 = vpack.i.bf16 %v2581_v25, %v2580_v28  ;;  %v2596_v34 = vsel %vm2148_vm11, %v4665_v53, %v4666_v47 }
 0x6b8   : > { %v4669_v49 = vpop.permute.xlu1 %4668 }
 0x6b9   : > { %v2587_v52 = vpop.permute.xlu0 %2586  ;;  %v4670_v54 = vunpack.i.l.bf16 %v4669_v49  ;;  %v4671_v18 = vunpack.i.h.bf16 %v4669_v49 }
 0x6ba   : > { %v4692_v55 = vpack.i.bf16 %v2587_v52, %v2579_v46  ;;  %v2589_v13 = vsel %vm2139_vm7, %v4661_v9, %v2587_v52 }
 0x6bb   : > { %v4697_v58 = vpack.i.bf16 %v4670_v54, %v4665_v53  ;;  %v4732_v21 = vpack.i.bf16 %v2589_v13, %v2588_v17  ;;  %v2604_v27 = vsel %vm2157_vm8, %v4670_v54, %v4671_v18 }
 0x6bc   : > { %4693 = vrot.lane.b32.xlu1 %v4692_v55, %s5064_s24  ;;  %v2607_v33 = vpop.permute.xlu1 %2606 }
 0x6bd   : > { %4698 = vrot.lane.b32.xlu0 %v4697_v58, %s5064_s24  ;;  %v2595_v2 = vpop.permute.xlu0 %2594 }
 0x6be   : > { %v2597_v32 = vsel %vm2148_vm11, %v4666_v47, %v2595_v2 }
 0x6bf   : > { %v4737_v36 = vpack.i.bf16 %v2597_v32, %v2596_v34 }
 0x6c0   : > { %4703 = vrot.lane.b32.xlu1 %v4702_v3, %s5064_s24  ;;  %v2611_v38 = vpop.permute.xlu1 %2610 }
 0x6c1   : > { %4708 = vrot.lane.b32.xlu0 %v4707_v6, %s5064_s24  ;;  %v2603_v16 = vpop.permute.xlu0 %2602 }
 0x6c2   : > { %v2605_v22 = vsel %vm2157_vm8, %v4671_v18, %v2603_v16  ;;  %v4747_v35 = vpack.i.bf16 %v2603_v16, %v2595_v2 }
 0x6c3   : > { %v4742_v30 = vpack.i.bf16 %v2605_v22, %v2604_v27 }
 0x6c4   : > { %4718 = vrot.lane.b32.xlu1 %v4717_v12, %s5064_s24 }
 0x6c5   : > { %4713 = vrot.lane.b32.xlu0 %v4712_v14, %s5064_s24  ;;  %v2609_v37 = vpop.permute.xlu0 %2608 }
 0x6c6   : > { %v2613_v39 = vsel %vm2166_vm12, %v2609_v37, %v2611_v38  ;;  %v2612_v40 = vsel %vm2166_vm12, %v2607_v33, %v2609_v37 }
 0x6c8   : > { %4733 = vrot.lane.b32.xlu1 %v4732_v21, %s5064_s24 }
 0x6c9   : > { %4723 = vrot.lane.b32.xlu0 %v4722_v24, %s5064_s24  ;;  %v4674_v43 = vpop.permute.xlu0 %4673 }
 0x6ca   : > { %v4676_v49 = vunpack.i.h.bf16 %v4674_v43  ;;  %v4675_v50 = vunpack.i.l.bf16 %v4674_v43 }
 0x6cc   : > { %4743 = vrot.lane.b32.xlu1 %v4742_v30, %s5064_s24  ;;  %v2692_v62 = vsel %vm2246_vm14, %v4675_v50, %v4676_v49 }
 0x6cd   : > { %4728 = vrot.lane.b32.xlu0 %v4727_v31, %s5064_s24 }
 0x6d0   : > { %4748 = vrot.lane.b32.xlu1 %v4747_v35, %s5064_s24 }
 0x6d1   : > { %4738 = vrot.lane.b32.xlu0 %v4737_v36, %s5064_s24 }
 0x6d4   : > { %2687 = vrot.lane.b32.xlu1 %v2613_v39, %s5064_s24 }
 0x6d5   : > { %2685 = vrot.lane.b32.xlu0 %v2612_v40, %s5064_s24 }
 0x6d8   : > { %2689 = vrot.lane.b32.xlu1 %v2611_v38, %s5064_s24 }
 0x6d9   : > { %2683 = vrot.lane.b32.xlu0 %v2607_v33, %s5064_s24 }
 0x6dd   : > { %2616 = vperm.xlu0 %4490, %v4008_v41  }
 0x720   : > { %v4679_v42 = vpop.permute.xlu1 %4678 }
 0x721   : > { %v4680_v51 = vunpack.i.l.bf16 %v4679_v42  ;;  %v4681_v53 = vunpack.i.h.bf16 %v4679_v42 }
 0x723   : > { %v2693_v60 = vsel %vm2246_vm14, %v4676_v49, %v4680_v51 }
 0x727   : > { %v5547_v45 = vpop.permute.xlu0 %4688 }
 0x728   : > { %v4684_v44 = vpop.permute.xlu1 %4683  ;;  %v4691_v32 = vunpack.i.h.bf16 %v5547_v45  ;;  %v4690_v33 = vunpack.i.l.bf16 %v5547_v45 }
 0x729   : > { %v4686_v10 = vunpack.i.h.bf16 %v4684_v44  ;;  %v4685_v11 = vunpack.i.l.bf16 %v4684_v44 }
 0x72e   : > { %v5549_v46 = vpop.permute.xlu1 %4693 }
 0x72f   : > { %v5551_v48 = vpop.permute.xlu0 %4698  ;;  %v4696_v31 = vunpack.i.h.bf16 %v5549_v46  ;;  %v4695_v36 = vunpack.i.l.bf16 %v5549_v46 }
 0x730   : > { %v4701_v37 = vunpack.i.h.bf16 %v5551_v48  ;;  %v4700_v40 = vunpack.i.l.bf16 %v5551_v48 }
 0x732   : > { %v4704_v52 = vpop.permute.xlu1 %4703 }
 0x733   : > { %v4706_v54 = vunpack.i.h.bf16 %v4704_v52  ;;  %v4705_v55 = vunpack.i.l.bf16 %v4704_v52  ;;  %v4709_v57 = vpop.permute.xlu0 %4708 }
 0x734   : > { %v4711_v58 = vunpack.i.h.bf16 %v4709_v57  ;;  %v4710_v59 = vunpack.i.l.bf16 %v4709_v57 }
 0x735   : > { %v2696_v61 = vsel %vm2246_vm14, %v4706_v54, %v4681_v53  ;;  %v2695_v63 = vsel %vm2246_vm14, %v4705_v55, %v4706_v54 }
 0x736   : > { %v4719_v0 = vpop.permute.xlu1 %4718  ;;  %v4334_v2 = vpack.c.bf16 %v2695_v63, %v2692_v62  ;;  %v4351_v3 = vpack.c.bf16 %v2696_v61, %v2693_v60  ;;  %v2694_v4 = vsel %vm2246_vm14, %v4711_v58, %v4705_v55  ;;  %v2691_v6 = vsel %vm2246_vm14, %v4710_v59, %v4675_v50 }
 0x737   : > { %v4721_v1 = vunpack.i.h.bf16 %v4719_v0  ;;  %v4720_v7 = vunpack.i.l.bf16 %v4719_v0  ;;  %v4714_v8 = vpop.permute.xlu0 %4713  ;;  %v4336_v9 = vpack.c.bf16 %v2694_v4, %v2691_v6 }
 0x738   : > { %4335 = vmatprep.subr.bf16.mxu0 %v4334_v2  ;;  %4352 = vmatpush3.bf16.msra.mxu1 %v4351_v3  ;;  %v4716_v12 = vunpack.i.h.bf16 %v4714_v8  ;;  %v4715_v13 = vunpack.i.l.bf16 %v4714_v8 }
 0x739   : > { %4337 = vmatpush1.bf16.msra.mxu0 %v4336_v9  ;;  %4353 = vmatprep.subr.bf16.mxu1 %v5084_v56  ;;  %v2702_v14 = vsel %vm2246_vm14, %v4721_v1, %v4686_v10  ;;  %v2701_v18 = vsel %vm2246_vm14, %v4720_v7, %v4721_v1 }
 0x73a   : > { %v4734_v15 = vpop.permute.xlu1 %4733  ;;  %v2699_v16 = vsel %vm2246_vm14, %v4716_v12, %v4685_v11  ;;  %v2698_v17 = vsel %vm2246_vm14, %v4715_v13, %v4716_v12  ;;  %v4007_v11 = vld [vmem:[%s5911_s7 + $0x8] sm:$0xff] }
 0x73b   : > { %v4724_v19 = vpop.permute.xlu0 %4723  ;;  %v4338_v20 = vpack.c.bf16 %v2701_v18, %v2698_v17  ;;  %v4354_v21 = vpack.c.bf16 %v2702_v14, %v2699_v16  ;;  %v4736_v25 = vunpack.i.h.bf16 %v4734_v15  ;;  %v4735_v27 = vunpack.i.l.bf16 %v4734_v15 }
 0x73c   : > { %v4726_v22 = vunpack.i.h.bf16 %v4724_v19  ;;  %v4725_v24 = vunpack.i.l.bf16 %v4724_v19 }
 0x73d   : > { %4339 = vmatprep.subr.bf16.mxu0 %v4338_v20  ;;  %4355 = vmatpush3.bf16.msra.mxu1 %v4354_v21  ;;  %v2708_v41 = vsel %vm2246_vm14, %v4736_v25, %v4696_v31  ;;  %v2707_v46 = vsel %vm2246_vm14, %v4735_v27, %v4736_v25  ;;  %v2706_v51 = vsel %vm2246_vm14, %v4691_v32, %v4735_v27 }
 0x73e   : > { %v4744_v28 = vpop.permute.xlu1 %4743  ;;  %v2700_v47 = vsel %vm2246_vm14, %v4726_v22, %v4720_v7  ;;  %v2697_v30 = vsel %vm2246_vm14, %v4725_v24, %v4715_v13  ;;  %4356 = vmatprep.subr.bf16.mxu1 %v5084_v56 }
 0x73f   : > { %v4729_v34 = vpop.permute.xlu0 %4728  ;;  %v4340_v35 = vpack.c.bf16 %v2700_v47, %v2697_v30  ;;  %v4746_v42 = vunpack.i.h.bf16 %v4744_v28  ;;  %v4745_v43 = vunpack.i.l.bf16 %v4744_v28 }
 0x740   : > { %v4731_v38 = vunpack.i.h.bf16 %v4729_v34  ;;  %v4730_v39 = vunpack.i.l.bf16 %v4729_v34 }
 0x741   : > { %4341 = vmatpush1.bf16.msra.mxu0 %v4340_v35  ;;  %v2712_v60 = vsel %vm2246_vm14, %v4701_v37, %v4745_v43  ;;  %v2713_v62 = vsel %vm2246_vm14, %v4745_v43, %v4746_v42 }
 0x742   : > { %v4749_v44 = vpop.permute.xlu1 %4748  ;;  %v2705_v49 = vsel %vm2246_vm14, %v4731_v38, %v4695_v36  ;;  %v2703_v45 = vsel %vm2246_vm14, %v4690_v33, %v4730_v39  ;;  %v2704_v50 = vsel %vm2246_vm14, %v4730_v39, %v4731_v38  ;;  %v4010_v36 = vld [vmem:[%s5914_s10 + $0x8] sm:$0xff] }
 0x743   : > { %v4751_v52 = vunpack.i.h.bf16 %v4749_v44  ;;  %v4739_v53 = vpop.permute.xlu0 %4738  ;;  %v4342_v54 = vpack.c.bf16 %v2707_v46, %v2704_v50  ;;  %v4357_v48 = vpack.c.bf16 %v2708_v41, %v2705_v49  ;;  %v4750_v55 = vunpack.i.l.bf16 %v4749_v44  ;;  %v4009_v44 = vld [vmem:[%s5913_s9 + $0x8] sm:$0xff] }
 0x744   : > { %v4741_v57 = vunpack.i.h.bf16 %v4739_v53  ;;  %v4740_v58 = vunpack.i.l.bf16 %v4739_v53  ;;  %v4344_v59 = vpack.c.bf16 %v2706_v51, %v2703_v45 }
 0x745   : > { %v2714_v61 = vsel %vm2246_vm14, %v4746_v42, %v4751_v52  ;;  %4343 = vmatprep.subr.bf16.mxu0 %v4342_v54  ;;  %4358 = vmatpush3.bf16.msra.mxu1 %v4357_v48 }
 0x746   : > { %v2688_v63 = vpop.permute.xlu1 %2687  ;;  %v2711_v0 = vsel %vm2246_vm14, %v4741_v57, %v4750_v55  ;;  %v2709_v2 = vsel %vm2246_vm14, %v4700_v40, %v4740_v58  ;;  %4345 = vmatpush1.bf16.msra.mxu0 %v4344_v59  ;;  %4359 = vmatprep.subr.bf16.mxu1 %v5084_v56  ;;  %v2710_v3 = vsel %vm2246_vm14, %v4740_v58, %v4741_v57 }
 0x747   : > { %v2686_v4 = vpop.permute.xlu0 %2685  ;;  %v4346_v6 = vpack.c.bf16 %v2713_v62, %v2710_v3  ;;  %v4360_v1 = vpack.c.bf16 %v2714_v61, %v2711_v0  ;;  %v4348_v7 = vpack.c.bf16 %v2712_v60, %v2709_v2 }
 0x748   : > { %v2716_v9 = vsel %vm2246_vm14, %v2686_v4, %v2688_v63 }
 0x749   : > { %4347 = vmatprep.subr.bf16.mxu0 %v4346_v6  ;;  %4361 = vmatpush3.bf16.msra.mxu1 %v4360_v1 }
 0x74a   : > { %v2690_v8 = vpop.permute.xlu1 %2689  ;;  %4349 = vmatpush1.bf16.msra.mxu0 %v4348_v7  ;;  %4259 = vmatprep.subr.mxu1 %v5510_v5 }
 0x74b   : > { %v2684_v10 = vpop.permute.xlu0 %2683  ;;  %2764 = vmatprep.subr.mxu0 %v2716_v9  ;;  %v2717_v12 = vsel %vm2246_vm14, %v2688_v63, %v2690_v8 }
 0x74c   : > { %v2715_v13 = vsel %vm2246_vm14, %v2684_v10, %v2686_v4 }
 0x74d   : > { %4260 = vmatpush3.msra.mxu1 %v2717_v12 }
 0x74e   : > { %2765 = vmatpush1.msra.mxu0 %v2715_v13  ;;  %4262 = vmatmul.mubr.msk.f32.vlgmr.msra.gmra.mrb[12].mxu1 %vm2301_vm15, %v4007_v11 }
 0x74f   : > { %4011 = vmatmul.mubr.msk.f32.vlgmr.msra.gmra.mrb[12].mxu0 %vm2301_vm15, %v4007_v11  ;;  %4378 = vmatprep.subr.bf16.mxu1 %v5084_v56 }
 0x750   : > { %4282 = vmatprep.mubr.msk.f32.mxu1 %vm5085_vm13, %v5510_v5  ;;  %3239 = vmatprep.mubr.f32.mxu0 %v5510_v5 }
 0x75c   : > { %v2617_v14 = vpop.permute.xlu0 %2616 }
 0x821   : > { %v2885_v15 = vpop.f32.mrb[12].mxu1 }
 0x822   : > { %v2886_v16 = vadd.f32 %v2885_v15, %v2617_v14  ;;  %v2814_v17 = vpop.f32.mrb[12].mxu0  ;;  %v4263_v18 = vpop.f32.mrb[13].mxu1 }
 0x823   : > { %v2815_v19 = vadd.f32 %v2814_v17, %v2617_v14  ;;  %v2816_v20 = vpop.f32.mrb[13].mxu0 }
 0x824   : > { %v2891_v21 = vmul.f32 %v2886_v16, %v5455_v23  ;;  %v2817_v22 = vadd.f32 %v2816_v20, %v2617_v14 }
 0x825   : > { %v2889_v24 = vmul.f32 %v2815_v19, %v5457_v26 }
 0x826   : > { %v2890_v25 = vmul.f32 %v2817_v22, %v5459_v29  ;;  %v2899_v28 = vmul.f32 %v2891_v21, %v2891_v21  ;;  %v2893_v31 = vsel %vm406_vm0, %v2891_v21, 0.0 }
 0x827   : > { %v2897_v27 = vmul.f32 %v2889_v24, %v2889_v24 }
 0x828   : > { %v2898_v47 = vmul.f32 %v2890_v25, %v2890_v25  ;;  %v2892_v30 = vadd.f32 %v2890_v25, %v2889_v24  ;;  %v2901_v34 = vsel %vm406_vm0, %v2899_v28, 0.0 }
 0x82a   : > { %v2894_v32 = vadd.f32 %v2893_v31, %v2892_v30  ;;  %v2900_v33 = vadd.f32 %v2898_v47, %v2897_v27 }
 0x82c   : > { %2895 = vadd.xlane.f32.xlu1 %v2894_v32  ;;  %v2902_v35 = vadd.f32 %v2901_v34, %v2900_v33 }
 0x82e   : > { %2903 = vadd.xlane.f32.xlu0 %v2902_v35 }
 0x83d   : > { %2925 = vperm.xlu1 %4491, %v4010_v36  }
 0x8b9   : > { %v2896_v37 = vpop.xlane.xlu1 %2895 }
 0x8ba   : > { %v2905_v38 = vmul.f32 0.00390625, %v2896_v37 }
 0x8bb   : > { %v2904_v39 = vpop.xlane.xlu0 %2903 }
 0x8bc   : > { %v2906_v40 = vmul.f32 0.00390625, %v2904_v39  ;;  %v2907_v41 = vmul.f32 %v2905_v38, %v2905_v38  ;;  %v2911_v50 = vsub.f32 %v2889_v24, %v2905_v38  ;;  %v2912_v46 = vsub.f32 %v2890_v25, %v2905_v38 }
 0x8bd   : > { %v2913_v51 = vsub.f32 %v2891_v21, %v2905_v38  ;;  %v2926_v55 = vpop.permute.xlu1 %2925 }
 0x8be   : > { %v2908_v42 = vsub.f32 %v2906_v40, %v2907_v41 }
 0x8c0   : > { %v2909_v43 = vadd.f32 1e-05, %v2908_v42 }
 0x8c2   : > { %5020 = vrsqrt.f32 %v2909_v43 }
 0x8cc   : > { %v5021_v49 = vpop.eup %5020 }
 0x8cd   : > { %v2914_v45 = vmul.f32 %v5021_v49, %v4009_v44 }
 0x8cf   : > { %2917 = vperm.xlu0 %4490, %v2914_v45  }
 0x94e   : > { %v2918_v52 = vpop.permute.xlu0 %2917 }
 0x94f   : > { %v2920_v53 = vmul.f32 %v2918_v52, %v2911_v50  ;;  %v2921_v54 = vmul.f32 %v2918_v52, %v2912_v46  ;;  %v2922_v48 = vmul.f32 %v2918_v52, %v2913_v51 }
 0x951   : > { %v2928_v57 = vadd.f32 %v2926_v55, %v2920_v53  ;;  %v2929_v58 = vadd.f32 %v2926_v55, %v2921_v54  ;;  %v2930_v59 = vadd.f32 %v2926_v55, %v2922_v48 }
 0x953   : > { %v2934_v60 = vmul.f32 0.70710677, %v2928_v57  ;;  %v2935_v61 = vmul.f32 0.70710677, %v2929_v58  ;;  %v2936_v62 = vmul.f32 0.70710677, %v2930_v59 }
 0x954   : > { %v2931_v2 = vmul.f32 0.5, %v2928_v57  ;;  %v2932_v6 = vmul.f32 0.5, %v2929_v58  ;;  %v2933_v7 = vmul.f32 0.5, %v2930_v59 }
 0x955   : > { %5022 = verf.f32 %v2934_v60 }
 0x956   : > { %5024 = verf.f32 %v2935_v61 }
 0x957   : > { %5026 = verf.f32 %v2936_v62 }
 0x95f   : > { %v5023_v63 = vpop.eup %5022 }
 0x960   : > { %v5025_v0 = vpop.eup %5024  ;;  %v2940_v3 = vadd.f32 1.0, %v5023_v63 }
 0x961   : > { %v5027_v4 = vpop.eup %5026  ;;  %v2941_v1 = vadd.f32 1.0, %v5025_v0 }
 0x962   : > { %v2942_v8 = vadd.f32 1.0, %v5027_v4  ;;  %v2943_v9 = vmul.f32 %v2940_v3, %v2931_v2 }
 0x963   : > { %v2944_v10 = vmul.f32 %v2941_v1, %v2932_v6 }
 0x964   : > { %v2945_v11 = vmul.f32 %v2942_v8, %v2933_v7  ;;  %v2946_v12 = vmul.f32 %v2943_v9, %v5457_v26 }
 0x965   : > { %v2947_v13 = vmul.f32 %v2944_v10, %v5459_v29 }
 0x966   : > { %v2948_v14 = vmul.f32 %v2945_v11, %v5455_v23 }
 0x967   : > { %v4752_v15 = vpack.i.bf16 %v2947_v13, %v2946_v12 }
 0x968   : > { %2951 = vst.msk [vmem:[#allocation2 + $0x18] sm:$0xff] %vm406_vm0, %v2948_v14 }
 0x969   : > { %4753 = vrot.lane.b32.xlu1 %v4752_v15, %s5071_s12 }
 0x96d   : > { %4763 = vrot.lane.b32.xlu1 %v4752_v15, %s5079_s22 }
 0x96f   : > { %v2963_v16 = vld [vmem:[#allocation2 + $0x18] sm:$0xff] }
 0x970   : > { %v4757_v17 = vpack.i.bf16 %v5510_v5, %v2963_v16 }
 0x971   : > { %4773 = vrot.lane.b32.xlu1 %v4752_v15, %s5080_s23 }
 0x972   : > { %4758 = vrot.lane.b32.xlu0 %v4757_v17, %s5071_s12 }
 0x975   : > { %4783 = vrot.lane.b32.xlu1 %v4752_v15, %s5067_s27 }
 0x976   : > { %4768 = vrot.lane.b32.xlu0 %v4757_v17, %s5079_s22 }
 0x979   : > { %4788 = vrot.lane.b32.xlu1 %v4752_v15, %s5081_s25 }
 0x97a   : > { %4778 = vrot.lane.b32.xlu0 %v4757_v17, %s5080_s23 }
 0x97d   : > { %4793 = vrot.lane.b32.xlu1 %v4752_v15, %s5082_s26 }
 0x97e   : > { %3005 = vrot.lane.b32.xlu0 %v2963_v16, %s5067_s27 }
 0x981   : > { %4798 = vrot.lane.b32.xlu1 %v4752_v15, %s5068_s28 }
 0x982   : > { %3013 = vrot.lane.b32.xlu0 %v2963_v16, %s5081_s25 }
 0x985   : > { %3033 = vrot.lane.b32.xlu1 %v2946_v12, %s5083_s29 }
 0x986   : > { %3021 = vrot.lane.b32.xlu0 %v2963_v16, %s5082_s26 }
 0x989   : > { %3037 = vrot.lane.b32.xlu1 %v2963_v16, %s5083_s29 }
 0x98a   : > { %3029 = vrot.lane.b32.xlu0 %v2963_v16, %s5068_s28 }
 0x98e   : > { %3035 = vrot.lane.b32.xlu0 %v2947_v13, %s5083_s29 }
 0x992   : > { %4803 = vrot.lane.b32.xlu0 %v4752_v15, %s5064_s24 }
 0x9db   : > { %v4754_v18 = vpop.permute.xlu1 %4753 }
 0x9dc   : > { %v4756_v40 = vunpack.i.h.bf16 %v4754_v18  ;;  %v4755_v41 = vunpack.i.l.bf16 %v4754_v18 }
 0x9de   : > { %v2977_v51 = vsel %vm2096_vm5, %v4755_v41, %v4756_v40 }
 0x9df   : > { %v4764_v19 = vpop.permute.xlu1 %4763 }
 0x9e0   : > { %v4766_v54 = vunpack.i.h.bf16 %v4764_v19  ;;  %v4765_v48 = vunpack.i.l.bf16 %v4764_v19 }
 0x9e2   : > { %v2988_v2 = vsel %vm2108_vm9, %v4765_v48, %v4766_v54 }
 0x9e3   : > { %v4774_v20 = vpop.permute.xlu1 %4773 }
 0x9e4   : > { %v4759_v21 = vpop.permute.xlu0 %4758  ;;  %v4776_v52 = vunpack.i.h.bf16 %v4774_v20  ;;  %v4775_v53 = vunpack.i.l.bf16 %v4774_v20 }
 0x9e5   : > { %v4760_v22 = vunpack.i.l.bf16 %v4759_v21  ;;  %v4761_v38 = vunpack.i.h.bf16 %v4759_v21 }
 0x9e6   : > { %v2999_v62 = vsel %vm2120_vm6, %v4775_v53, %v4776_v52 }
 0x9e7   : > { %v4807_v24 = vpack.i.bf16 %v4760_v22, %v2963_v16  ;;  %v5633_v25 = vpop.permute.xlu1 %4783  ;;  %v2978_v45 = vsel %vm2096_vm5, %v4756_v40, %v4760_v22  ;;  %v2976_v46 = vsel %vm2096_vm5, %v4761_v38, %v4755_v41 }
 0x9e8   : > { %v4769_v27 = vpop.permute.xlu0 %4768  ;;  %v4785_v30 = vunpack.i.l.bf16 %v5633_v25  ;;  %v4832_v57 = vpack.i.bf16 %v2978_v45, %v2977_v51  ;;  %v4837_v59 = vpack.i.bf16 %v2976_v46, %v5510_v5  ;;  %v4786_v11 = vunpack.i.h.bf16 %v5633_v25 }
 0x9e9   : > { %4808 = vrot.lane.b32.xlu1 %v4807_v24, %s5064_s24  ;;  %v4770_v32 = vunpack.i.l.bf16 %v4769_v27  ;;  %v4771_v0 = vunpack.i.h.bf16 %v4769_v27 }
 0x9ea   : > { %v3007_v17 = vsel %vm2130_vm10, %v4785_v30, %v4786_v11 }
 0x9eb   : > { %v4789_v28 = vpop.permute.xlu1 %4788  ;;  %v2989_v60 = vsel %vm2108_vm9, %v4766_v54, %v4770_v32  ;;  %v2987_v10 = vsel %vm2108_vm9, %v4771_v0, %v4765_v48 }
 0x9ec   : > { %v4779_v47 = vpop.permute.xlu0 %4778  ;;  %v4790_v31 = vunpack.i.l.bf16 %v4789_v28  ;;  %v4791_v63 = vunpack.i.h.bf16 %v4789_v28  ;;  %v4842_v6 = vpack.i.bf16 %v2989_v60, %v2988_v2 }
 0x9ed   : > { %v4780_v33 = vunpack.i.l.bf16 %v4779_v47  ;;  %v4781_v61 = vunpack.i.h.bf16 %v4779_v47 }
 0x9ee   : > { %v4817_v34 = vpack.i.bf16 %v4790_v31, %v4785_v30  ;;  %v3015_v8 = vsel %vm2139_vm7, %v4790_v31, %v4791_v63 }
 0x9ef   : > { %v4812_v35 = vpack.i.bf16 %v4780_v33, %v4770_v32  ;;  %v4794_v36 = vpop.permute.xlu1 %4793  ;;  %v3000_v58 = vsel %vm2120_vm6, %v4776_v52, %v4780_v33  ;;  %v2998_v1 = vsel %vm2120_vm6, %v4781_v61, %v4775_v53  ;;  %v4014_v32 = vld [vmem:[%s5912_s8 + $0x10] sm:$0xff] }
 0x9f0   : > { %v3006_v37 = vpop.permute.xlu0 %3005  ;;  %4818 = vrot.lane.b32.xlu0 %v4817_v34, %s5064_s24  ;;  %v4795_v43 = vunpack.i.l.bf16 %v4794_v36  ;;  %v4847_v3 = vpack.i.bf16 %v3000_v58, %v2999_v62  ;;  %v4852_v13 = vpack.i.bf16 %v2998_v1, %v2987_v10  ;;  %v4796_v18 = vunpack.i.h.bf16 %v4794_v36 }
 0x9f1   : > { %4813 = vrot.lane.b32.xlu1 %v4812_v35, %s5064_s24  ;;  %v3008_v15 = vsel %vm2130_vm10, %v4786_v11, %v3006_v37 }
 0x9f2   : > { %v4857_v20 = vpack.i.bf16 %v3008_v15, %v3007_v17  ;;  %v3023_v24 = vsel %vm2148_vm11, %v4795_v43, %v4796_v18 }
 0x9f3   : > { %v4799_v39 = vpop.permute.xlu1 %4798 }
 0x9f4   : > { %v3014_v42 = vpop.permute.xlu0 %3013  ;;  %v4800_v44 = vunpack.i.l.bf16 %v4799_v39  ;;  %v4801_v9 = vunpack.i.h.bf16 %v4799_v39 }
 0x9f5   : > { %v4822_v49 = vpack.i.bf16 %v3014_v42, %v3006_v37  ;;  %v3016_v4 = vsel %vm2139_vm7, %v4791_v63, %v3014_v42 }
 0x9f6   : > { %v4827_v50 = vpack.i.bf16 %v4800_v44, %v4795_v43  ;;  %v4862_v12 = vpack.i.bf16 %v3016_v4, %v3015_v8  ;;  %v3031_v16 = vsel %vm2157_vm8, %v4800_v44, %v4801_v9 }
 0x9f7   : > { %4823 = vrot.lane.b32.xlu1 %v4822_v49, %s5064_s24  ;;  %v3034_v22 = vpop.permute.xlu1 %3033 }
 0x9f8   : > { %4828 = vrot.lane.b32.xlu0 %v4827_v50, %s5064_s24  ;;  %v3022_v55 = vpop.permute.xlu0 %3021 }
 0x9f9   : > { %v3024_v21 = vsel %vm2148_vm11, %v4796_v18, %v3022_v55 }
 0x9fa   : > { %v4867_v27 = vpack.i.bf16 %v3024_v21, %v3023_v24 }
 0x9fb   : > { %4833 = vrot.lane.b32.xlu1 %v4832_v57, %s5064_s24  ;;  %v3038_v47 = vpop.permute.xlu1 %3037 }
 0x9fc   : > { %4838 = vrot.lane.b32.xlu0 %v4837_v59, %s5064_s24  ;;  %v3030_v7 = vpop.permute.xlu0 %3029 }
 0x9fd   : > { %v3032_v14 = vsel %vm2157_vm8, %v4801_v9, %v3030_v7  ;;  %v4877_v25 = vpack.i.bf16 %v3030_v7, %v3022_v55 }
 0x9fe   : > { %v4872_v19 = vpack.i.bf16 %v3032_v14, %v3031_v16 }
 0x9ff   : > { %4848 = vrot.lane.b32.xlu1 %v4847_v3, %s5064_s24 }
 0xa00   : > { %4843 = vrot.lane.b32.xlu0 %v4842_v6, %s5064_s24  ;;  %v3036_v28 = vpop.permute.xlu0 %3035 }
 0xa01   : > { %v3040_v30 = vsel %vm2166_vm12, %v3036_v28, %v3038_v47  ;;  %v3039_v31 = vsel %vm2166_vm12, %v3034_v22, %v3036_v28 }
 0xa03   : > { %4863 = vrot.lane.b32.xlu1 %v4862_v12, %s5064_s24 }
 0xa04   : > { %4853 = vrot.lane.b32.xlu0 %v4852_v13, %s5064_s24  ;;  %v4804_v34 = vpop.permute.xlu0 %4803 }
 0xa05   : > { %v4806_v39 = vunpack.i.h.bf16 %v4804_v34  ;;  %v4805_v40 = vunpack.i.l.bf16 %v4804_v34 }
 0xa07   : > { %4873 = vrot.lane.b32.xlu1 %v4872_v19, %s5064_s24  ;;  %v3119_v53 = vsel %vm2246_vm14, %v4805_v40, %v4806_v39 }
 0xa08   : > { %4858 = vrot.lane.b32.xlu0 %v4857_v20, %s5064_s24 }
 0xa0b   : > { %4878 = vrot.lane.b32.xlu1 %v4877_v25, %s5064_s24 }
 0xa0c   : > { %4868 = vrot.lane.b32.xlu0 %v4867_v27, %s5064_s24 }
 0xa0f   : > { %3114 = vrot.lane.b32.xlu1 %v3040_v30, %s5064_s24 }
 0xa10   : > { %3112 = vrot.lane.b32.xlu0 %v3039_v31, %s5064_s24 }
 0xa13   : > { %3116 = vrot.lane.b32.xlu1 %v3038_v47, %s5064_s24 }
 0xa14   : > { %3110 = vrot.lane.b32.xlu0 %v3034_v22, %s5064_s24 }
 0xa18   : > { %3043 = vperm.xlu0 %4490, %v4014_v32  }
 0xa5b   : > { %v4809_v33 = vpop.permute.xlu1 %4808 }
 0xa5c   : > { %v4810_v41 = vunpack.i.l.bf16 %v4809_v33  ;;  %v4811_v43 = vunpack.i.h.bf16 %v4809_v33 }
 0xa5e   : > { %v3120_v51 = vsel %vm2246_vm14, %v4806_v39, %v4810_v41 }
 0xa62   : > { %v5679_v36 = vpop.permute.xlu0 %4818 }
 0xa63   : > { %v4814_v35 = vpop.permute.xlu1 %4813  ;;  %v4821_v21 = vunpack.i.h.bf16 %v5679_v36  ;;  %v4820_v22 = vunpack.i.l.bf16 %v5679_v36 }
 0xa64   : > { %v4816_v0 = vunpack.i.h.bf16 %v4814_v35  ;;  %v4815_v2 = vunpack.i.l.bf16 %v4814_v35 }
 0xa69   : > { %v5681_v37 = vpop.permute.xlu1 %4823 }
 0xa6a   : > { %v5683_v38 = vpop.permute.xlu0 %4828  ;;  %v4826_v20 = vunpack.i.h.bf16 %v5681_v37  ;;  %v4825_v27 = vunpack.i.l.bf16 %v5681_v37 }
 0xa6b   : > { %v4831_v28 = vunpack.i.h.bf16 %v5683_v38  ;;  %v4830_v31 = vunpack.i.l.bf16 %v5683_v38 }
 0xa6d   : > { %v4834_v42 = vpop.permute.xlu1 %4833 }
 0xa6e   : > { %v4836_v44 = vunpack.i.h.bf16 %v4834_v42  ;;  %v4835_v49 = vunpack.i.l.bf16 %v4834_v42  ;;  %v4839_v45 = vpop.permute.xlu0 %4838 }
 0xa6f   : > { %v4841_v50 = vunpack.i.h.bf16 %v4839_v45  ;;  %v4840_v46 = vunpack.i.l.bf16 %v4839_v45 }
 0xa70   : > { %v3123_v52 = vsel %vm2246_vm14, %v4836_v44, %v4811_v43  ;;  %v3122_v54 = vsel %vm2246_vm14, %v4835_v49, %v4836_v44 }
 0xa71   : > { %v4379_v48 = vpack.c.bf16 %v3123_v52, %v3120_v51  ;;  %v4849_v55 = vpop.permute.xlu1 %4848  ;;  %v4362_v57 = vpack.c.bf16 %v3122_v54, %v3119_v53  ;;  %v3121_v58 = vsel %vm2246_vm14, %v4841_v50, %v4835_v49  ;;  %v3118_v59 = vsel %vm2246_vm14, %v4840_v46, %v4805_v40 }
 0xa72   : > { %v4851_v60 = vunpack.i.h.bf16 %v4849_v55  ;;  %v4850_v61 = vunpack.i.l.bf16 %v4849_v55  ;;  %v4364_v62 = vpack.c.bf16 %v3121_v58, %v3118_v59  ;;  %v4844_v63 = vpop.permute.xlu0 %4843 }
 0xa73   : > { %4363 = vmatprep.subr.bf16.mxu0 %v4362_v57  ;;  %4380 = vmatpush3.bf16.msra.mxu1 %v4379_v48  ;;  %v4846_v3 = vunpack.i.h.bf16 %v4844_v63  ;;  %v4845_v4 = vunpack.i.l.bf16 %v4844_v63 }
 0xa74   : > { %4365 = vmatpush1.bf16.msra.mxu0 %v4364_v62  ;;  %4381 = vmatprep.subr.bf16.mxu1 %v5084_v56  ;;  %v3129_v6 = vsel %vm2246_vm14, %v4851_v60, %v4816_v0  ;;  %v3128_v9 = vsel %vm2246_vm14, %v4850_v61, %v4851_v60 }
 0xa75   : > { %v4864_v1 = vpop.permute.xlu1 %4863  ;;  %v3126_v7 = vsel %vm2246_vm14, %v4846_v3, %v4815_v2  ;;  %v3125_v8 = vsel %vm2246_vm14, %v4845_v4, %v4846_v3  ;;  %v4013_v2 = vld [vmem:[%s5911_s7 + $0x10] sm:$0xff] }
 0xa76   : > { %v4382_v10 = vpack.c.bf16 %v3129_v6, %v3126_v7  ;;  %v4854_v11 = vpop.permute.xlu0 %4853  ;;  %v4366_v12 = vpack.c.bf16 %v3128_v9, %v3125_v8  ;;  %v4866_v15 = vunpack.i.h.bf16 %v4864_v1  ;;  %v4865_v16 = vunpack.i.l.bf16 %v4864_v1 }
 0xa77   : > { %v4856_v13 = vunpack.i.h.bf16 %v4854_v11  ;;  %v4855_v14 = vunpack.i.l.bf16 %v4854_v11 }
 0xa78   : > { %4367 = vmatprep.subr.bf16.mxu0 %v4366_v12  ;;  %4383 = vmatpush3.bf16.msra.mxu1 %v4382_v10  ;;  %v3135_v32 = vsel %vm2246_vm14, %v4866_v15, %v4826_v20  ;;  %v3133_v35 = vsel %vm2246_vm14, %v4821_v21, %v4865_v16  ;;  %v3134_v38 = vsel %vm2246_vm14, %v4865_v16, %v4866_v15 }
 0xa79   : > { %v4874_v17 = vpop.permute.xlu1 %4873  ;;  %v3127_v18 = vsel %vm2246_vm14, %v4856_v13, %v4850_v61  ;;  %v3124_v19 = vsel %vm2246_vm14, %v4855_v14, %v4845_v4  ;;  %4384 = vmatprep.subr.bf16.mxu1 %v5084_v56 }
 0xa7a   : > { %v4368_v24 = vpack.c.bf16 %v3127_v18, %v3124_v19  ;;  %v4859_v25 = vpop.permute.xlu0 %4858  ;;  %v4876_v33 = vunpack.i.h.bf16 %v4874_v17  ;;  %v4875_v34 = vunpack.i.l.bf16 %v4874_v17 }
 0xa7b   : > { %v4861_v47 = vunpack.i.h.bf16 %v4859_v25  ;;  %v4860_v30 = vunpack.i.l.bf16 %v4859_v25  ;;  %v4016_v25 = vld [vmem:[%s5914_s10 + $0x10] sm:$0xff] }
 0xa7c   : > { %4369 = vmatpush1.bf16.msra.mxu0 %v4368_v24  ;;  %v3139_v51 = vsel %vm2246_vm14, %v4831_v28, %v4875_v34  ;;  %v3140_v53 = vsel %vm2246_vm14, %v4875_v34, %v4876_v33  ;;  %v4015_v34 = vld [vmem:[%s5913_s9 + $0x10] sm:$0xff] }
 0xa7d   : > { %v4879_v39 = vpop.permute.xlu1 %4878  ;;  %v3132_v36 = vsel %vm2246_vm14, %v4861_v47, %v4825_v27  ;;  %v3130_v40 = vsel %vm2246_vm14, %v4820_v22, %v4860_v30  ;;  %v3131_v37 = vsel %vm2246_vm14, %v4860_v30, %v4861_v47 }
 0xa7e   : > { %v4881_v41 = vunpack.i.h.bf16 %v4879_v39  ;;  %v4385_v42 = vpack.c.bf16 %v3135_v32, %v3132_v36  ;;  %v4372_v43 = vpack.c.bf16 %v3133_v35, %v3130_v40  ;;  %v4869_v44 = vpop.permute.xlu0 %4868  ;;  %v4880_v49 = vunpack.i.l.bf16 %v4879_v39 }
 0xa7f   : > { %v4871_v45 = vunpack.i.h.bf16 %v4869_v44  ;;  %v4870_v50 = vunpack.i.l.bf16 %v4869_v44  ;;  %v4370_v46 = vpack.c.bf16 %v3134_v38, %v3131_v37 }
 0xa80   : > { %v3141_v52 = vsel %vm2246_vm14, %v4876_v33, %v4881_v41  ;;  %4386 = vmatpush3.bf16.msra.mxu1 %v4385_v42 }
 0xa81   : > { %v3115_v54 = vpop.permute.xlu1 %3114  ;;  %v3138_v48 = vsel %vm2246_vm14, %v4871_v45, %v4880_v49  ;;  %v3136_v55 = vsel %vm2246_vm14, %v4830_v31, %v4870_v50  ;;  %4371 = vmatprep.subr.bf16.mxu0 %v4370_v46  ;;  %4387 = vmatprep.subr.bf16.mxu1 %v5084_v56  ;;  %v3137_v57 = vsel %vm2246_vm14, %v4870_v50, %v4871_v45 }
 0xa82   : > { %v4388_v58 = vpack.c.bf16 %v3141_v52, %v3138_v48  ;;  %v4376_v59 = vpack.c.bf16 %v3139_v51, %v3136_v55  ;;  %4373 = vmatpush1.bf16.msra.mxu0 %v4372_v43  ;;  %v3113_v60 = vpop.permute.xlu0 %3112  ;;  %v4374_v61 = vpack.c.bf16 %v3140_v53, %v3137_v57 }
 0xa83   : > { %v3143_v0 = vsel %vm2246_vm14, %v3113_v60, %v3115_v54 }
 0xa84   : > { %4375 = vmatprep.subr.bf16.mxu0 %v4374_v61  ;;  %4389 = vmatpush3.bf16.msra.mxu1 %v4388_v58 }
 0xa85   : > { %v3117_v62 = vpop.permute.xlu1 %3116  ;;  %4280 = vmatprep.subr.mxu1 %v5510_v5 }
 0xa86   : > { %4377 = vmatpush1.bf16.msra.mxu0 %v4376_v59  ;;  %v3111_v63 = vpop.permute.xlu0 %3110  ;;  %v3144_v3 = vsel %vm2246_vm14, %v3115_v54, %v3117_v62 }
 0xa87   : > { %v3142_v4 = vsel %vm2246_vm14, %v3111_v63, %v3113_v60  ;;  %3191 = vmatprep.subr.mxu0 %v3143_v0 }
 0xa88   : > { %4281 = vmatpush3.msra.mxu1 %v3144_v3 }
 0xa89   : > { %4283 = vmatmul.mubr.msk.f32.vlgmr.msra.gmra.mrb[14].mxu1 %vm2301_vm15, %v4013_v2  ;;  %4406 = vmatprep.subr.bf16.mxu1 %v5084_v56 }
 0xa8a   : > { %3192 = vmatpush1.msra.mxu0 %v3142_v4  ;;  %4303 = vmatprep.mubr.msk.f32.mxu1 %vm5085_vm13, %v5510_v5 }
 0xa8b   : > { %4017 = vmatmul.mubr.msk.f32.vlgmr.msra.gmra.mrb[14].mxu0 %vm2301_vm15, %v4013_v2 }
 0xa8c   : > { %3666 = vmatprep.mubr.f32.mxu0 %v5510_v5 }
 0xa97   : > { %v3044_v6 = vpop.permute.xlu0 %3043 }
 0xb5c   : > { %v3312_v1 = vpop.f32.mrb[14].mxu1 }
 0xb5d   : > { %v3313_v7 = vadd.f32 %v3312_v1, %v3044_v6  ;;  %v4284_v8 = vpop.f32.mrb[15].mxu1 }
 0xb5e   : > { %v3241_v9 = vpop.f32.mrb[14].mxu0 }
 0xb5f   : > { %v3318_v10 = vmul.f32 %v3313_v7, %v5455_v23  ;;  %v3242_v11 = vadd.f32 %v3241_v9, %v3044_v6  ;;  %v3243_v12 = vpop.f32.mrb[15].mxu0  ;;  %v5748_v7 = vld [vmem:[#allocation2] sm:$0xff] }
 0xb60   : > { %v3244_v13 = vadd.f32 %v3243_v12, %v3044_v6 }
 0xb61   : > { %v3316_v14 = vmul.f32 %v3242_v11, %v5457_v26  ;;  %v3326_v17 = vmul.f32 %v3318_v10, %v3318_v10  ;;  %v3320_v5 = vsel %vm406_vm0, %v3318_v10, 0.0 }
 0xb62   : > { %v3317_v15 = vmul.f32 %v3244_v13, %v5459_v29 }
 0xb63   : > { %v3324_v16 = vmul.f32 %v3316_v14, %v3316_v14  ;;  %v3328_v22 = vsel %vm406_vm0, %v3326_v17, 0.0 }
 0xb64   : > { %v3325_v18 = vmul.f32 %v3317_v15, %v3317_v15  ;;  %v3319_v19 = vadd.f32 %v3317_v15, %v3316_v14 }
 0xb66   : > { %v3321_v20 = vadd.f32 %v3320_v5, %v3319_v19  ;;  %v3327_v21 = vadd.f32 %v3325_v18, %v3324_v16 }
 0xb68   : > { %3322 = vadd.xlane.f32.xlu1 %v3321_v20  ;;  %v3329_v24 = vadd.f32 %v3328_v22, %v3327_v21 }
 0xb6a   : > { %3330 = vadd.xlane.f32.xlu0 %v3329_v24 }
 0xb79   : > { %3352 = vperm.xlu1 %4491, %v4016_v25  }
 0xbf5   : > { %v3323_v27 = vpop.xlane.xlu1 %3322 }
 0xbf6   : > { %v3332_v28 = vmul.f32 0.00390625, %v3323_v27 }
 0xbf7   : > { %v3331_v47 = vpop.xlane.xlu0 %3330 }
 0xbf8   : > { %v3333_v30 = vmul.f32 0.00390625, %v3331_v47  ;;  %v3334_v31 = vmul.f32 %v3332_v28, %v3332_v28  ;;  %v3338_v36 = vsub.f32 %v3316_v14, %v3332_v28  ;;  %v3339_v40 = vsub.f32 %v3317_v15, %v3332_v28 }
 0xbf9   : > { %v3340_v37 = vsub.f32 %v3318_v10, %v3332_v28  ;;  %v3353_v38 = vpop.permute.xlu1 %3352 }
 0xbfa   : > { %v3335_v32 = vsub.f32 %v3333_v30, %v3334_v31 }
 0xbfc   : > { %v3336_v33 = vadd.f32 1e-05, %v3335_v32 }
 0xbfe   : > { %5028 = vrsqrt.f32 %v3336_v33 }
 0xc08   : > { %v5029_v35 = vpop.eup %5028 }
 0xc09   : > { %v3341_v39 = vmul.f32 %v5029_v35, %v4015_v34 }
 0xc0b   : > { %3344 = vperm.xlu0 %4490, %v3341_v39  }
 0xc8a   : > { %v3345_v41 = vpop.permute.xlu0 %3344 }
 0xc8b   : > { %v3347_v42 = vmul.f32 %v3345_v41, %v3338_v36  ;;  %v3348_v43 = vmul.f32 %v3345_v41, %v3339_v40  ;;  %v3349_v44 = vmul.f32 %v3345_v41, %v3340_v37 }
 0xc8d   : > { %v3355_v49 = vadd.f32 %v3353_v38, %v3347_v42  ;;  %v3356_v45 = vadd.f32 %v3353_v38, %v3348_v43  ;;  %v3357_v50 = vadd.f32 %v3353_v38, %v3349_v44 }
 0xc8f   : > { %v3361_v46 = vmul.f32 0.70710677, %v3355_v49  ;;  %v3362_v51 = vmul.f32 0.70710677, %v3356_v45  ;;  %v3363_v52 = vmul.f32 0.70710677, %v3357_v50 }
 0xc90   : > { %v3358_v48 = vmul.f32 0.5, %v3355_v49  ;;  %v3359_v58 = vmul.f32 0.5, %v3356_v45  ;;  %v3360_v60 = vmul.f32 0.5, %v3357_v50 }
 0xc91   : > { %5030 = verf.f32 %v3361_v46 }
 0xc92   : > { %5032 = verf.f32 %v3362_v51 }
 0xc93   : > { %5034 = verf.f32 %v3363_v52 }
 0xc9b   : > { %v5031_v53 = vpop.eup %5030 }
 0xc9c   : > { %v5033_v54 = vpop.eup %5032  ;;  %v3367_v55 = vadd.f32 1.0, %v5031_v53 }
 0xc9d   : > { %v5035_v57 = vpop.eup %5034  ;;  %v3368_v59 = vadd.f32 1.0, %v5033_v54 }
 0xc9e   : > { %v3369_v61 = vadd.f32 1.0, %v5035_v57  ;;  %v3370_v62 = vmul.f32 %v3367_v55, %v3358_v48 }
 0xc9f   : > { %v3371_v63 = vmul.f32 %v3368_v59, %v3359_v58 }
 0xca0   : > { %v3372_v0 = vmul.f32 %v3369_v61, %v3360_v60  ;;  %v3373_v2 = vmul.f32 %v3370_v62, %v5457_v26 }
 0xca1   : > { %v3374_v3 = vmul.f32 %v3371_v63, %v5459_v29 }
 0xca2   : > { %v3375_v4 = vmul.f32 %v3372_v0, %v5455_v23  ;;  %3376 = vst [vmem:[#allocation2 + $0x8] sm:$0xff] %v3373_v2 }
 0xca3   : > { %3377 = vst [vmem:[#allocation2 + $0x10] sm:$0xff] %v3374_v3  ;;  %v4882_v6 = vpack.i.bf16 %v3374_v3, %v3373_v2 }
 0xca4   : > { %3378 = vst.msk [vmem:[#allocation2 + $0x18] sm:$0xff] %vm406_vm0, %v3375_v4 }
 0xca5   : > { %4883 = vrot.lane.b32.xlu1 %v4882_v6, %s5071_s12 }
 0xca9   : > { %4893 = vrot.lane.b32.xlu1 %v4882_v6, %s5079_s22 }
 0xcab   : > { %v3390_v1 = vld [vmem:[#allocation2 + $0x18] sm:$0xff] }
 0xcac   : > { %v4887_v8 = vpack.i.bf16 %v5748_v7, %v3390_v1 }
 0xcad   : > { %4903 = vrot.lane.b32.xlu1 %v4882_v6, %s5080_s23 }
 0xcae   : > { %4888 = vrot.lane.b32.xlu0 %v4887_v8, %s5071_s12  ;;  %s5095_s12 = smov 81  }
 0xcb1   : > { %4913 = vrot.lane.b32.xlu1 %v4882_v6, %s5067_s27 }
 0xcb2   : > { %4898 = vrot.lane.b32.xlu0 %v4887_v8, %s5079_s22  ;;  %s5096_s22 = smov 95  }
 0xcb5   : > { %4918 = vrot.lane.b32.xlu1 %v4882_v6, %s5081_s25 }
 0xcb6   : > { %4908 = vrot.lane.b32.xlu0 %v4887_v8, %s5080_s23  ;;  %s4027_s23 = sshll.u32 %s5917_s18, 4 }
 0xcb9   : > { %4923 = vrot.lane.b32.xlu1 %v4882_v6, %s5082_s26 }
 0xcba   : > { %3432 = vrot.lane.b32.xlu0 %v3390_v1, %s5067_s27 }
 0xcbd   : > { %4928 = vrot.lane.b32.xlu1 %v4882_v6, %s5068_s28 }
 0xcbe   : > { %3440 = vrot.lane.b32.xlu0 %v3390_v1, %s5081_s25 }
 0xcc1   : > { %3460 = vrot.lane.b32.xlu1 %v3373_v2, %s5083_s29 }
 0xcc2   : > { %3448 = vrot.lane.b32.xlu0 %v3390_v1, %s5082_s26 }
 0xcc5   : > { %3464 = vrot.lane.b32.xlu1 %v3390_v1, %s5083_s29 }
 0xcc6   : > { %3456 = vrot.lane.b32.xlu0 %v3390_v1, %s5068_s28 }
 0xcca   : > { %3462 = vrot.lane.b32.xlu0 %v3374_v3, %s5083_s29  ;;  %s5883_s29 = scalar_lea.vmem %s5915_s11, %s4027_s23 }
 0xcce   : > { %4933 = vrot.lane.b32.xlu0 %v4882_v6, %s5064_s24 }
 0xd17   : > { %v4884_v9 = vpop.permute.xlu1 %4883 }
 0xd18   : > { %v4886_v30 = vunpack.i.h.bf16 %v4884_v9  ;;  %v4885_v31 = vunpack.i.l.bf16 %v4884_v9 }
 0xd1a   : > { %v3404_v37 = vsel %vm2096_vm5, %v4885_v31, %v4886_v30 }
 0xd1b   : > { %v4894_v10 = vpop.permute.xlu1 %4893 }
 0xd1c   : > { %v4896_v44 = vunpack.i.h.bf16 %v4894_v10  ;;  %v4895_v38 = vunpack.i.l.bf16 %v4894_v10 }
 0xd1e   : > { %v3415_v48 = vsel %vm2108_vm9, %v4895_v38, %v4896_v44 }
 0xd1f   : > { %v4904_v11 = vpop.permute.xlu1 %4903 }
 0xd20   : > { %v4889_v12 = vpop.permute.xlu0 %4888  ;;  %v4906_v41 = vunpack.i.h.bf16 %v4904_v11  ;;  %v4905_v42 = vunpack.i.l.bf16 %v4904_v11 }
 0xd21   : > { %v4890_v13 = vunpack.i.l.bf16 %v4889_v12  ;;  %v4891_v28 = vunpack.i.h.bf16 %v4889_v12 }
 0xd22   : > { %v3426_v52 = vsel %vm2120_vm6, %v4905_v42, %v4906_v41 }
 0xd23   : > { %v4937_v14 = vpack.i.bf16 %v4890_v13, %v3390_v1  ;;  %v5767_v15 = vpop.permute.xlu1 %4913  ;;  %v3405_v39 = vsel %vm2096_vm5, %v4886_v30, %v4890_v13  ;;  %v3403_v40 = vsel %vm2096_vm5, %v4891_v28, %v4885_v31  ;;  %vm3827_vm5 = vcmask 654848  }
 0xd24   : > { %v4899_v16 = vpop.permute.xlu0 %4898  ;;  %v4915_v19 = vunpack.i.l.bf16 %v5767_v15  ;;  %v4962_v43 = vpack.i.bf16 %v3405_v39, %v3404_v37  ;;  %v4967_v45 = vpack.i.bf16 %v3403_v40, %v5748_v7  ;;  %v4916_v0 = vunpack.i.h.bf16 %v5767_v15 }
 0xd25   : > { %4938 = vrot.lane.b32.xlu1 %v4937_v14, %s5064_s24  ;;  %v4900_v20 = vunpack.i.l.bf16 %v4899_v16  ;;  %v4901_v54 = vunpack.i.h.bf16 %v4899_v16 }
 0xd26   : > { %v3434_v8 = vsel %vm2130_vm10, %v4915_v19, %v4916_v0 }
 0xd27   : > { %v4919_v17 = vpop.permute.xlu1 %4918  ;;  %v3416_v46 = vsel %vm2108_vm9, %v4896_v44, %v4900_v20  ;;  %v3414_v63 = vsel %vm2108_vm9, %v4901_v54, %v4895_v38  ;;  %vm3842_vm9 = vcmask 917248  }
 0xd28   : > { %v4909_v18 = vpop.permute.xlu0 %4908  ;;  %v4920_v5 = vunpack.i.l.bf16 %v4919_v17  ;;  %v4921_v53 = vunpack.i.h.bf16 %v4919_v17  ;;  %v4972_v57 = vpack.i.bf16 %v3416_v46, %v3415_v48 }
 0xd29   : > { %v4910_v21 = vunpack.i.l.bf16 %v4909_v18  ;;  %v4911_v51 = vunpack.i.h.bf16 %v4909_v18 }
 0xd2a   : > { %v4947_v22 = vpack.i.bf16 %v4920_v5, %v4915_v19  ;;  %v3442_v61 = vsel %vm2139_vm7, %v4920_v5, %v4921_v53 }
 0xd2b   : > { %v4942_v24 = vpack.i.bf16 %v4910_v21, %v4900_v20  ;;  %v4924_v25 = vpop.permute.xlu1 %4923  ;;  %v3427_v50 = vsel %vm2120_vm6, %v4906_v41, %v4910_v21  ;;  %v3425_v59 = vsel %vm2120_vm6, %v4911_v51, %v4905_v42  ;;  %v4020_v20 = vld [vmem:[%s5912_s8 + $0x18] sm:$0xff]  ;;  %vm3874_vm6 = vcmask 678912  }
 0xd2c   : > { %v3433_v27 = vpop.permute.xlu0 %3432  ;;  %4948 = vrot.lane.b32.xlu0 %v4947_v22, %s5064_s24  ;;  %v4925_v33 = vunpack.i.l.bf16 %v4924_v25  ;;  %v4977_v55 = vpack.i.bf16 %v3427_v50, %v3426_v52  ;;  %v4982_v3 = vpack.i.bf16 %v3425_v59, %v3414_v63  ;;  %v4926_v9 = vunpack.i.h.bf16 %v4924_v25 }
 0xd2d   : > { %4943 = vrot.lane.b32.xlu1 %v4942_v24, %s5064_s24  ;;  %v3435_v6 = vsel %vm2130_vm10, %v4916_v0, %v3433_v27  ;;  %vm3847_vm10 = vcmask 1048448  }
 0xd2e   : > { %v4987_v11 = vpack.i.bf16 %v3435_v6, %v3434_v8  ;;  %v3450_v14 = vsel %vm2148_vm11, %v4925_v33, %v4926_v9 }
 0xd2f   : > { %v4929_v47 = vpop.permute.xlu1 %4928 }
 0xd30   : > { %v3441_v32 = vpop.permute.xlu0 %3440  ;;  %v4930_v34 = vunpack.i.l.bf16 %v4929_v47  ;;  %v4931_v62 = vunpack.i.h.bf16 %v4929_v47 }
 0xd31   : > { %v4952_v35 = vpack.i.bf16 %v3441_v32, %v3433_v27  ;;  %v3443_v58 = vsel %vm2139_vm7, %v4921_v53, %v3441_v32  ;;  %vm3832_vm7 = vcmask 786048  }
 0xd32   : > { %v4957_v36 = vpack.i.bf16 %v4930_v34, %v4925_v33  ;;  %v4992_v2 = vpack.i.bf16 %v3443_v58, %v3442_v61  ;;  %v3458_v1 = vsel %vm2157_vm8, %v4930_v34, %v4931_v62 }
 0xd33   : > { %4953 = vrot.lane.b32.xlu1 %v4952_v35, %s5064_s24  ;;  %v3461_v13 = vpop.permute.xlu1 %3460 }
 0xd34   : > { %4958 = vrot.lane.b32.xlu0 %v4957_v36, %s5064_s24  ;;  %v3449_v49 = vpop.permute.xlu0 %3448 }
 0xd35   : > { %v3451_v12 = vsel %vm2148_vm11, %v4926_v9, %v3449_v49 }
 0xd36   : > { %v4997_v16 = vpack.i.bf16 %v3451_v12, %v3450_v14 }
 0xd37   : > { %4963 = vrot.lane.b32.xlu1 %v4962_v43, %s5064_s24  ;;  %v3465_v18 = vpop.permute.xlu1 %3464 }
 0xd38   : > { %4968 = vrot.lane.b32.xlu0 %v4967_v45, %s5064_s24  ;;  %v3457_v60 = vpop.permute.xlu0 %3456 }
 0xd39   : > { %v3459_v4 = vsel %vm2157_vm8, %v4931_v62, %v3457_v60  ;;  %v5007_v15 = vpack.i.bf16 %v3457_v60, %v3449_v49  ;;  %vm3839_vm8 = vcmask 793600  }
 0xd3a   : > { %v5002_v10 = vpack.i.bf16 %v3459_v4, %v3458_v1 }
 0xd3b   : > { %4978 = vrot.lane.b32.xlu1 %v4977_v55, %s5064_s24 }
 0xd3c   : > { %4973 = vrot.lane.b32.xlu0 %v4972_v57, %s5064_s24  ;;  %v3463_v17 = vpop.permute.xlu0 %3462 }
 0xd3d   : > { %v3467_v19 = vsel %vm2166_vm12, %v3463_v17, %v3465_v18  ;;  %v3466_v5 = vsel %vm2166_vm12, %v3461_v13, %v3463_v17 }
 0xd3f   : > { %4993 = vrot.lane.b32.xlu1 %v4992_v2, %s5064_s24 }
 0xd40   : > { %4983 = vrot.lane.b32.xlu0 %v4982_v3, %s5064_s24  ;;  %v4934_v22 = vpop.permute.xlu0 %4933 }
 0xd41   : > { %v4936_v47 = vunpack.i.h.bf16 %v4934_v22  ;;  %v4935_v30 = vunpack.i.l.bf16 %v4934_v22 }
 0xd43   : > { %5003 = vrot.lane.b32.xlu1 %v5002_v10, %s5064_s24  ;;  %v3546_v42 = vsel %vm2246_vm14, %v4935_v30, %v4936_v47 }
 0xd44   : > { %4988 = vrot.lane.b32.xlu0 %v4987_v11, %s5064_s24 }
 0xd47   : > { %5008 = vrot.lane.b32.xlu1 %v5007_v15, %s5064_s24 }
 0xd48   : > { %4998 = vrot.lane.b32.xlu0 %v4997_v16, %s5064_s24 }
 0xd4b   : > { %3541 = vrot.lane.b32.xlu1 %v3467_v19, %s5064_s24 }
 0xd4c   : > { %3539 = vrot.lane.b32.xlu0 %v3466_v5, %s5064_s24 }
 0xd4f   : > { %3543 = vrot.lane.b32.xlu1 %v3465_v18, %s5064_s24 }
 0xd50   : > { %3537 = vrot.lane.b32.xlu0 %v3461_v13, %s5064_s24  ;;  %s5097_s24 = smov 79  }
 0xd54   : > { %3470 = vperm.xlu0 %4490, %v4020_v20  }
 0xd97   : > { %v4939_v21 = vpop.permute.xlu1 %4938 }
 0xd98   : > { %v4940_v31 = vunpack.i.l.bf16 %v4939_v21  ;;  %v4941_v33 = vunpack.i.h.bf16 %v4939_v21 }
 0xd9a   : > { %v3547_v37 = vsel %vm2246_vm14, %v4936_v47, %v4940_v31 }
 0xd9e   : > { %v5813_v25 = vpop.permute.xlu0 %4948 }
 0xd9f   : > { %v4944_v24 = vpop.permute.xlu1 %4943  ;;  %v4951_v12 = vunpack.i.h.bf16 %v5813_v25  ;;  %v4950_v13 = vunpack.i.l.bf16 %v5813_v25 }
 0xda0   : > { %v4946_v54 = vunpack.i.h.bf16 %v4944_v24  ;;  %v4945_v48 = vunpack.i.l.bf16 %v4944_v24 }
 0xda5   : > { %v5815_v27 = vpop.permute.xlu1 %4953 }
 0xda6   : > { %v5817_v28 = vpop.permute.xlu0 %4958  ;;  %v4956_v11 = vunpack.i.h.bf16 %v5815_v27  ;;  %v4955_v16 = vunpack.i.l.bf16 %v5815_v27 }
 0xda7   : > { %v4961_v17 = vunpack.i.h.bf16 %v5817_v28  ;;  %v4960_v5 = vunpack.i.l.bf16 %v5817_v28 }
 0xda9   : > { %v4964_v32 = vpop.permute.xlu1 %4963 }
 0xdaa   : > { %v4966_v34 = vunpack.i.h.bf16 %v4964_v32  ;;  %v4965_v35 = vunpack.i.l.bf16 %v4964_v32  ;;  %v4969_v39 = vpop.permute.xlu0 %4968 }
 0xdab   : > { %v4971_v36 = vunpack.i.h.bf16 %v4969_v39  ;;  %v4970_v40 = vunpack.i.l.bf16 %v4969_v39 }
 0xdac   : > { %v3550_v41 = vsel %vm2246_vm14, %v4966_v34, %v4941_v33  ;;  %v3549_v43 = vsel %vm2246_vm14, %v4965_v35, %v4966_v34 }
 0xdad   : > { %v4407_v44 = vpack.c.bf16 %v3550_v41, %v3547_v37  ;;  %v4979_v38 = vpop.permute.xlu1 %4978  ;;  %v4390_v49 = vpack.c.bf16 %v3549_v43, %v3546_v42  ;;  %v3548_v45 = vsel %vm2246_vm14, %v4971_v36, %v4965_v35  ;;  %v3545_v50 = vsel %vm2246_vm14, %v4970_v40, %v4935_v30 }
 0xdae   : > { %v4981_v46 = vunpack.i.h.bf16 %v4979_v38  ;;  %v4980_v51 = vunpack.i.l.bf16 %v4979_v38  ;;  %v4392_v52 = vpack.c.bf16 %v3548_v45, %v3545_v50  ;;  %v4974_v53 = vpop.permute.xlu0 %4973 }
 0xdaf   : > { %4391 = vmatprep.subr.bf16.mxu0 %v4390_v49  ;;  %4408 = vmatpush3.bf16.msra.mxu1 %v4407_v44  ;;  %v4976_v55 = vunpack.i.h.bf16 %v4974_v53  ;;  %v4975_v57 = vunpack.i.l.bf16 %v4974_v53 }
 0xdb0   : > { %4393 = vmatpush1.bf16.msra.mxu0 %v4392_v52  ;;  %4409 = vmatprep.subr.bf16.mxu1 %v5084_v56  ;;  %v3556_v58 = vsel %vm2246_vm14, %v4981_v46, %v4946_v54  ;;  %v3555_v62 = vsel %vm2246_vm14, %v4980_v51, %v4981_v46 }
 0xdb1   : > { %v4994_v59 = vpop.permute.xlu1 %4993  ;;  %v3553_v60 = vsel %vm2246_vm14, %v4976_v55, %v4945_v48  ;;  %v3552_v61 = vsel %vm2246_vm14, %v4975_v57, %v4976_v55 }
 0xdb2   : > { %v4410_v63 = vpack.c.bf16 %v3556_v58, %v3553_v60  ;;  %v4984_v0 = vpop.permute.xlu0 %4983  ;;  %v4394_v2 = vpack.c.bf16 %v3555_v62, %v3552_v61  ;;  %v4996_v6 = vunpack.i.h.bf16 %v4994_v59  ;;  %v4995_v1 = vunpack.i.l.bf16 %v4994_v59 }
 0xdb3   : > { %v4986_v3 = vunpack.i.h.bf16 %v4984_v0  ;;  %v4985_v4 = vunpack.i.l.bf16 %v4984_v0 }
 0xdb4   : > { %4395 = vmatprep.subr.bf16.mxu0 %v4394_v2  ;;  %4411 = vmatpush3.bf16.msra.mxu1 %v4410_v63  ;;  %v3562_v20 = vsel %vm2246_vm14, %v4996_v6, %v4956_v11  ;;  %v3560_v24 = vsel %vm2246_vm14, %v4951_v12, %v4995_v1  ;;  %v3561_v28 = vsel %vm2246_vm14, %v4995_v1, %v4996_v6 }
 0xdb5   : > { %v5004_v8 = vpop.permute.xlu1 %5003  ;;  %v3554_v9 = vsel %vm2246_vm14, %v4986_v3, %v4980_v51  ;;  %v3551_v10 = vsel %vm2246_vm14, %v4985_v4, %v4975_v57  ;;  %4412 = vmatprep.subr.bf16.mxu1 %v5084_v56 }
 0xdb6   : > { %v4396_v14 = vpack.c.bf16 %v3554_v9, %v3551_v10  ;;  %v4989_v15 = vpop.permute.xlu0 %4988  ;;  %v5006_v21 = vunpack.i.h.bf16 %v5004_v8  ;;  %v5005_v22 = vunpack.i.l.bf16 %v5004_v8 }
 0xdb7   : > { %v4991_v18 = vunpack.i.h.bf16 %v4989_v15  ;;  %v4990_v19 = vunpack.i.l.bf16 %v4989_v15 }
 0xdb8   : > { %4397 = vmatpush1.bf16.msra.mxu0 %v4396_v14  ;;  %v3566_v37 = vsel %vm2246_vm14, %v4961_v17, %v5005_v22  ;;  %v3567_v42 = vsel %vm2246_vm14, %v5005_v22, %v5006_v21  ;;  %v4022_v14 = vld [vmem:[%s5914_s10 + $0x18] sm:$0xff] }
 0xdb9   : > { %v5009_v47 = vpop.permute.xlu1 %5008  ;;  %v3559_v25 = vsel %vm2246_vm14, %v4991_v18, %v4955_v16  ;;  %v3557_v30 = vsel %vm2246_vm14, %v4950_v13, %v4990_v19  ;;  %v3558_v27 = vsel %vm2246_vm14, %v4990_v19, %v4991_v18 }
 0xdba   : > { %v5011_v31 = vunpack.i.h.bf16 %v5009_v47  ;;  %v4413_v32 = vpack.c.bf16 %v3562_v20, %v3559_v25  ;;  %v4400_v33 = vpack.c.bf16 %v3560_v24, %v3557_v30  ;;  %v4999_v34 = vpop.permute.xlu0 %4998  ;;  %v5010_v35 = vunpack.i.l.bf16 %v5009_v47 }
 0xdbb   : > { %v5001_v39 = vunpack.i.h.bf16 %v4999_v34  ;;  %v5000_v36 = vunpack.i.l.bf16 %v4999_v34  ;;  %v4398_v40 = vpack.c.bf16 %v3561_v28, %v3558_v27 }
 0xdbc   : > { %v3568_v41 = vsel %vm2246_vm14, %v5006_v21, %v5011_v31  ;;  %4414 = vmatpush3.bf16.msra.mxu1 %v4413_v32  ;;  %v4021_v21 = vld [vmem:[%s5913_s9 + $0x18] sm:$0xff] }
 0xdbd   : > { %v3542_v43 = vpop.permute.xlu1 %3541  ;;  %v3565_v44 = vsel %vm2246_vm14, %v5001_v39, %v5010_v35  ;;  %v3563_v38 = vsel %vm2246_vm14, %v4960_v5, %v5000_v36  ;;  %4399 = vmatprep.subr.bf16.mxu0 %v4398_v40  ;;  %4415 = vmatprep.subr.bf16.mxu1 %v5084_v56  ;;  %v3564_v49 = vsel %vm2246_vm14, %v5000_v36, %v5001_v39  ;;  %v4019_v56 = vld [vmem:[%s5911_s7 + $0x18] sm:$0xff] }
 0xdbe   : > { %v4416_v45 = vpack.c.bf16 %v3568_v41, %v3565_v44  ;;  %v4404_v50 = vpack.c.bf16 %v3566_v37, %v3563_v38  ;;  %4401 = vmatpush1.bf16.msra.mxu0 %v4400_v33  ;;  %v3540_v46 = vpop.permute.xlu0 %3539  ;;  %v4402_v51 = vpack.c.bf16 %v3567_v42, %v3564_v49 }
 0xdbf   : > { %v3570_v54 = vsel %vm2246_vm14, %v3540_v46, %v3542_v43 }
 0xdc0   : > { %4403 = vmatprep.subr.bf16.mxu0 %v4402_v51  ;;  %4417 = vmatpush3.bf16.msra.mxu1 %v4416_v45 }
 0xdc1   : > { %v3544_v52 = vpop.permute.xlu1 %3543  ;;  %4301 = vmatprep.subr.mxu1 %v5748_v7 }
 0xdc2   : > { %4405 = vmatpush1.bf16.msra.mxu0 %v4404_v50  ;;  %v3538_v53 = vpop.permute.xlu0 %3537  ;;  %v3571_v48 = vsel %vm2246_vm14, %v3542_v43, %v3544_v52 }
 0xdc3   : > { %v3569_v55 = vsel %vm2246_vm14, %v3538_v53, %v3540_v46  ;;  %3618 = vmatprep.subr.mxu0 %v3570_v54 }
 0xdc4   : > { %4302 = vmatpush3.msra.mxu1 %v3571_v48 }
 0xdc5   : > { %4304 = vmatmul.mubr.msk.f32.vlgmr.msra.gmra.mrb[16].mxu1 %vm2301_vm15, %v4019_v56 }
 0xdc6   : > { %3619 = vmatpush1.msra.mxu0 %v3569_v55 }
 0xdc7   : > { %4023 = vmatmul.mubr.msk.f32.vlgmr.msra.gmra.mrb[16].mxu0 %vm2301_vm15, %v4019_v56 }
 0xdd3   : > { %v3471_v7 = vpop.permute.xlu0 %3470 }
 0xe98   : > { %v3739_v57 = vpop.f32.mrb[16].mxu1 }
 0xe99   : > { %v3740_v58 = vadd.f32 %v3739_v57, %v3471_v7  ;;  %v4305_v59 = vpop.f32.mrb[17].mxu1 }
 0xe9a   : > { %v3668_v60 = vpop.f32.mrb[16].mxu0 }
 0xe9b   : > { %v3745_v61 = vmul.f32 %v3740_v58, %v5455_v23  ;;  %v3669_v62 = vadd.f32 %v3668_v60, %v3471_v7  ;;  %v3670_v63 = vpop.f32.mrb[17].mxu0 }
 0xe9c   : > { %v3671_v0 = vadd.f32 %v3670_v63, %v3471_v7 }
 0xe9d   : > { %v3743_v2 = vmul.f32 %v3669_v62, %v5457_v26  ;;  %v3753_v6 = vmul.f32 %v3745_v61, %v3745_v61  ;;  %v3747_v9 = vsel %vm406_vm0, %v3745_v61, 0.0 }
 0xe9e   : > { %v3744_v3 = vmul.f32 %v3671_v0, %v5459_v29 }
 0xe9f   : > { %v3751_v4 = vmul.f32 %v3743_v2, %v3743_v2  ;;  %v3755_v12 = vsel %vm406_vm0, %v3753_v6, 0.0 }
 0xea0   : > { %v3752_v1 = vmul.f32 %v3744_v3, %v3744_v3  ;;  %v3746_v8 = vadd.f32 %v3744_v3, %v3743_v2 }
 0xea2   : > { %v3748_v10 = vadd.f32 %v3747_v9, %v3746_v8  ;;  %v3754_v11 = vadd.f32 %v3752_v1, %v3751_v4 }
 0xea4   : > { %3749 = vadd.xlane.f32.xlu1 %v3748_v10  ;;  %v3756_v13 = vadd.f32 %v3755_v12, %v3754_v11 }
 0xea6   : > { %3757 = vadd.xlane.f32.xlu0 %v3756_v13 }
 0xeb5   : > { %3779 = vperm.xlu1 %4491, %v4022_v14  }
 0xf31   : > { %v3750_v15 = vpop.xlane.xlu1 %3749 }
 0xf32   : > { %v3759_v16 = vmul.f32 0.00390625, %v3750_v15 }
 0xf33   : > { %v3758_v17 = vpop.xlane.xlu0 %3757 }
 0xf34   : > { %v3760_v18 = vmul.f32 0.00390625, %v3758_v17  ;;  %v3761_v19 = vmul.f32 %v3759_v16, %v3759_v16  ;;  %v3765_v47 = vsub.f32 %v3743_v2, %v3759_v16  ;;  %v3766_v25 = vsub.f32 %v3744_v3, %v3759_v16 }
 0xf35   : > { %v3780_v32 = vpop.permute.xlu1 %3779  ;;  %v3767_v39 = vsub.f32 %v3745_v61, %v3759_v16 }
 0xf36   : > { %v3762_v5 = vsub.f32 %v3760_v18, %v3761_v19 }
 0xf38   : > { %v3763_v20 = vadd.f32 1e-05, %v3762_v5 }
 0xf3a   : > { %5036 = vrsqrt.f32 %v3763_v20 }
 0xf44   : > { %v5037_v22 = vpop.eup %5036 }
 0xf45   : > { %v3768_v24 = vmul.f32 %v5037_v22, %v4021_v21 }
 0xf47   : > { %3771 = vperm.xlu0 %4490, %v3768_v24  }
 0xfc6   : > { %v3772_v30 = vpop.permute.xlu0 %3771 }
 0xfc7   : > { %v3774_v27 = vmul.f32 %v3772_v30, %v3765_v47  ;;  %v3775_v31 = vmul.f32 %v3772_v30, %v3766_v25  ;;  %v3776_v36 = vmul.f32 %v3772_v30, %v3767_v39 }
 0xfc9   : > { %v3782_v33 = vadd.f32 %v3780_v32, %v3774_v27  ;;  %v3783_v34 = vadd.f32 %v3780_v32, %v3775_v31  ;;  %v3784_v40 = vadd.f32 %v3780_v32, %v3776_v36 }
 0xfcb   : > { %v3788_v28 = vmul.f32 0.70710677, %v3782_v33  ;;  %v3789_v35 = vmul.f32 0.70710677, %v3783_v34  ;;  %v3785_v42 = vmul.f32 0.5, %v3782_v33  ;;  %v3786_v38 = vmul.f32 0.5, %v3783_v34 }
 0xfcc   : > { %v3790_v43 = vmul.f32 0.70710677, %v3784_v40  ;;  %v3787_v54 = vmul.f32 0.5, %v3784_v40 }
 0xfcd   : > { %5038 = verf.f32 %v3788_v28 }
 0xfce   : > { %5040 = verf.f32 %v3789_v35 }
 0xfcf   : > { %5042 = verf.f32 %v3790_v43 }
 0xfd7   : > { %v5039_v37 = vpop.eup %5038 }
 0xfd8   : > { %v5041_v41 = vpop.eup %5040  ;;  %v3794_v44 = vadd.f32 1.0, %v5039_v37 }
 0xfd9   : > { %v3795_v49 = vadd.f32 1.0, %v5041_v41  ;;  %v5043_v52 = vpop.eup %5042 }
 0xfda   : > { %v3797_v45 = vmul.f32 %v3794_v44, %v3785_v42  ;;  %v3796_v53 = vadd.f32 1.0, %v5043_v52 }
 0xfdb   : > { %v3798_v50 = vmul.f32 %v3795_v49, %v3786_v38 }
 0xfdc   : > { %v3800_v46 = vmul.f32 %v3797_v45, %v5457_v26  ;;  %v3799_v26 = vmul.f32 %v3796_v53, %v3787_v54 }
 0xfdd   : > { %v3801_v51 = vmul.f32 %v3798_v50, %v5459_v29 }
 0xfde   : > { %3804 = vrot.lane.b32.xlu1 %v3800_v46, %s5067_s27  ;;  %s5091_s27 = smov 85   ;;  %v3802_v29 = vmul.f32 %v3799_v26, %v5455_v23 }
 0xfdf   : > { %3849 = vrot.lane.b32.xlu0 %v3801_v51, %s5086_s16 }
 0xfe2   : > { %3809 = vrot.lane.b32.xlu1 %v3800_v46, %s5076_s19  ;;  %s5093_s19 = smov 99  }
 0xfe3   : > { %3853 = vrot.lane.b32.xlu0 %v3801_v51, %s5068_s28  ;;  %s5092_s28 = smov 83  }
 0xfe6   : > { %3814 = vrot.lane.b32.xlu1 %v3800_v46, %s5087_s20 }
 0xfe7   : > { %3857 = vrot.lane.b32.xlu0 %v3801_v51, %s5073_s14  ;;  %s5094_s14 = smov 97  }
 0xfea   : > { %3819 = vrot.lane.b32.xlu1 %v3800_v46, %s5088_s21 }
 0xfeb   : > { %3861 = vrot.lane.b32.xlu0 %v3801_v51, %s5089_s30 }
 0xfee   : > { %3824 = vrot.lane.b32.xlu1 %v3800_v46, %s5090_s13 }
 0xfef   : > { %3865 = vrot.lane.b32.xlu0 %v3801_v51, %s5091_s27 }
 0xff2   : > { %3870 = vrot.lane.b32.xlu1 %v3801_v51, %s5092_s28 }
 0xff3   : > { %3872 = vrot.lane.b32.xlu0 %v3802_v29, %s5092_s28 }
 0xff6   : > { %3829 = vrot.lane.b32.xlu1 %v3800_v46, %s5093_s19 }
 0xff7   : > { %3835 = vrot.lane.b32.xlu0 %v3800_v46, %s5094_s14 }
 0xffa   : > { %3837 = vrot.lane.b32.xlu1 %v3801_v51, %s5094_s14 }
 0xffb   : > { %3878 = vrot.lane.b32.xlu0 %v3802_v29, %s5095_s12 }
 0xffe   : > { %3844 = vrot.lane.b32.xlu1 %v3801_v51, %s5096_s22 }
 0xfff   : > { %3882 = vrot.lane.b32.xlu0 %v3802_v29, %s5097_s24 }
0x1050   : > { %v3805_v23 = vpop.permute.xlu1 %3804 }
0x1051   : > { %v3850_v56 = vpop.permute.xlu0 %3849  ;;  %3808 = vst.msk [vmem:[%s5883_s29] sm:$0xff] %vm3807_vm1, %v3805_v23 }
0x1052   : > { %3852 = vst.msk [vmem:[%s5883_s29 + $0x8] sm:$0xff] %vm3807_vm1, %v3850_v56 }
0x1054   : > { %v3810_v48 = vpop.permute.xlu1 %3809 }
0x1055   : > { %v3854_v55 = vpop.permute.xlu0 %3853  ;;  %3813 = vst.msk [vmem:[%s5883_s29] sm:$0xff] %vm3812_vm2, %v3810_v48 }
0x1056   : > { %3856 = vst.msk [vmem:[%s5883_s29 + $0x8] sm:$0xff] %vm3812_vm2, %v3854_v55 }
0x1058   : > { %v3815_v7 = vpop.permute.xlu1 %3814 }
0x1059   : > { %v3858_v57 = vpop.permute.xlu0 %3857  ;;  %3818 = vst.msk [vmem:[%s5883_s29] sm:$0xff] %vm3817_vm3, %v3815_v7 }
0x105a   : > { %3860 = vst.msk [vmem:[%s5883_s29 + $0x8] sm:$0xff] %vm3817_vm3, %v3858_v57 }
0x105c   : > { %v3820_v58 = vpop.permute.xlu1 %3819 }
0x105d   : > { %v3862_v59 = vpop.permute.xlu0 %3861  ;;  %3823 = vst.msk [vmem:[%s5883_s29] sm:$0xff] %vm3822_vm4, %v3820_v58 }
0x105e   : > { %3864 = vst.msk [vmem:[%s5883_s29 + $0x8] sm:$0xff] %vm3822_vm4, %v3862_v59 }
0x1060   : > { %v3825_v60 = vpop.permute.xlu1 %3824 }
0x1061   : > { %v3866_v61 = vpop.permute.xlu0 %3865  ;;  %3828 = vst.msk [vmem:[%s5883_s29] sm:$0xff] %vm3827_vm5, %v3825_v60 }
0x1062   : > { %3868 = vst.msk [vmem:[%s5883_s29 + $0x8] sm:$0xff] %vm3827_vm5, %v3866_v61 }
0x1064   : > { %v3871_v62 = vpop.permute.xlu1 %3870 }
0x1065   : > { %v3873_v63 = vpop.permute.xlu0 %3872 }
0x1066   : > { %v3875_v0 = vsel %vm3874_vm6, %v3871_v62, %v3873_v63 }
0x1067   : > { %3877 = vst.msk [vmem:[%s5883_s29 + $0x8] sm:$0xff] %vm3832_vm7, %v3875_v0 }
0x1068   : > { %v3830_v2 = vpop.permute.xlu1 %3829 }
0x1069   : > { %v3836_v3 = vpop.permute.xlu0 %3835  ;;  %3833 = vst.msk [vmem:[%s5883_s29] sm:$0xff] %vm3832_vm7, %v3830_v2 }
0x106c   : > { %v3838_v4 = vpop.permute.xlu1 %3837 }
0x106d   : > { %v3879_v6 = vpop.permute.xlu0 %3878  ;;  %v3840_v1 = vsel %vm3839_vm8, %v3836_v3, %v3838_v4 }
0x106e   : > { %3881 = vst.msk [vmem:[%s5883_s29 + $0x8] sm:$0xff] %vm3842_vm9, %v3879_v6  ;;  %3843 = vst.msk [vmem:[%s5883_s29] sm:$0xff] %vm3842_vm9, %v3840_v1 }
0x1070   : > { %v3845_v8 = vpop.permute.xlu1 %3844 }
0x1071   : > { %v3883_v9 = vpop.permute.xlu0 %3882  ;;  %3848 = vst.msk [vmem:[%s5883_s29] sm:$0xff] %vm3847_vm10, %v3845_v8 }
0x1072   : > { %3885 = vst.msk [vmem:[%s5883_s29 + $0x8] sm:$0xff] %vm3847_vm10, %v3883_v9 }
0x1073 PF: > { %s21_s17 = sadd.s32 1, %s5052_s17  }
0x1074   : > { %p18_p4 = scmp.ge.s32.totalorder %s21_s17, 4  }
0x1076   :  { %20 = sbr.rel (!%p18_p4) target bundleno = 1 (0x1), region = 110 }

</bundles_post_ra>
